<compile_context>
chip_gen: v7x
topology: tpu7x:2x2x1
jax: 0.10.0
libtpu: 0.0.40
codegen_flags: <defaults>
</compile_context>

<pallas_src>
import jax
import jax.numpy as jnp
from jax.experimental import pallas as pl
from jax.experimental.pallas import tpu as pltpu

HIDDEN = 128      # hidden_dim in the PyTorch module
L_SEQ = 512       # RNA sequence length (rna_out_seq)
L_GRAPH = 128     # RNA graph length (rna_out_graph)
L_MSEQ = 128      # molecule sequence length
L_MGRAPH = 128    # molecule graph length

# ----------------------------------------------------------------------------
# Packing layout for all small (sub-KB) tensors: one lane-dense (1, N) f32.
# Every offset / size is a multiple of 128 -> lane-tile aligned slices.
# ----------------------------------------------------------------------------
_PACK_SIZES = (
    ("rna_w_row", L_SEQ + L_GRAPH),     # fused mask*scale row for out_rna
    ("mole_w_row", L_MSEQ + L_MGRAPH),  # fused mask*scale row for out_mole
    ("mseq_w_row", L_MSEQ),             # mask*scale row for mole_seq_emb
    ("rna_final_pre", HIDDEN),          # (rna_seq_final + rna_graph_final)/4
    ("mole_final_pre", HIDDEN),         # mole_graph_final/4
    ("rna1_b", 4 * HIDDEN),
    ("mole1_b", 4 * HIDDEN),
    ("rna2_b", HIDDEN),
    ("mole2_b", HIDDEN),
    ("line1_b", 1024),
    ("line2_b", 512),
    ("line3_w_row", 512),               # line3 weight stored lane-dense (1,512)
)
_PACK_OFF = {}
_off = 0
for _name, _size in _PACK_SIZES:
    _PACK_OFF[_name] = (_off, _size)
    _off += _size
PACK_TOTAL = _off                       # 4608 = 36 * 128


def _pk(small_ref, name):
    """Lane-aligned static slice of the packed small-tensor array."""
    off, size = _PACK_OFF[name]
    return small_ref[:, off:off + size]


# ----------------------------------------------------------------------------
# Kernel
# ----------------------------------------------------------------------------
def deeprsma_head_kernel(
    out_rna_ref,        # (640, 128) bf16  cross-attn context, RNA (seq ++ graph)
    out_mole_ref,       # (256, 128) bf16  cross-attn context, molecule
    mole_seq_emb_ref,   # (128, 128) bf16  mole_seq_emb[-1]
    small_ref,          # (1, 4608) f32    packed masks/finals/biases/line3 row
    mlp1_w_ref,         # (256, 512) bf16  [rna1_w ; mole1_w]
    mlp2_w_ref,         # (1024, 128) bf16 [rna2_w ; mole2_w]
    line1_w_ref,        # (256, 1024) bf16 rows 0:128 -> rna_cross, 128:256 -> mole
    line2_w_ref,        # (1024, 512) bf16
    line3_b_ref,        # (1, 1) f32 in SMEM
    out_ref,            # (1, 1) f32
):
    f32 = jnp.float32
    bf16 = jnp.bfloat16

    # --- fused masked means (bf16 matvecs, f32 accumulation) -----------------
    # rna_cross (pre-MLP) = (rna_seq_final + rna_graph_final)/4 + w_row @ out_rna
    # where w_row = [mask_seq/(4*512), mask_graph/(4*128)]   (built host-side;
    # the scales are exact powers of two in bf16).
    rna_pre = _pk(small_ref, "rna_final_pre") + jnp.dot(
        _pk(small_ref, "rna_w_row").astype(bf16), out_rna_ref[...],
        preferred_element_type=f32)

    # mole_cross (pre-MLP) = mole_graph_final/4
    #                        + [mask_seq, mask_graph]/(4*128) @ out_mole
    #                        + mask_seq/(4*128) @ mole_seq_emb
    mole_pre = (_pk(small_ref, "mole_final_pre")
                + jnp.dot(_pk(small_ref, "mole_w_row").astype(bf16),
                          out_mole_ref[...], preferred_element_type=f32)
                + jnp.dot(_pk(small_ref, "mseq_w_row").astype(bf16),
                          mole_seq_emb_ref[...], preferred_element_type=f32))

    # --- branch MLPs (bf16 weights, f32 accumulate; dropout=identity eval) ---
    h = jnp.dot(rna_pre.astype(bf16), mlp1_w_ref[0:HIDDEN, :],
                preferred_element_type=f32) + _pk(small_ref, "rna1_b")
    h = jnp.maximum(h, 0.0)
    rna_cross = jnp.dot(h.astype(bf16), mlp2_w_ref[0:4 * HIDDEN, :],
                        preferred_element_type=f32) + _pk(small_ref, "rna2_b")

    h = jnp.dot(mole_pre.astype(bf16), mlp1_w_ref[HIDDEN:2 * HIDDEN, :],
                preferred_element_type=f32) + _pk(small_ref, "mole1_b")
    h = jnp.maximum(h, 0.0)
    mole_cross = jnp.dot(h.astype(bf16), mlp2_w_ref[4 * HIDDEN:8 * HIDDEN, :],
                         preferred_element_type=f32) + _pk(small_ref, "mole2_b")

    # --- prediction head (line1 split avoids the lane concat) ----------------
    h1 = (jnp.dot(rna_cross.astype(bf16), line1_w_ref[0:HIDDEN, :],
                  preferred_element_type=f32)
          + jnp.dot(mole_cross.astype(bf16), line1_w_ref[HIDDEN:2 * HIDDEN, :],
                    preferred_element_type=f32)
          + _pk(small_ref, "line1_b"))
    h1 = jnp.maximum(h1, 0.0)

    h2 = jnp.maximum(
        jnp.dot(h1.astype(bf16), line2_w_ref[...],
                preferred_element_type=f32) + _pk(small_ref, "line2_b"),
        0.0)

    # --- line3 as lane-dense row: VPU multiply + lane reduce + scalar bias ---
    out = jnp.sum(h2 * _pk(small_ref, "line3_w_row"), axis=1, keepdims=True)
    out_ref[...] = out + line3_b_ref[0, 0]


def deeprsma_head(kernel_args):
    """kernel_args: list of arrays in kernel argument order (last one is SMEM)."""
    vmem = pl.BlockSpec(memory_space=pltpu.MemorySpace.VMEM)
    smem = pl.BlockSpec(memory_space=pltpu.MemorySpace.SMEM)
    in_specs = [vmem] * (len(kernel_args) - 1) + [smem]
    return pl.pallas_call(
        deeprsma_head_kernel,
        out_shape=jax.ShapeDtypeStruct((1, 1), jnp.float32),
        in_specs=in_specs,
        out_specs=vmem,
        compiler_params=pltpu.CompilerParams(
            vmem_limit_bytes=16 * 1024 * 1024),   # fits v5e/v6e/v7x (64 MiB phys)
    )(*kernel_args)


# ----------------------------------------------------------------------------
# Pure-JAX reference (unfused math, same bf16 weight/context precision policy)
# ----------------------------------------------------------------------------
def reference_jnp(raw):
    f32 = jnp.float32
    bf16 = jnp.bfloat16

    def lin(x, w, b):
        return jnp.dot(x.astype(bf16), w.astype(bf16),
                       preferred_element_type=f32) + b

    def q(a):   # contexts are streamed to the kernel as bf16
        return a.astype(bf16).astype(f32)

    out_rna = q(raw["out_rna"])
    out_mole = q(raw["out_mole"])
    mole_seq_emb = q(raw["mole_seq_emb"])

    mean_rna_seq = jnp.mean(out_rna[:L_SEQ] * raw["rna_mask_seq"][:, None],
                            axis=0, keepdims=True)
    mean_rna_graph = jnp.mean(out_rna[L_SEQ:] * raw["rna_mask_graph"][:, None],
                              axis=0, keepdims=True)
    rna_cross = ((mean_rna_seq + raw["rna_seq_final"]) / 2
                 + (mean_rna_graph + raw["rna_graph_final"]) / 2) / 2
    rna_cross = lin(jnp.maximum(lin(rna_cross, raw["rna1_w"], raw["rna1_b"]), 0.0),
                    raw["rna2_w"], raw["rna2_b"])

    mole_seq_final = jnp.mean(mole_seq_emb * raw["mole_mask_seq"][:, None],
                              axis=0, keepdims=True)
    mean_mole_seq = jnp.mean(out_mole[:L_MSEQ] * raw["mole_mask_seq"][:, None],
                             axis=0, keepdims=True)
    mean_mole_graph = jnp.mean(out_mole[L_MSEQ:] * raw["mole_mask_graph"][:, None],
                               axis=0, keepdims=True)
    mole_cross = ((mean_mole_seq + mole_seq_final) / 2
                  + (mean_mole_graph + raw["mole_graph_final"]) / 2) / 2
    mole_cross = lin(jnp.maximum(lin(mole_cross, raw["mole1_w"], raw["mole1_b"]), 0.0),
                     raw["mole2_w"], raw["mole2_b"])

    cat = jnp.concatenate([rna_cross, mole_cross], axis=1)
    h1 = jnp.maximum(lin(cat, raw["line1_w"], raw["line1_b"]), 0.0)
    h2 = jnp.maximum(lin(h1, raw["line2_w"], raw["line2_b"]), 0.0)
    return h2 @ raw["line3_w"] + raw["line3_b"]


# ----------------------------------------------------------------------------
# Deterministic inputs
# ----------------------------------------------------------------------------
def make_inputs():
    key = jax.random.PRNGKey(0)
    ks = jax.random.split(key, 24)
    kit = iter(ks)

    def rnd(shape, scale=0.05):
        return (scale * jax.random.normal(next(kit), shape)).astype(jnp.float32)

    # Synthesized sub-model outputs (deterministic), batch=1 squeezed.
    out_rna = rnd((L_SEQ + L_GRAPH, HIDDEN))
    out_mole = rnd((L_MSEQ + L_MGRAPH, HIDDEN))
    mole_seq_emb = rnd((L_MSEQ, HIDDEN))

    # Masks exactly as DeepRSMA.forward builds them (ones up to length, then 0).
    rna_len, mole_seq_len, mole_graph_len = 200, 60, 40
    graph_len = min(rna_len, L_GRAPH)
    rna_mask_seq = (jnp.arange(L_SEQ) < rna_len).astype(jnp.float32)
    rna_mask_graph = (jnp.arange(L_GRAPH) < graph_len).astype(jnp.float32)
    mole_mask_seq = (jnp.arange(L_MSEQ) < mole_seq_len).astype(jnp.float32)
    mole_mask_graph = (jnp.arange(L_MGRAPH) < mole_graph_len).astype(jnp.float32)

    rna_seq_final = rnd((1, HIDDEN))     # rna_batch.emb
    rna_graph_final = rnd((1, HIDDEN))   # RNA_feature_extraction output
    mole_graph_final = rnd((1, HIDDEN))  # GNN_molecule output

    # Linear layers: weights stored (in, out), biases (1, out).
    def linear(din, dout):
        w = rnd((din, dout), scale=float(din) ** -0.5)
        b = rnd((1, dout), scale=0.01)
        return w, b

    rna1_w, rna1_b = linear(HIDDEN, HIDDEN * 4)
    rna2_w, rna2_b = linear(HIDDEN * 4, HIDDEN)
    mole1_w, mole1_b = linear(HIDDEN, HIDDEN * 4)
    mole2_w, mole2_b = linear(HIDDEN * 4, HIDDEN)
    line1_w, line1_b = linear(HIDDEN * 2, 1024)
    line2_w, line2_b = linear(1024, 512)
    line3_w, line3_b = linear(512, 1)

    raw = dict(out_rna=out_rna, out_mole=out_mole, mole_seq_emb=mole_seq_emb,
               rna_mask_seq=rna_mask_seq, rna_mask_graph=rna_mask_graph,
               mole_mask_seq=mole_mask_seq, mole_mask_graph=mole_mask_graph,
               rna_seq_final=rna_seq_final, rna_graph_final=rna_graph_final,
               mole_graph_final=mole_graph_final,
               rna1_w=rna1_w, rna1_b=rna1_b, rna2_w=rna2_w, rna2_b=rna2_b,
               mole1_w=mole1_w, mole1_b=mole1_b, mole2_w=mole2_w, mole2_b=mole2_b,
               line1_w=line1_w, line1_b=line1_b, line2_w=line2_w, line2_b=line2_b,
               line3_w=line3_w, line3_b=line3_b)

    # --- fused mask*scale rows (means folded into M=1 matvecs) ---------------
    rna_w_row = jnp.concatenate(
        [rna_mask_seq * (1.0 / (4.0 * L_SEQ)),
         rna_mask_graph * (1.0 / (4.0 * L_GRAPH))])[None, :]          # (1, 640)
    mole_w_row = jnp.concatenate(
        [mole_mask_seq * (1.0 / (4.0 * L_MSEQ)),
         mole_mask_graph * (1.0 / (4.0 * L_MGRAPH))])[None, :]        # (1, 256)
    mseq_w_row = (mole_mask_seq * (1.0 / (4.0 * L_MSEQ)))[None, :]    # (1, 128)

    pieces = {
        "rna_w_row": rna_w_row, "mole_w_row": mole_w_row, "mseq_w_row": mseq_w_row,
        "rna_final_pre": (rna_seq_final + rna_graph_final) * 0.25,    # pre-folded
        "mole_final_pre": mole_graph_final * 0.25,                    # pre-folded
        "rna1_b": rna1_b, "mole1_b": mole1_b, "rna2_b": rna2_b, "mole2_b": mole2_b,
        "line1_b": line1_b, "line2_b": line2_b,
        "line3_w_row": line3_w.T,                                     # (1, 512)
    }
    small = jnp.concatenate([pieces[n] for n, _ in _PACK_SIZES],
                            axis=1).astype(jnp.float32)
    assert small.shape == (1, PACK_TOTAL)

    bf16 = jnp.bfloat16
    kernel_args = [
        out_rna.astype(bf16),                                    # (640, 128)
        out_mole.astype(bf16),                                   # (256, 128)
        mole_seq_emb.astype(bf16),                               # (128, 128)
        small,                                                   # (1, 4608) f32
        jnp.concatenate([rna1_w, mole1_w], axis=0).astype(bf16), # (256, 512)
        jnp.concatenate([rna2_w, mole2_w], axis=0).astype(bf16), # (1024, 128)
        line1_w.astype(bf16),                                    # (256, 1024)
        line2_w.astype(bf16),                                    # (1024, 512)
        line3_b.astype(jnp.float32),                             # (1, 1) -> SMEM
    ]
    return raw, kernel_args


if __name__ == "__main__":
    raw, kernel_args = make_inputs()

    out = deeprsma_head(kernel_args)
    out = jax.block_until_ready(out)

    ref = reference_jnp(raw)
    assert out.shape == (1, 1)
    assert jnp.allclose(out, ref, atol=1e-3, rtol=1e-2), (out, ref)
    print("KERNEL_OK")
</pallas_src>

<mosaic_0001>
module attributes {stable_mosaic.version = 11 : i64} {
  func.func @deeprsma_head_kernel(%arg0: memref<640x128xbf16, #tpu.memory_space<vmem>>, %arg1: memref<256x128xbf16, #tpu.memory_space<vmem>>, %arg2: memref<128x128xbf16, #tpu.memory_space<vmem>>, %arg3: memref<1x4608xf32, #tpu.memory_space<vmem>>, %arg4: memref<256x512xbf16, #tpu.memory_space<vmem>>, %arg5: memref<1024x128xbf16, #tpu.memory_space<vmem>>, %arg6: memref<256x1024xbf16, #tpu.memory_space<vmem>>, %arg7: memref<1024x512xbf16, #tpu.memory_space<vmem>>, %arg8: memref<1x1xf32, #tpu.memory_space<smem>>, %arg9: memref<1x1xf32, #tpu.memory_space<vmem>>) attributes {dimension_semantics = [], scalar_prefetch = 0 : i64, scratch_operands = 0 : i64, tpu.core_type = #tpu.core_type<tc>} {
    %c0 = arith.constant 0 : index
    %c1024 = arith.constant 1024 : index
    %0 = vector.load %arg3[%c0, %c1024] : memref<1x4608xf32, #tpu.memory_space<vmem>>, vector<1x128xf32>
    %c0_0 = arith.constant 0 : index
    %c0_1 = arith.constant 0 : index
    %1 = vector.load %arg3[%c0_0, %c0_1] : memref<1x4608xf32, #tpu.memory_space<vmem>>, vector<1x640xf32>
    %2 = arith.truncf %1 : vector<1x640xf32> to vector<1x640xbf16>
    %c0_2 = arith.constant 0 : index
    %c0_3 = arith.constant 0 : index
    %3 = vector.load %arg0[%c0_2, %c0_3] : memref<640x128xbf16, #tpu.memory_space<vmem>>, vector<640x128xbf16>
    %cst = arith.constant dense<0.000000e+00> : vector<1x128xf32>
    %4 = tpu.matmul %2, %3, %cst {dimension_numbers = #tpu.dot_dimension_numbers<[1], [0], [0], [1], [0, 0, 1, 1], [], []>} : vector<1x640xbf16>, vector<640x128xbf16>, vector<1x128xf32> -> vector<1x128xf32>
    %5 = arith.addf %0, %4 : vector<1x128xf32>
    %c0_4 = arith.constant 0 : index
    %c1152 = arith.constant 1152 : index
    %6 = vector.load %arg3[%c0_4, %c1152] : memref<1x4608xf32, #tpu.memory_space<vmem>>, vector<1x128xf32>
    %c0_5 = arith.constant 0 : index
    %c640 = arith.constant 640 : index
    %7 = vector.load %arg3[%c0_5, %c640] : memref<1x4608xf32, #tpu.memory_space<vmem>>, vector<1x256xf32>
    %8 = arith.truncf %7 : vector<1x256xf32> to vector<1x256xbf16>
    %c0_6 = arith.constant 0 : index
    %c0_7 = arith.constant 0 : index
    %9 = vector.load %arg1[%c0_6, %c0_7] : memref<256x128xbf16, #tpu.memory_space<vmem>>, vector<256x128xbf16>
    %cst_8 = arith.constant dense<0.000000e+00> : vector<1x128xf32>
    %10 = tpu.matmul %8, %9, %cst_8 {dimension_numbers = #tpu.dot_dimension_numbers<[1], [0], [0], [1], [0, 0, 1, 1], [], []>} : vector<1x256xbf16>, vector<256x128xbf16>, vector<1x128xf32> -> vector<1x128xf32>
    %11 = arith.addf %6, %10 : vector<1x128xf32>
    %c0_9 = arith.constant 0 : index
    %c896 = arith.constant 896 : index
    %12 = vector.load %arg3[%c0_9, %c896] : memref<1x4608xf32, #tpu.memory_space<vmem>>, vector<1x128xf32>
    %13 = arith.truncf %12 : vector<1x128xf32> to vector<1x128xbf16>
    %c0_10 = arith.constant 0 : index
    %c0_11 = arith.constant 0 : index
    %14 = vector.load %arg2[%c0_10, %c0_11] : memref<128x128xbf16, #tpu.memory_space<vmem>>, vector<128x128xbf16>
    %cst_12 = arith.constant dense<0.000000e+00> : vector<1x128xf32>
    %15 = tpu.matmul %13, %14, %cst_12 {dimension_numbers = #tpu.dot_dimension_numbers<[1], [0], [0], [1], [0, 0, 1, 1], [], []>} : vector<1x128xbf16>, vector<128x128xbf16>, vector<1x128xf32> -> vector<1x128xf32>
    %16 = arith.addf %11, %15 : vector<1x128xf32>
    %17 = arith.truncf %5 : vector<1x128xf32> to vector<1x128xbf16>
    %c0_13 = arith.constant 0 : index
    %c0_14 = arith.constant 0 : index
    %18 = vector.load %arg4[%c0_13, %c0_14] : memref<256x512xbf16, #tpu.memory_space<vmem>>, vector<128x512xbf16>
    %cst_15 = arith.constant dense<0.000000e+00> : vector<1x512xf32>
    %19 = tpu.matmul %17, %18, %cst_15 {dimension_numbers = #tpu.dot_dimension_numbers<[1], [0], [0], [1], [0, 0, 1, 1], [], []>} : vector<1x128xbf16>, vector<128x512xbf16>, vector<1x512xf32> -> vector<1x512xf32>
    %c0_16 = arith.constant 0 : index
    %c1280 = arith.constant 1280 : index
    %20 = vector.load %arg3[%c0_16, %c1280] : memref<1x4608xf32, #tpu.memory_space<vmem>>, vector<1x512xf32>
    %21 = arith.addf %19, %20 : vector<1x512xf32>
    %cst_17 = arith.constant 0.000000e+00 : f32
    %22 = vector.broadcast %cst_17 : f32 to vector<1x512xf32>
    %23 = arith.maximumf %21, %22 : vector<1x512xf32>
    %24 = arith.truncf %23 : vector<1x512xf32> to vector<1x512xbf16>
    %c0_18 = arith.constant 0 : index
    %c0_19 = arith.constant 0 : index
    %25 = vector.load %arg5[%c0_18, %c0_19] : memref<1024x128xbf16, #tpu.memory_space<vmem>>, vector<512x128xbf16>
    %cst_20 = arith.constant dense<0.000000e+00> : vector<1x128xf32>
    %26 = tpu.matmul %24, %25, %cst_20 {dimension_numbers = #tpu.dot_dimension_numbers<[1], [0], [0], [1], [0, 0, 1, 1], [], []>} : vector<1x512xbf16>, vector<512x128xbf16>, vector<1x128xf32> -> vector<1x128xf32>
    %c0_21 = arith.constant 0 : index
    %c2304 = arith.constant 2304 : index
    %27 = vector.load %arg3[%c0_21, %c2304] : memref<1x4608xf32, #tpu.memory_space<vmem>>, vector<1x128xf32>
    %28 = arith.addf %26, %27 : vector<1x128xf32>
    %29 = arith.truncf %16 : vector<1x128xf32> to vector<1x128xbf16>
    %c128 = arith.constant 128 : index
    %c0_22 = arith.constant 0 : index
    %30 = vector.load %arg4[%c128, %c0_22] : memref<256x512xbf16, #tpu.memory_space<vmem>>, vector<128x512xbf16>
    %cst_23 = arith.constant dense<0.000000e+00> : vector<1x512xf32>
    %31 = tpu.matmul %29, %30, %cst_23 {dimension_numbers = #tpu.dot_dimension_numbers<[1], [0], [0], [1], [0, 0, 1, 1], [], []>} : vector<1x128xbf16>, vector<128x512xbf16>, vector<1x512xf32> -> vector<1x512xf32>
    %c0_24 = arith.constant 0 : index
    %c1792 = arith.constant 1792 : index
    %32 = vector.load %arg3[%c0_24, %c1792] : memref<1x4608xf32, #tpu.memory_space<vmem>>, vector<1x512xf32>
    %33 = arith.addf %31, %32 : vector<1x512xf32>
    %cst_25 = arith.constant 0.000000e+00 : f32
    %34 = vector.broadcast %cst_25 : f32 to vector<1x512xf32>
    %35 = arith.maximumf %33, %34 : vector<1x512xf32>
    %36 = arith.truncf %35 : vector<1x512xf32> to vector<1x512xbf16>
    %c512 = arith.constant 512 : index
    %c0_26 = arith.constant 0 : index
    %37 = vector.load %arg5[%c512, %c0_26] : memref<1024x128xbf16, #tpu.memory_space<vmem>>, vector<512x128xbf16>
    %cst_27 = arith.constant dense<0.000000e+00> : vector<1x128xf32>
    %38 = tpu.matmul %36, %37, %cst_27 {dimension_numbers = #tpu.dot_dimension_numbers<[1], [0], [0], [1], [0, 0, 1, 1], [], []>} : vector<1x512xbf16>, vector<512x128xbf16>, vector<1x128xf32> -> vector<1x128xf32>
    %c0_28 = arith.constant 0 : index
    %c2432 = arith.constant 2432 : index
    %39 = vector.load %arg3[%c0_28, %c2432] : memref<1x4608xf32, #tpu.memory_space<vmem>>, vector<1x128xf32>
    %40 = arith.addf %38, %39 : vector<1x128xf32>
    %41 = arith.truncf %28 : vector<1x128xf32> to vector<1x128xbf16>
    %c0_29 = arith.constant 0 : index
    %c0_30 = arith.constant 0 : index
    %42 = vector.load %arg6[%c0_29, %c0_30] : memref<256x1024xbf16, #tpu.memory_space<vmem>>, vector<128x1024xbf16>
    %cst_31 = arith.constant dense<0.000000e+00> : vector<1x1024xf32>
    %43 = tpu.matmul %41, %42, %cst_31 {dimension_numbers = #tpu.dot_dimension_numbers<[1], [0], [0], [1], [0, 0, 1, 1], [], []>} : vector<1x128xbf16>, vector<128x1024xbf16>, vector<1x1024xf32> -> vector<1x1024xf32>
    %44 = arith.truncf %40 : vector<1x128xf32> to vector<1x128xbf16>
    %c128_32 = arith.constant 128 : index
    %c0_33 = arith.constant 0 : index
    %45 = vector.load %arg6[%c128_32, %c0_33] : memref<256x1024xbf16, #tpu.memory_space<vmem>>, vector<128x1024xbf16>
    %cst_34 = arith.constant dense<0.000000e+00> : vector<1x1024xf32>
    %46 = tpu.matmul %44, %45, %cst_34 {dimension_numbers = #tpu.dot_dimension_numbers<[1], [0], [0], [1], [0, 0, 1, 1], [], []>} : vector<1x128xbf16>, vector<128x1024xbf16>, vector<1x1024xf32> -> vector<1x1024xf32>
    %47 = arith.addf %43, %46 : vector<1x1024xf32>
    %c0_35 = arith.constant 0 : index
    %c2560 = arith.constant 2560 : index
    %48 = vector.load %arg3[%c0_35, %c2560] : memref<1x4608xf32, #tpu.memory_space<vmem>>, vector<1x1024xf32>
    %49 = arith.addf %47, %48 : vector<1x1024xf32>
    %cst_36 = arith.constant 0.000000e+00 : f32
    %50 = vector.broadcast %cst_36 : f32 to vector<1x1024xf32>
    %51 = arith.maximumf %49, %50 : vector<1x1024xf32>
    %52 = arith.truncf %51 : vector<1x1024xf32> to vector<1x1024xbf16>
    %c0_37 = arith.constant 0 : index
    %c0_38 = arith.constant 0 : index
    %53 = vector.load %arg7[%c0_37, %c0_38] : memref<1024x512xbf16, #tpu.memory_space<vmem>>, vector<1024x512xbf16>
    %cst_39 = arith.constant dense<0.000000e+00> : vector<1x512xf32>
    %54 = tpu.matmul %52, %53, %cst_39 {dimension_numbers = #tpu.dot_dimension_numbers<[1], [0], [0], [1], [0, 0, 1, 1], [], []>} : vector<1x1024xbf16>, vector<1024x512xbf16>, vector<1x512xf32> -> vector<1x512xf32>
    %c0_40 = arith.constant 0 : index
    %c3584 = arith.constant 3584 : index
    %55 = vector.load %arg3[%c0_40, %c3584] : memref<1x4608xf32, #tpu.memory_space<vmem>>, vector<1x512xf32>
    %56 = arith.addf %54, %55 : vector<1x512xf32>
    %cst_41 = arith.constant 0.000000e+00 : f32
    %57 = vector.broadcast %cst_41 : f32 to vector<1x512xf32>
    %58 = arith.maximumf %56, %57 : vector<1x512xf32>
    %c0_42 = arith.constant 0 : index
    %c4096 = arith.constant 4096 : index
    %59 = vector.load %arg3[%c0_42, %c4096] : memref<1x4608xf32, #tpu.memory_space<vmem>>, vector<1x512xf32>
    %60 = arith.mulf %58, %59 : vector<1x512xf32>
    %cst_43 = arith.constant dense<0.000000e+00> : vector<1xf32>
    %61 = vector.multi_reduction <add>, %60, %cst_43 [1] : vector<1x512xf32> to vector<1xf32>
    %62 = vector.shape_cast %61 : vector<1xf32> to vector<1x1xf32>
    %c0_44 = arith.constant 0 : index
    %c0_45 = arith.constant 0 : index
    %63 = memref.load %arg8[%c0_44, %c0_45] : memref<1x1xf32, #tpu.memory_space<smem>>
    %64 = vector.broadcast %63 : f32 to vector<1x1xf32>
    %65 = arith.addf %62, %64 : vector<1x1xf32>
    %c0_46 = arith.constant 0 : index
    %c0_47 = arith.constant 0 : index
    %66 = vector.load %arg9[%c0_46, %c0_47] : memref<1x1xf32, #tpu.memory_space<vmem>>, vector<1x1xf32>
    tpu.vector_store %arg9[%c0_46, %c0_47], %65 {strides = array<i32>} : memref<1x1xf32, #tpu.memory_space<vmem>>, vector<1x1xf32>,
    return
  }
}

</mosaic_0001>

<bundles_post_ra>
// kernel: tpu_custom_call.1
= control target key start
LH: loop header
LB: loop body
LE: loop exit
PB: predicated region body
PF: predicated region fallthrough
CT: control target
= control target key end

     0   :  { %15 = vsyncpa [#allocation4], 0  ;;  %s7312_s0 = inlined_call_operand.hbm [shape: bf16[640,128], index: 0, kind: input, shape index: {}]   ;;  %s7313_s1 = inlined_call_operand.hbm [shape: bf16[256,128], index: 1, kind: input, shape index: {}]   ;;  %s7314_s2 = inlined_call_operand.hbm [shape: bf16[128,128], index: 2, kind: input, shape index: {}]   ;;  %s7315_s3 = inlined_call_operand.hbm [shape: f32[1,4608], index: 3, kind: input, shape index: {}]   ;;  %s7316_s4 = inlined_call_operand.hbm [shape: bf16[256,512], index: 4, kind: input, shape index: {}]   ;;  %s7317_s5 = inlined_call_operand.hbm [shape: bf16[1024,128], index: 5, kind: input, shape index: {}]   ;;  %s7318_s6 = inlined_call_operand.hbm [shape: bf16[256,1024], index: 6, kind: input, shape index: {}]   ;;  %s7319_s7 = inlined_call_operand.hbm [shape: bf16[1024,512], index: 7, kind: input, shape index: {}]   ;;  %s7320_s8 = inlined_call_operand.<no memory space> [shape: f32[1,1], index: 8, kind: input, shape index: {}]   ;;  %s7321_s9 = inlined_call_operand.hbm [shape: f32[1,1], index: 9, kind: output, shape index: {}]  }
   0x1   :  { %16 = vsyncpa [#allocation7], 0 }
   0x2   :  { %17 = vsyncpa [#allocation10], 0 }
   0x3   :  { %18 = vsyncpa [#allocation13], 0 }
   0x4   :  { %19 = vsyncpa [#allocation16], 0 }
   0x5   :  { %20 = vsyncpa [#allocation5], 0  ;;  %s6957_s30 = smov [#allocation6]   ;;  %s6958_s11 = smov [#allocation9]  }
   0x6   :  { %s38_s10 = sshll.u32 %s6957_s30, 4  ;;  %s63_s12 = sshll.u32 %s6958_s11, 4  ;;  %s39_s10 = int_to_ptr.vmem [resolvable:$true] %s38_s10  ;;  %s64_s12 = int_to_ptr.vmem [resolvable:$true] %s63_s12 }
   0x7   :  { %s6747_s15 = scalar_lea.hbm %s7313_s1, 2048 }
   0x8   :  { %p6748_p0 = scmp.ne.s32.totalorder %s7313_s1, %s6747_s15  ;;  %p6751_p1 = scmp.lt.u32.totalorder %s6747_s15, %s7313_s1 }
   0xa   :  { %p6753_p2 = pnand %p6751_p1, %p6748_p0 }
   0xc   :  { %6756 = shalt.err (!%p6753_p2)
}
   0xd   :  { %s6757_s20 = scalar_lea.vmem %s39_s10, 2048  ;;  %p6762_p4 = scmp.lt.s32.totalorder %s39_s10, %s39_s10 }
   0xe   :  { %p6758_p3 = scmp.ne.s32.totalorder %s39_s10, %s6757_s20  ;;  %p6763_p5 = scmp.lt.s32.totalorder %s6757_s20, %s6757_s20 }
  0x10   :  { %p6764_p6 = por %p6763_p5, %p6762_p4 }
  0x12   :  { %p6765_p7 = pnand %p6764_p6, %p6758_p3 }
  0x14   :  { %6768 = shalt.err (!%p6765_p7)
}
  0x15   :  { %s6959_s21 = smov 64   ;;  %s6960_s22 = smov 4  }
  0x16   :  { %44 = dma.hbm_to_vmem [thread:$0]  %s7313_s1, 2048, %s39_s10, [#allocation7], %s6959_s21, %s6959_s21, %s6960_s22  }
  0x17   :  { %s6769_s27 = scalar_lea.hbm %s7315_s3, 576 }
  0x18   :  { %p6770_p8 = scmp.ne.s32.totalorder %s7315_s3, %s6769_s27  ;;  %p6773_p9 = scmp.lt.u32.totalorder %s6769_s27, %s7315_s3 }
  0x1a   :  { %p6775_p10 = pnand %p6773_p9, %p6770_p8 }
  0x1c   :  { %6778 = shalt.err (!%p6775_p10)
}
  0x1d   :  { %s6779_s13 = scalar_lea.vmem %s64_s12, 576  ;;  %p6784_p12 = scmp.lt.s32.totalorder %s64_s12, %s64_s12 }
  0x1e   :  { %p6780_p11 = scmp.ne.s32.totalorder %s64_s12, %s6779_s13  ;;  %p6785_p13 = scmp.lt.s32.totalorder %s6779_s13, %s6779_s13 }
  0x20   :  { %p6786_p0 = por %p6785_p13, %p6784_p12 }
  0x22   :  { %p6787_p1 = pnand %p6786_p0, %p6780_p11 }
  0x24   :  { %6790 = shalt.err (!%p6787_p1)
}
  0x25   :  { %66 = dma.hbm_to_vmem [thread:$0]  %s7315_s3, 576, %s64_s12, [#allocation10]  }
  0x26   :  { %s6961_s14 = smov [#allocation12]   ;;  %s6962_s16 = smov [#allocation3]  }
  0x27   :  { %s84_s15 = sshll.u32 %s6961_s14, 4  ;;  %s26_s17 = sshll.u32 %s6962_s16, 4  ;;  %s85_s15 = int_to_ptr.vmem [resolvable:$true] %s84_s15  ;;  %s7052_s17 = int_to_ptr.vmem [resolvable:$true] %s26_s17 }
  0x28   :  { %s6791_s20 = scalar_lea.hbm %s7317_s5, 8192 }
  0x29   :  { %p6792_p2 = scmp.ne.s32.totalorder %s7317_s5, %s6791_s20  ;;  %p6795_p3 = scmp.lt.u32.totalorder %s6791_s20, %s7317_s5 }
  0x2b   :  { %p6797_p4 = pnand %p6795_p3, %p6792_p2 }
  0x2d   :  { %6800 = shalt.err (!%p6797_p4)
}
  0x2e   :  { %s6801_s3 = scalar_lea.vmem %s85_s15, 8192  ;;  %p6806_p6 = scmp.lt.s32.totalorder %s85_s15, %s85_s15 }
  0x2f   :  { %p6802_p5 = scmp.ne.s32.totalorder %s85_s15, %s6801_s3  ;;  %p6807_p7 = scmp.lt.s32.totalorder %s6801_s3, %s6801_s3 }
  0x31   :  { %p6808_p8 = por %p6807_p7, %p6806_p6 }
  0x33   :  { %p6809_p9 = pnand %p6808_p8, %p6802_p5 }
  0x35   :  { %6812 = shalt.err (!%p6809_p9)
}
  0x36   :  { %90 = dma.hbm_to_vmem [thread:$0]  %s7317_s5, 8192, %s85_s15, [#allocation13], %s6959_s21, %s6959_s21, %s6960_s22  }
  0x37   :  { %s6813_s30 = scalar_lea.hbm %s7312_s0, 5120 }
  0x38   :  { %p6814_p10 = scmp.ne.s32.totalorder %s7312_s0, %s6813_s30  ;;  %p6817_p11 = scmp.lt.u32.totalorder %s6813_s30, %s7312_s0 }
  0x3a   :  { %p6819_p12 = pnand %p6817_p11, %p6814_p10 }
  0x3c   :  { %6822 = shalt.err (!%p6819_p12)
}
  0x3d   :  { %s6823_s14 = scalar_lea.vmem %s7052_s17, 5120  ;;  %p6828_p0 = scmp.lt.s32.totalorder %s7052_s17, %s7052_s17 }
  0x3e   :  { %p6824_p13 = scmp.ne.s32.totalorder %s7052_s17, %s6823_s14  ;;  %p6829_p1 = scmp.lt.s32.totalorder %s6823_s14, %s6823_s14 }
  0x40   :  { %p6830_p2 = por %p6829_p1, %p6828_p0 }
  0x42   :  { %p6831_p3 = pnand %p6830_p2, %p6824_p13 }
  0x44   :  { %6834 = shalt.err (!%p6831_p3)
}
  0x45   :  { %32 = dma.hbm_to_vmem [thread:$0]  %s7312_s0, 5120, %s7052_s17, [#allocation4], %s6959_s21, %s6959_s21, %s6960_s22  }
  0x46   :  { %s6963_s16 = smov [#allocation8]   ;;  %s6964_s19 = smov [#allocation11]  }
  0x47   :  { %s50_s18 = sshll.u32 %s6963_s16, 4  ;;  %s72_s20 = sshll.u32 %s6964_s19, 4  ;;  %s51_s18 = int_to_ptr.vmem [resolvable:$true] %s50_s18  ;;  %s7089_s20 = int_to_ptr.vmem [resolvable:$true] %s72_s20 }
  0x48   :  { %s6835_s25 = scalar_lea.hbm %s7314_s2, 1024 }
  0x49   :  { %p6836_p4 = scmp.ne.s32.totalorder %s7314_s2, %s6835_s25  ;;  %p6839_p5 = scmp.lt.u32.totalorder %s6835_s25, %s7314_s2 }
  0x4b   :  { %p6841_p6 = pnand %p6839_p5, %p6836_p4 }
  0x4d   :  { %6844 = shalt.err (!%p6841_p6)
}
  0x4e   :  { %s6845_s0 = scalar_lea.vmem %s51_s18, 1024  ;;  %p6850_p8 = scmp.lt.s32.totalorder %s51_s18, %s51_s18 }
  0x4f   :  { %p6846_p7 = scmp.ne.s32.totalorder %s51_s18, %s6845_s0  ;;  %p6851_p9 = scmp.lt.s32.totalorder %s6845_s0, %s6845_s0 }
  0x51   :  { %p6852_p10 = por %p6851_p9, %p6850_p8 }
  0x53   :  { %p6853_p11 = pnand %p6852_p10, %p6846_p7 }
  0x55   :  { %6856 = shalt.err (!%p6853_p11)
}
  0x56   :  { %56 = dma.hbm_to_vmem [thread:$0]  %s7314_s2, 1024, %s51_s18, [#allocation7], %s6959_s21, %s6959_s21, %s6960_s22  }
  0x57   :  { %s6857_s11 = scalar_lea.hbm %s7316_s4, 8192 }
  0x58   :  { %p6858_p12 = scmp.ne.s32.totalorder %s7316_s4, %s6857_s11  ;;  %p6861_p13 = scmp.lt.u32.totalorder %s6857_s11, %s7316_s4 }
  0x5a   :  { %p6863_p0 = pnand %p6861_p13, %p6858_p12 }
  0x5c   :  { %6866 = shalt.err (!%p6863_p0)
}
  0x5d   :  { %s6867_s5 = scalar_lea.vmem %s7089_s20, 8192  ;;  %p6872_p2 = scmp.lt.s32.totalorder %s7089_s20, %s7089_s20 }
  0x5e   :  { %p6868_p1 = scmp.ne.s32.totalorder %s7089_s20, %s6867_s5  ;;  %p6873_p3 = scmp.lt.s32.totalorder %s6867_s5, %s6867_s5 }
  0x60   :  { %p6874_p4 = por %p6873_p3, %p6872_p2 }
  0x62   :  { %p6875_p5 = pnand %p6874_p4, %p6868_p1 }
  0x64   :  { %6878 = shalt.err (!%p6875_p5)
}
  0x65   :  { %s6965_s2 = smov 256   ;;  %s6966_s21 = smov 16  }
  0x66   :  { %78 = dma.hbm_to_vmem [thread:$0]  %s7316_s4, 8192, %s7089_s20, [#allocation10], %s6965_s2, %s6965_s2, %s6966_s21  }
  0x67   :  { %s6967_s16 = smov [#allocation14]   ;;  %s6879_s24 = scalar_lea.hbm %s7318_s6, 16384 }
  0x68   :  { %s96_s18 = sshll.u32 %s6967_s16, 4  ;;  %p6880_p6 = scmp.ne.s32.totalorder %s7318_s6, %s6879_s24  ;;  %s97_s18 = int_to_ptr.vmem [resolvable:$true] %s96_s18 }
  0x69   :  { %p6883_p7 = scmp.lt.u32.totalorder %s6879_s24, %s7318_s6 }
  0x6b   :  { %p6885_p8 = pnand %p6883_p7, %p6880_p6 }
  0x6d   :  { %6888 = shalt.err (!%p6885_p8)
}
  0x6e   :  { %s6889_s27 = scalar_lea.vmem %s97_s18, 16384  ;;  %p6894_p10 = scmp.lt.s32.totalorder %s97_s18, %s97_s18 }
  0x6f   :  { %p6890_p9 = scmp.ne.s32.totalorder %s97_s18, %s6889_s27  ;;  %p6895_p11 = scmp.lt.s32.totalorder %s6889_s27, %s6889_s27 }
  0x71   :  { %p6896_p12 = por %p6895_p11, %p6894_p10 }
  0x73   :  { %p6897_p13 = pnand %p6896_p12, %p6890_p9 }
  0x75   :  { %6900 = shalt.err (!%p6897_p13)
}
  0x76   :  { %s6968_s4 = smov 512   ;;  %s6969_s20 = smov 32  }
  0x77   :  { %102 = dma.hbm_to_vmem [thread:$0]  %s7318_s6, 16384, %s97_s18, [#allocation13], %s6968_s4, %s6968_s4, %s6969_s20  }
  0x78   :  { %s6970_s28 = smov [#allocation15]   ;;  %s6901_s13 = scalar_lea.hbm %s7319_s7, 32768 }
  0x79   :  { %s108_s29 = sshll.u32 %s6970_s28, 4  ;;  %p6902_p0 = scmp.ne.s32.totalorder %s7319_s7, %s6901_s13  ;;  %s109_s29 = int_to_ptr.vmem [resolvable:$true] %s108_s29 }
  0x7a   :  { %p6905_p1 = scmp.lt.u32.totalorder %s6901_s13, %s7319_s7 }
  0x7c   :  { %p6907_p2 = pnand %p6905_p1, %p6902_p0 }
  0x7e   :  { %6910 = shalt.err (!%p6907_p2)
}
  0x7f   :  { %s6911_s22 = scalar_lea.vmem %s109_s29, 32768  ;;  %p6916_p4 = scmp.lt.s32.totalorder %s109_s29, %s109_s29 }
  0x80   :  { %p6912_p3 = scmp.ne.s32.totalorder %s109_s29, %s6911_s22  ;;  %p6917_p5 = scmp.lt.s32.totalorder %s6911_s22, %s6911_s22 }
  0x82   :  { %p6918_p6 = por %p6917_p5, %p6916_p4 }
  0x84   :  { %p6919_p7 = pnand %p6918_p6, %p6912_p3 }
  0x86   :  { %6922 = shalt.err (!%p6919_p7)
}
  0x87   :  { %114 = dma.hbm_to_vmem [thread:$0]  %s7319_s7, 32768, %s109_s29, [#allocation16], %s6965_s2, %s6965_s2, %s6966_s21  }
  0x88   :  { %6945 = dma.done.wait [#allocation4], 5120  }
  0x89   :  { %6946 = vsyncadd [#allocation4], 4294962176 }
  0x8a   :  { %6947 = dma.done.wait [#allocation7], 3072  }
  0x8b   :  { %6948 = vsyncadd [#allocation7], 4294964224 }
  0x8c   :  { %6949 = dma.done.wait [#allocation10], 8768  }
  0x8d   :  { %6950 = vsyncadd [#allocation10], 4294958528 }
  0x8e   :  { %6951 = dma.done.wait [#allocation13], 24576  }
  0x8f   :  { %6952 = vsyncadd [#allocation13], 4294942720 }
  0x90   :  { %6953 = dma.done.wait [#allocation16], 32768  }
  0x91   :  { %6954 = vsyncadd [#allocation16], 4294934528  ;;  %v6139_v0 = vld [vmem:[#allocation3 + $0x40] sm:$0xff]   ;;  %v6143_v4 = vld [vmem:[#allocation3 + $0x48] sm:$0xff]   ;;  %v145_v19 = vlaneseq  ;;  %v6971_v43 = vmov 0.0   ;;  %vm6972_vm0 = vmmov 0  }
  0x92   :  { %v6140_v1 = vld [vmem:[#allocation3 + $0xc0] sm:$0xff]   ;;  %5881 = vmatprep.subr.bf16.mxu0 %v6139_v0  ;;  %v6144_v5 = vld [vmem:[#allocation3 + $0xc8] sm:$0xff]   ;;  %v6147_v8 = vld [vmem:[#allocation3 + $0x50] sm:$0xff]   ;;  %vm5271_vm1 = vcmask 1040384   ;;  %s6974_s21 = smov [#allocation17]   ;;  %vm5284_vm2 = vcmask 0  }
  0x93   :  { %v6141_v2 = vld [vmem:[#allocation3] sm:$0xff]   ;;  %5903 = vmatprep.subr.bf16.mxu1 %v6140_v1  ;;  %v6145_v6 = vld [vmem:[#allocation3 + $0x8] sm:$0xff]   ;;  %v6148_v9 = vld [vmem:[#allocation3 + $0xd0] sm:$0xff]   ;;  %v7153_v24 = vshrl.u32 %v145_v19, 7  ;;  %s5292_s16 = sshll.u32 %s6974_s21, 4  ;;  %s5293_s16 = int_to_ptr.vmem [resolvable:$true] %s5292_s16 }
  0x94   :  { %v6142_v3 = vld [vmem:[#allocation3 + $0x80] sm:$0xff]   ;;  %5882 = vmatpush3.bf16.msra.mxu0 %v6141_v2  ;;  %v6146_v7 = vld [vmem:[#allocation3 + $0x88] sm:$0xff]   ;;  %v6149_v10 = vld [vmem:[#allocation3 + $0x10] sm:$0xff]   ;;  %s6923_s18 = scalar_lea.vmem %s5293_s16, 16  ;;  %s6927_s19 = scalar_lea.vmem %s5293_s16, 32 }
  0x95   :  { %5904 = vmatpush3.bf16.msra.mxu1 %v6142_v3  ;;  %5883 = vmatprep.subr.bf16.mxu0 %v6143_v4  ;;  %v6150_v11 = vld [vmem:[#allocation3 + $0x90] sm:$0xff]   ;;  %v6151_v12 = vld [vmem:[#allocation3 + $0x58] sm:$0xff]   ;;  %v6155_v16 = vld [vmem:[#allocation3 + $0x60] sm:$0xff]   ;;  %v7156_v29 = vsub.s32 1, %v7153_v24  ;;  %v7159_v31 = vsub.s32 3, %v7153_v24  ;;  %v7162_v33 = vsub.s32 0, %v7153_v24  ;;  %p6924_p8 = scmp.ne.s32.totalorder %s5293_s16, %s6923_s18  ;;  %p6928_p9 = scmp.lt.s32.totalorder %s5293_s16, %s5293_s16 }
  0x96   :  { %5905 = vmatprep.subr.bf16.mxu1 %v6144_v5  ;;  %v6152_v13 = vld [vmem:[#allocation3 + $0xd8] sm:$0xff]   ;;  %v6156_v17 = vld [vmem:[#allocation3 + $0xe0] sm:$0xff]   ;;  %v6159_v21 = vld [vmem:[#allocation3 + $0x68] sm:$0xff]   ;;  %v7165_v35 = vsub.s32 2, %v7153_v24  ;;  %v163_v2 = vsub.s32 4, %v7153_v24  ;;  %p6929_p10 = scmp.lt.s32.totalorder %s6927_s19, %s6923_s18 }
  0x97   :  { %v6153_v14 = vld [vmem:[#allocation3 + $0x18] sm:$0xff]   ;;  %v6157_v18 = vld [vmem:[#allocation3 + $0x20] sm:$0xff]   ;;  %v6160_v22 = vld [vmem:[#allocation3 + $0xe8] sm:$0xff]  }
  0x98   :  { %5884 = vmatpush3.bf16.msra.mxu0 %v6145_v6  ;;  %v6154_v15 = vld [vmem:[#allocation3 + $0x98] sm:$0xff]   ;;  %v6158_v20 = vld [vmem:[#allocation3 + $0xa0] sm:$0xff]   ;;  %v6161_v23 = vld [vmem:[#allocation3 + $0x28] sm:$0xff]   ;;  %p6930_p11 = por %p6929_p10, %p6928_p9 }
  0x99   :  { %5906 = vmatpush3.bf16.msra.mxu1 %v6146_v7  ;;  %5885 = vmatprep.subr.bf16.mxu0 %v6147_v8  ;;  %v6162_v25 = vld [vmem:[#allocation3 + $0xa8] sm:$0xff]   ;;  %v6163_v26 = vld [vmem:[#allocation3 + $0x70] sm:$0xff]   ;;  %v6167_v32 = vld [vmem:[#allocation3 + $0x78] sm:$0xff]  }
  0x9a   :  { %5907 = vmatprep.subr.bf16.mxu1 %v6148_v9  ;;  %v6164_v27 = vld [vmem:[#allocation3 + $0xf0] sm:$0xff]   ;;  %v6168_v34 = vld [vmem:[#allocation3 + $0xf8] sm:$0xff]   ;;  %v7167_v38 = vld [vmem:[#allocation9] sm:$0x1f]  ;;  %p6931_p12 = pnand %p6930_p11, %p6924_p8 }
  0x9b   :  { %v6165_v28 = vld [vmem:[#allocation3 + $0x30] sm:$0xff]   ;;  %v6169_v36 = vld [vmem:[#allocation3 + $0x38] sm:$0xff]   ;;  %v152_v39 = vrot.slane %v7167_v38, %v7156_v29  ;;  %v160_v40 = vrot.slane %v7167_v38, %v7159_v31  ;;  %v148_v41 = vrot.slane %v7167_v38, %v7162_v33  ;;  %v156_v42 = vrot.slane %v7167_v38, %v7165_v35  ;;  %v6171_v48 = vld [vmem:[#allocation3 + $0x100] sm:$0xff]  }
  0x9c   :  { %5886 = vmatpush3.bf16.msra.mxu0 %v6149_v10  ;;  %v6166_v30 = vld [vmem:[#allocation3 + $0xb0] sm:$0xff]   ;;  %v6170_v37 = vld [vmem:[#allocation3 + $0xb8] sm:$0xff]   ;;  %v6172_v49 = vld [vmem:[#allocation3 + $0x108] sm:$0xff]   ;;  %v164_v6 = vrot.slane %v7167_v38, %v163_v2 }
  0x9d   :  { %5908 = vmatpush3.bf16.msra.mxu1 %v6150_v11  ;;  %5887 = vmatprep.subr.bf16.mxu0 %v6151_v12  ;;  %v171_v44 = vpack.c.bf16 %v152_v39, %v152_v39  ;;  %v173_v45 = vpack.c.bf16 %v160_v40, %v160_v40  ;;  %v170_v46 = vpack.c.bf16 %v148_v41, %v148_v41  ;;  %v6179_v50 = vld [vmem:[#allocation6 + $0x40] sm:$0xff]   ;;  %v6173_v52 = vld [vmem:[#allocation3 + $0x110] sm:$0xff]   ;;  %v6182_v53 = vld [vmem:[#allocation6 + $0x48] sm:$0xff]  }
  0x9e   :  { %5909 = vmatprep.subr.bf16.mxu1 %v6152_v13  ;;  %v172_v47 = vpack.c.bf16 %v156_v42, %v156_v42  ;;  %v6180_v51 = vld [vmem:[#allocation6] sm:$0xff]   ;;  %v6183_v54 = vld [vmem:[#allocation6 + $0x8] sm:$0xff]   ;;  %v6174_v55 = vld [vmem:[#allocation3 + $0x118] sm:$0xff]   ;;  %v174_v9 = vpack.c.bf16 %v164_v6, %v164_v6 }
  0x9f   :  { %527 = vmatprep.mubr.bf16.mxu0 %v171_v44  ;;  %567 = vmatprep.mubr.bf16.mxu1 %v173_v45  ;;  %v6185_v56 = vld [vmem:[#allocation6 + $0x50] sm:$0xff]   ;;  %v6188_v58 = vld [vmem:[#allocation6 + $0x58] sm:$0xff]   ;;  %v6175_v59 = vld [vmem:[#allocation3 + $0x120] sm:$0xff]  }
  0xa0   :  { %5888 = vmatpush3.bf16.msra.mxu0 %v6153_v14  ;;  %v6186_v57 = vld [vmem:[#allocation6 + $0x10] sm:$0xff]   ;;  %v6189_v60 = vld [vmem:[#allocation6 + $0x18] sm:$0xff]   ;;  %v6191_v61 = vld [vmem:[#allocation6 + $0x60] sm:$0xff]  }
  0xa1   :  { %5910 = vmatpush3.bf16.msra.mxu1 %v6154_v15  ;;  %5889 = vmatprep.subr.bf16.mxu0 %v6155_v16  ;;  %v6176_v62 = vld [vmem:[#allocation3 + $0x128] sm:$0xff]   ;;  %v6192_v63 = vld [vmem:[#allocation6 + $0x20] sm:$0xff]   ;;  %v6177_v1 = vld [vmem:[#allocation3 + $0x130] sm:$0xff]  }
  0xa2   :  { %5911 = vmatprep.subr.bf16.mxu1 %v6156_v17  ;;  %v6194_v0 = vld [vmem:[#allocation6 + $0x68] sm:$0xff]   ;;  %v6197_v4 = vld [vmem:[#allocation6 + $0x70] sm:$0xff]   ;;  %v6178_v5 = vld [vmem:[#allocation3 + $0x138] sm:$0xff]  }
  0xa3   :  { %v6195_v3 = vld [vmem:[#allocation6 + $0x28] sm:$0xff]   ;;  %v6198_v7 = vld [vmem:[#allocation6 + $0x30] sm:$0xff]   ;;  %v6181_v8 = vld [vmem:[#allocation8] sm:$0xff]  }
  0xa4   :  { %5890 = vmatpush3.bf16.msra.mxu0 %v6157_v18  ;;  %v6184_v10 = vld [vmem:[#allocation8 + $0x8] sm:$0xff]   ;;  %v6187_v11 = vld [vmem:[#allocation8 + $0x10] sm:$0xff]   ;;  %v6190_v12 = vld [vmem:[#allocation8 + $0x18] sm:$0xff]  }
  0xa5   :  { %5912 = vmatpush3.bf16.msra.mxu1 %v6158_v20  ;;  %5891 = vmatprep.subr.bf16.mxu0 %v6159_v21  ;;  %v6193_v13 = vld [vmem:[#allocation8 + $0x20] sm:$0xff]   ;;  %v6196_v14 = vld [vmem:[#allocation8 + $0x28] sm:$0xff]   ;;  %v6199_v15 = vld [vmem:[#allocation8 + $0x30] sm:$0xff]  }
  0xa6   :  { %5913 = vmatprep.subr.bf16.mxu1 %v6160_v22  ;;  %v6200_v16 = vld [vmem:[#allocation6 + $0x78] sm:$0xff]   ;;  %v617_v17 = vld [vmem:[#allocation9 + $0x5] sm:$0x3]  ;;  %v6220_v40 = vld [vmem:[#allocation11 + $0x4c] ss:$16 sps:$4 sm:$0xff]  }
  0xa7   :  { %v6201_v18 = vld [vmem:[#allocation6 + $0x38] sm:$0xff]   ;;  %v626_v19 = vrot.slane %v617_v17, %v7156_v29  ;;  %v622_v20 = vrot.slane %v617_v17, %v7162_v33  ;;  %v6215_v41 = vld [vmem:[#allocation11 + $0x40] ss:$16 sps:$4 sm:$0xff]   ;;  %v6226_v45 = vld [vmem:[#allocation11 + $0x6c] ss:$16 sps:$4 sm:$0xff]  }
  0xa8   :  { %5892 = vmatpush3.bf16.msra.mxu0 %v6161_v23  ;;  %v6202_v22 = vld [vmem:[#allocation8 + $0x38] sm:$0xff]   ;;  %v6221_v44 = vld [vmem:[#allocation11 + $0x60] ss:$16 sps:$4 sm:$0xff]  }
  0xa9   :  { %5914 = vmatpush3.bf16.msra.mxu1 %v6162_v25  ;;  %5893 = vmatprep.subr.bf16.mxu0 %v6163_v26  ;;  %v630_v21 = vpack.c.bf16 %v626_v19, %v626_v19  ;;  %v629_v23 = vpack.c.bf16 %v622_v20, %v622_v20  ;;  %v800_v25 = vld [vmem:[#allocation9 + $0x7] sm:$0x1]  ;;  %v6217_v38 = vld [vmem:[#allocation11 + $0x44] ss:$16 sps:$4 sm:$0xff]   ;;  %v6212_v39 = vld [vmem:[#allocation11 + $0x28] ss:$16 sps:$4 sm:$0xff]  }
  0xaa   :  { %5915 = vmatprep.subr.bf16.mxu1 %v6164_v27  ;;  %v6203_v26 = vld [vmem:[#allocation11] ss:$16 sps:$4 sm:$0xff]   ;;  %v6205_v27 = vld [vmem:[#allocation11 + $0x4] ss:$16 sps:$4 sm:$0xff]  }
  0xab   :  { %v6223_v42 = vld [vmem:[#allocation11 + $0x64] ss:$16 sps:$4 sm:$0xff]  }
  0xac   :  { %5894 = vmatpush3.bf16.msra.mxu0 %v6165_v28  ;;  %v801_v28 = vpack.c.bf16 %v800_v25, %v800_v25  ;;  %v6255_v25 = vld [vmem:[#allocation12 + $0x48] sm:$0xff]  }
  0xad   :  { %5916 = vmatpush3.bf16.msra.mxu1 %v6166_v30  ;;  %5895 = vmatprep.subr.bf16.mxu0 %v6167_v32  ;;  %v6206_v30 = vld [vmem:[#allocation11 + $0x8] ss:$16 sps:$4 sm:$0xff]   ;;  %v6208_v32 = vld [vmem:[#allocation11 + $0xc] ss:$16 sps:$4 sm:$0xff]  }
  0xae   :  { %5917 = vmatprep.subr.bf16.mxu1 %v6168_v34  ;;  %v6211_v34 = vld [vmem:[#allocation11 + $0x24] ss:$16 sps:$4 sm:$0xff]  }
  0xb0   :  { %5896 = vmatpush3.bf16.msra.mxu0 %v6169_v36  ;;  %v6214_v36 = vld [vmem:[#allocation11 + $0x2c] ss:$16 sps:$4 sm:$0xff]  }
  0xb1   :  { %5918 = vmatpush3.bf16.msra.mxu1 %v6170_v37  ;;  %6053 = vmatprep.subr.bf16.mxu0 %v6971_v43  ;;  %v6209_v37 = vld [vmem:[#allocation11 + $0x20] ss:$16 sps:$4 sm:$0xff]  }
  0xb2   :  { %5934 = vmatprep.subr.bf16.mxu1 %v6179_v50  ;;  %v6235_v50 = vld [vmem:[#allocation11 + $0xa4] ss:$16 sps:$4 sm:$0xff]  }
  0xb3   :  { %528 = vmatmul.mubr.bf16.vlgmr.msra.gmra.mrb[0].mxu0 %v170_v46  ;;  %v6229_v46 = vld [vmem:[#allocation11 + $0x84] ss:$16 sps:$4 sm:$0xff]  }
  0xb4   :  { %568 = vmatmul.mubr.bf16.vlgmr.msra.gmra.mrb[0].mxu1 %v172_v47  ;;  %6054 = vmatpush3.bf16.msra.mxu0 %v6171_v48  ;;  %v6224_v47 = vld [vmem:[#allocation11 + $0x68] ss:$16 sps:$4 sm:$0xff]   ;;  %v6232_v48 = vld [vmem:[#allocation11 + $0x8c] ss:$16 sps:$4 sm:$0xff]  }
  0xb5   :  { %6069 = vmatprep.mubr.msk.bf16.mxu0 %vm6972_vm0, %v6971_v43  ;;  %6055 = vmatprep.subr.bf16.mxu0 %v6971_v43 }
  0xb6   :  { %5935 = vmatpush3.bf16.msra.mxu1 %v6180_v51  ;;  %791 = vmatprep.mubr.bf16.mxu1 %v630_v21  ;;  %v6230_v51 = vld [vmem:[#allocation11 + $0x88] ss:$16 sps:$4 sm:$0xff]   ;;  %v6253_v21 = vld [vmem:[#allocation12] sm:$0xff]  }
  0xb7   :  { %5936 = vmatprep.subr.bf16.mxu1 %v6182_v53  ;;  %v6233_v53 = vld [vmem:[#allocation11 + $0xa0] ss:$16 sps:$4 sm:$0xff]  }
  0xb8   :  { %6056 = vmatpush3.bf16.msra.mxu0 %v6172_v49  ;;  %v6227_v49 = vld [vmem:[#allocation11 + $0x80] ss:$16 sps:$4 sm:$0xff]  }
  0xb9   :  { %6057 = vmatprep.subr.bf16.mxu0 %v6971_v43 }
  0xba   :  { %5937 = vmatpush3.bf16.msra.mxu1 %v6183_v54  ;;  %v6241_v54 = vld [vmem:[#allocation11 + $0xc4] ss:$16 sps:$4 sm:$0xff]  }
  0xbb   :  { %5938 = vmatprep.subr.bf16.mxu1 %v6185_v56  ;;  %v6244_v56 = vld [vmem:[#allocation11 + $0xcc] ss:$16 sps:$4 sm:$0xff]  }
  0xbc   :  { %6058 = vmatpush3.bf16.msra.mxu0 %v6173_v52  ;;  %v6238_v52 = vld [vmem:[#allocation11 + $0xac] ss:$16 sps:$4 sm:$0xff]  }
  0xbd   :  { %6059 = vmatprep.subr.bf16.mxu0 %v6971_v43 }
  0xbe   :  { %5939 = vmatpush3.bf16.msra.mxu1 %v6186_v57  ;;  %v6239_v57 = vld [vmem:[#allocation11 + $0xc0] ss:$16 sps:$4 sm:$0xff]  }
  0xbf   :  { %5940 = vmatprep.subr.bf16.mxu1 %v6188_v58  ;;  %v6242_v58 = vld [vmem:[#allocation11 + $0xc8] ss:$16 sps:$4 sm:$0xff]  }
  0xc0   :  { %6060 = vmatpush3.bf16.msra.mxu0 %v6174_v55  ;;  %v6236_v55 = vld [vmem:[#allocation11 + $0xa8] ss:$16 sps:$4 sm:$0xff]  }
  0xc1   :  { %6061 = vmatprep.subr.bf16.mxu0 %v6971_v43 }
  0xc2   :  { %5941 = vmatpush3.bf16.msra.mxu1 %v6189_v60  ;;  %v6250_v60 = vld [vmem:[#allocation11 + $0xec] ss:$16 sps:$4 sm:$0xff]  }
  0xc3   :  { %5942 = vmatprep.subr.bf16.mxu1 %v6191_v61  ;;  %v6245_v61 = vld [vmem:[#allocation11 + $0xe0] ss:$16 sps:$4 sm:$0xff]  }
  0xc4   :  { %6062 = vmatpush3.bf16.msra.mxu0 %v6175_v59  ;;  %v6247_v59 = vld [vmem:[#allocation11 + $0xe4] ss:$16 sps:$4 sm:$0xff]  }
  0xc5   :  { %6063 = vmatprep.subr.bf16.mxu0 %v6971_v43 }
  0xc6   :  { %5943 = vmatpush3.bf16.msra.mxu1 %v6192_v63  ;;  %v6973_v63 = vmov 0  }
  0xc7   :  { %5944 = vmatprep.subr.bf16.mxu1 %v6194_v0  ;;  %v6251_v0 = vld [vmem:[#allocation12 + $0x40] sm:$0xff]  }
  0xc8   :  { %6064 = vmatpush3.bf16.msra.mxu0 %v6176_v62  ;;  %v6248_v62 = vld [vmem:[#allocation11 + $0xe8] ss:$16 sps:$4 sm:$0xff]  }
  0xc9   :  { %6065 = vmatprep.subr.bf16.mxu0 %v6971_v43 }
  0xca   :  { %5945 = vmatpush3.bf16.msra.mxu1 %v6195_v3 }
  0xcb   :  { %5946 = vmatprep.subr.bf16.mxu1 %v6197_v4 }
  0xcc   :  { %6066 = vmatpush3.bf16.msra.mxu0 %v6177_v1  ;;  %v6252_v1 = vld [vmem:[#allocation12 + $0xc0] sm:$0xff]  }
  0xcd   :  { %6067 = vmatprep.subr.bf16.mxu0 %v6971_v43 }
  0xce   :  { %5947 = vmatpush3.bf16.msra.mxu1 %v6198_v7 }
  0xcf   :  { %5948 = vmatprep.subr.bf16.mxu1 %v6200_v16 }
  0xd0   :  { %6068 = vmatpush3.bf16.msra.mxu0 %v6178_v5 }
  0xd1   :  { %6073 = vmatprep.subr.bf16.mxu0 %v6971_v43 }
  0xd2   :  { %5949 = vmatpush3.bf16.msra.mxu1 %v6201_v18 }
  0xd3   :  { %6070 = vmatmul.mubr.bf16.vlgmr.msra.gmra.mrb[4].mxu0 %v174_v9  ;;  %1122 = vmatprep.subr.bf16.mxu1 %v6205_v27  ;;  %v6257_v27 = vld [vmem:[#allocation12 + $0x8] sm:$0xff]  }
  0xd4   :  { %6074 = vmatpush3.bf16.msra.mxu0 %v6181_v8  ;;  %6089 = vmatprep.mubr.msk.bf16.mxu0 %vm6972_vm0, %v6971_v43 }
  0xd5   :  { %6075 = vmatprep.subr.bf16.mxu0 %v6971_v43  ;;  %792 = vmatmul.mubr.bf16.vlgmr.msra.gmra.mrb[4].mxu1 %v629_v23 }
  0xd6   :  { %1123 = vmatpush1.bf16.msra.mxu1 %v6203_v26  ;;  %1154 = vmatprep.mubr.bf16.mxu1 %v6973_v63  ;;  %v6256_v26 = vld [vmem:[#allocation12 + $0xc8] sm:$0xff]  }
  0xd7   :  { %1124 = vmatprep.subr.bf16.mxu1 %v6211_v34  ;;  %v6261_v34 = vld [vmem:[#allocation12 + $0x10] sm:$0xff]  }
  0xd8   :  { %6076 = vmatpush3.bf16.msra.mxu0 %v6184_v10 }
  0xd9   :  { %6077 = vmatprep.subr.bf16.mxu0 %v6971_v43 }
  0xda   :  { %1125 = vmatpush1.bf16.msra.mxu1 %v6209_v37  ;;  %v6263_v37 = vld [vmem:[#allocation12 + $0x58] sm:$0xff]  }
  0xdb   :  { %1126 = vmatprep.subr.bf16.mxu1 %v6217_v38  ;;  %v6264_v38 = vld [vmem:[#allocation12 + $0xd8] sm:$0xff]  }
  0xdc   :  { %6078 = vmatpush3.bf16.msra.mxu0 %v6187_v11 }
  0xdd   :  { %6079 = vmatprep.subr.bf16.mxu0 %v6971_v43 }
  0xde   :  { %1127 = vmatpush1.bf16.msra.mxu1 %v6215_v41  ;;  %v6267_v41 = vld [vmem:[#allocation12 + $0x60] sm:$0xff]  }
  0xdf   :  { %1128 = vmatprep.subr.bf16.mxu1 %v6223_v42  ;;  %v6268_v42 = vld [vmem:[#allocation12 + $0xe0] sm:$0xff]  }
  0xe0   :  { %6080 = vmatpush3.bf16.msra.mxu0 %v6190_v12 }
  0xe1   :  { %6081 = vmatprep.subr.bf16.mxu0 %v6971_v43 }
  0xe2   :  { %1129 = vmatpush1.bf16.msra.mxu1 %v6221_v44  ;;  %v6270_v44 = vld [vmem:[#allocation12 + $0xa0] sm:$0xff]  }
  0xe3   :  { %1130 = vmatprep.subr.bf16.mxu1 %v6229_v46  ;;  %v6272_v46 = vld [vmem:[#allocation12 + $0xe8] sm:$0xff]  }
  0xe4   :  { %6082 = vmatpush3.bf16.msra.mxu0 %v6193_v13 }
  0xe5   :  { %6083 = vmatprep.subr.bf16.mxu0 %v6971_v43 }
  0xe6   :  { %1131 = vmatpush1.bf16.msra.mxu1 %v6227_v49 }
  0xe7   :  { %1132 = vmatprep.subr.bf16.mxu1 %v6235_v50 }
  0xe8   :  { %6084 = vmatpush3.bf16.msra.mxu0 %v6196_v14  ;;  %v142_v14 = vld [vmem:[#allocation9 + $0x8] sm:$0x1] }
  0xe9   :  { %6085 = vmatprep.subr.bf16.mxu0 %v6971_v43 }
  0xea   :  { %1133 = vmatpush1.bf16.msra.mxu1 %v6233_v53 }
  0xeb   :  { %1134 = vmatprep.subr.bf16.mxu1 %v6241_v54 }
  0xec   :  { %6086 = vmatpush3.bf16.msra.mxu0 %v6199_v15 }
  0xed   :  { %6087 = vmatprep.subr.bf16.mxu0 %v6971_v43  ;;  %v6218_v43 = vld [vmem:[#allocation11 + $0x48] ss:$16 sps:$4 sm:$0xff]  }
  0xee   :  { %1135 = vmatpush1.bf16.msra.mxu1 %v6239_v57 }
  0xef   :  { %1136 = vmatprep.subr.bf16.mxu1 %v6247_v59 }
  0xf0   :  { %6088 = vmatpush3.bf16.msra.mxu0 %v6202_v22  ;;  %v6254_v22 = vld [vmem:[#allocation12 + $0x80] sm:$0xff]  }
  0xf1   :  { %1163 = vmatprep.subr.bf16.mxu0 %v6208_v32  ;;  %v6260_v32 = vld [vmem:[#allocation12 + $0xd0] sm:$0xff]  }
  0xf2   :  { %1137 = vmatpush1.bf16.msra.mxu1 %v6245_v61  ;;  %v6275_v61 = vld [vmem:[#allocation12 + $0x70] sm:$0xff]  }
  0xf3   :  { %6090 = vmatmul.mubr.bf16.vlgmr.msra.gmra.mrb[8].mxu0 %v801_v28  ;;  %5965 = vmatprep.subr.bf16.mxu1 %v6251_v0  ;;  %v6258_v28 = vld [vmem:[#allocation12 + $0x88] sm:$0xff]   ;;  %v6277_v0 = vld [vmem:[#allocation12 + $0x30] sm:$0xff]  }
  0xf4   :  { %1164 = vmatpush1.bf16.msra.mxu0 %v6206_v30  ;;  %1195 = vmatprep.mubr.bf16.mxu0 %v6973_v63  ;;  %v6259_v30 = vld [vmem:[#allocation12 + $0x50] sm:$0xff]  }
  0xf5   :  { %1165 = vmatprep.subr.bf16.mxu0 %v6214_v36  ;;  %v6262_v36 = vld [vmem:[#allocation12 + $0x90] sm:$0xff]  }
  0xf8   :  { %1166 = vmatpush1.bf16.msra.mxu0 %v6212_v39  ;;  %v6265_v39 = vld [vmem:[#allocation12 + $0x18] sm:$0xff]  }
  0xf9   :  { %1167 = vmatprep.subr.bf16.mxu0 %v6220_v40  ;;  %v6266_v40 = vld [vmem:[#allocation12 + $0x98] sm:$0xff]  }
  0xfc   :  { %1168 = vmatpush1.bf16.msra.mxu0 %v6218_v43  ;;  %v6269_v43 = vld [vmem:[#allocation12 + $0x20] sm:$0xff]  }
  0xfd   :  { %1169 = vmatprep.subr.bf16.mxu0 %v6226_v45  ;;  %v6271_v45 = vld [vmem:[#allocation12 + $0x68] sm:$0xff]  }
 0x100   :  { %1170 = vmatpush1.bf16.msra.mxu0 %v6224_v47  ;;  %v6273_v47 = vld [vmem:[#allocation12 + $0x28] sm:$0xff]  }
 0x101   :  { %1171 = vmatprep.subr.bf16.mxu0 %v6232_v48  ;;  %v6274_v48 = vld [vmem:[#allocation12 + $0xa8] sm:$0xff]  }
 0x104   :  { %1172 = vmatpush1.bf16.msra.mxu0 %v6230_v51  ;;  %v616_v51 = vld [vmem:[#allocation9 + $0x9] sm:$0x1] }
 0x105   :  { %1173 = vmatprep.subr.bf16.mxu0 %v6238_v52 }
 0x108   :  { %1174 = vmatpush1.bf16.msra.mxu0 %v6236_v55 }
 0x109   :  { %1175 = vmatprep.subr.bf16.mxu0 %v6244_v56 }
 0x10c   :  { %1176 = vmatpush1.bf16.msra.mxu0 %v6242_v58 }
 0x10d   :  { %1177 = vmatprep.subr.bf16.mxu0 %v6250_v60 }
 0x110   :  { %1178 = vmatpush1.bf16.msra.mxu0 %v6248_v62  ;;  %v6276_v62 = vld [vmem:[#allocation12 + $0xf0] sm:$0xff]  }
 0x111   :  { %5987 = vmatprep.subr.bf16.mxu0 %v6252_v1  ;;  %v6278_v1 = vld [vmem:[#allocation12 + $0xb0] sm:$0xff]  }
 0x186   :  { %v5897_v3 = vpop.f32.mrb[0].mxu0 }
 0x187   :  { %v5919_v4 = vpop.f32.mrb[0].mxu1  ;;  %v5898_v5 = vpop.f32.mrb[1].mxu0 }
 0x188   :  { %v5920_v6 = vpop.f32.mrb[1].mxu1  ;;  %v5899_v7 = vadd.f32 %v5898_v5, %v5897_v3  ;;  %v5900_v9 = vpop.f32.mrb[2].mxu0  ;;  %v6279_v3 = vld [vmem:[#allocation12 + $0x78] sm:$0xff]  }
 0x189   :  { %v5921_v8 = vadd.f32 %v5920_v6, %v5919_v4  ;;  %v5922_v10 = vpop.f32.mrb[2].mxu1  ;;  %v5901_v11 = vpop.f32.mrb[3].mxu0  ;;  %v6280_v4 = vld [vmem:[#allocation12 + $0xf8] sm:$0xff]   ;;  %v940_v9 = vld [vmem:[#allocation9 + $0xa] sm:$0xf] }
 0x18a   :  { %v5923_v12 = vpop.f32.mrb[3].mxu1  ;;  %v6281_v5 = vld [vmem:[#allocation12 + $0x38] sm:$0xff]   ;;  %v1105_v10 = vrot.slane %v940_v9, %v7162_v33  ;;  %v1113_v11 = vrot.slane %v940_v9, %v7165_v35 }
 0x18b   :  { %v570_v13 = vadd.f32 %v5921_v8, %v5899_v7  ;;  %v6282_v6 = vld [vmem:[#allocation12 + $0xb8] sm:$0xff]   ;;  %v6285_v7 = vld [vmem:[#allocation11 + $0x104] ss:$16 sps:$4 sm:$0xff]   ;;  %v1109_v12 = vrot.slane %v940_v9, %v7156_v29 }
 0x18c   :  { %v6288_v8 = vld [vmem:[#allocation11 + $0x10c] ss:$16 sps:$4 sm:$0xff]  }
 0x1a6   :  { %v609_v15 = vpop.f32.mrb[4].mxu0 }
 0x1a7   :  { %v610_v16 = vadd.f32 %v609_v15, %v570_v13  ;;  %v6071_v17 = vpop.f32.mrb[5].mxu0  ;;  %v1117_v13 = vrot.slane %v940_v9, %v7159_v31  ;;  %v6331_v9 = vld [vmem:[#allocation12 + $0x140] sm:$0xff]  }
 0x1a8   :  { %v612_v18 = vpop.f32.mrb[6].mxu0  ;;  %v5950_v49 = vpop.f32.mrb[4].mxu1 }
 0x1a9   :  { %v615_v19 = vadd.f32 %v610_v16, %v142_v14  ;;  %v6072_v20 = vpop.f32.mrb[7].mxu0  ;;  %v5951_v50 = vpop.f32.mrb[5].mxu1 }
 0x1aa   :  { %v5952_v52 = vadd.f32 %v5951_v50, %v5950_v49  ;;  %v5953_v53 = vpop.f32.mrb[6].mxu1  ;;  %v6303_v49 = vld [vmem:[#allocation11 + $0x164] ss:$16 sps:$4 sm:$0xff]   ;;  %v6306_v50 = vld [vmem:[#allocation11 + $0x16c] ss:$16 sps:$4 sm:$0xff]  }
 0x1ab   :  { %v907_v23 = vpack.c.bf16 %v615_v19, %v615_v19  ;;  %v5954_v55 = vpop.f32.mrb[7].mxu1  ;;  %v6309_v53 = vld [vmem:[#allocation11 + $0x184] ss:$16 sps:$4 sm:$0xff]  }
 0x1ac   :  { %v799_v57 = vadd.f32 %v5952_v52, %v616_v51  ;;  %v6301_v51 = vld [vmem:[#allocation11 + $0x160] ss:$16 sps:$4 sm:$0xff]   ;;  %v6304_v52 = vld [vmem:[#allocation11 + $0x168] ss:$16 sps:$4 sm:$0xff]  }
 0x1ad   :  { %1155 = vmatmul.mubr.bf16.vlgmr.msra.gmra.mrb[8].mxu1 %v907_v23  ;;  %1196 = vmatmul.mubr.bf16.vlgmr.msra.gmra.mrb[12].mxu0 %v907_v23  ;;  %v6307_v55 = vld [vmem:[#allocation11 + $0x180] ss:$16 sps:$4 sm:$0xff]  }
 0x1ae   :  { %5966 = vmatpush3.bf16.msra.mxu1 %v6253_v21  ;;  %5988 = vmatpush3.bf16.msra.mxu0 %v6254_v22 }
 0x1af   :  { %5967 = vmatprep.subr.bf16.mxu1 %v6255_v25  ;;  %5989 = vmatprep.subr.bf16.mxu0 %v6256_v26 }
 0x1b2   :  { %5968 = vmatpush3.bf16.msra.mxu1 %v6257_v27  ;;  %5990 = vmatpush3.bf16.msra.mxu0 %v6258_v28 }
 0x1b3   :  { %5969 = vmatprep.subr.bf16.mxu1 %v6259_v30  ;;  %5991 = vmatprep.subr.bf16.mxu0 %v6260_v32 }
 0x1b6   :  { %5970 = vmatpush3.bf16.msra.mxu1 %v6261_v34  ;;  %5992 = vmatpush3.bf16.msra.mxu0 %v6262_v36 }
 0x1b7   :  { %5971 = vmatprep.subr.bf16.mxu1 %v6263_v37  ;;  %5993 = vmatprep.subr.bf16.mxu0 %v6264_v38  ;;  %v6283_v37 = vld [vmem:[#allocation11 + $0x100] ss:$16 sps:$4 sm:$0xff]   ;;  %v6286_v38 = vld [vmem:[#allocation11 + $0x108] ss:$16 sps:$4 sm:$0xff]  }
 0x1ba   :  { %5972 = vmatpush3.bf16.msra.mxu1 %v6265_v39  ;;  %5994 = vmatpush3.bf16.msra.mxu0 %v6266_v40 }
 0x1bb   :  { %5973 = vmatprep.subr.bf16.mxu1 %v6267_v41  ;;  %5995 = vmatprep.subr.bf16.mxu0 %v6268_v42  ;;  %v6291_v41 = vld [vmem:[#allocation11 + $0x124] ss:$16 sps:$4 sm:$0xff]   ;;  %v6294_v42 = vld [vmem:[#allocation11 + $0x12c] ss:$16 sps:$4 sm:$0xff]  }
 0x1be   :  { %5974 = vmatpush3.bf16.msra.mxu1 %v6269_v43  ;;  %5996 = vmatpush3.bf16.msra.mxu0 %v6270_v44  ;;  %v6289_v43 = vld [vmem:[#allocation11 + $0x120] ss:$16 sps:$4 sm:$0xff]   ;;  %v6292_v44 = vld [vmem:[#allocation11 + $0x128] ss:$16 sps:$4 sm:$0xff]  }
 0x1bf   :  { %5975 = vmatprep.subr.bf16.mxu1 %v6271_v45  ;;  %5997 = vmatprep.subr.bf16.mxu0 %v6272_v46  ;;  %v6297_v45 = vld [vmem:[#allocation11 + $0x144] ss:$16 sps:$4 sm:$0xff]   ;;  %v6300_v46 = vld [vmem:[#allocation11 + $0x14c] ss:$16 sps:$4 sm:$0xff]  }
 0x1c2   :  { %5976 = vmatpush3.bf16.msra.mxu1 %v6273_v47  ;;  %5998 = vmatpush3.bf16.msra.mxu0 %v6274_v48  ;;  %v6295_v47 = vld [vmem:[#allocation11 + $0x140] ss:$16 sps:$4 sm:$0xff]   ;;  %v6298_v48 = vld [vmem:[#allocation11 + $0x148] ss:$16 sps:$4 sm:$0xff]  }
 0x1c3   :  { %5977 = vmatprep.subr.bf16.mxu1 %v6275_v61  ;;  %5999 = vmatprep.subr.bf16.mxu0 %v6276_v62  ;;  %v6316_v61 = vld [vmem:[#allocation11 + $0x1a8] ss:$16 sps:$4 sm:$0xff]   ;;  %v6321_v62 = vld [vmem:[#allocation11 + $0x1c4] ss:$16 sps:$4 sm:$0xff]  }
 0x1c6   :  { %v900_v54 = vpop.f32.mrb[8].mxu0  ;;  %5978 = vmatpush3.bf16.msra.mxu1 %v6277_v0  ;;  %6000 = vmatpush3.bf16.msra.mxu0 %v6278_v1  ;;  %v6324_v0 = vld [vmem:[#allocation11 + $0x1cc] ss:$16 sps:$4 sm:$0xff]   ;;  %v6319_v1 = vld [vmem:[#allocation11 + $0x1c0] ss:$16 sps:$4 sm:$0xff]  }
 0x1c7   :  { %v6091_v56 = vpop.f32.mrb[9].mxu0  ;;  %v7205_v60 = vadd.f32 %v900_v54, %v799_v57  ;;  %5979 = vmatprep.subr.bf16.mxu1 %v6279_v3  ;;  %6001 = vmatprep.subr.bf16.mxu0 %v6280_v4  ;;  %v6312_v54 = vld [vmem:[#allocation11 + $0x18c] ss:$16 sps:$4 sm:$0xff]   ;;  %v6315_v57 = vld [vmem:[#allocation11 + $0x1a4] ss:$16 sps:$4 sm:$0xff]  }
 0x1c8   :  { %v903_v58 = vpop.f32.mrb[10].mxu0  ;;  %v6310_v56 = vld [vmem:[#allocation11 + $0x188] ss:$16 sps:$4 sm:$0xff]   ;;  %v6327_v4 = vld [vmem:[#allocation11 + $0x1e4] ss:$16 sps:$4 sm:$0xff]  }
 0x1c9   :  { %v6092_v59 = vpop.f32.mrb[11].mxu0  ;;  %v6318_v58 = vld [vmem:[#allocation11 + $0x1ac] ss:$16 sps:$4 sm:$0xff]   ;;  %v6322_v3 = vld [vmem:[#allocation11 + $0x1c8] ss:$16 sps:$4 sm:$0xff]  }
 0x1ca   :  { %5980 = vmatpush3.bf16.msra.mxu1 %v6281_v5  ;;  %6002 = vmatpush3.bf16.msra.mxu0 %v6282_v6  ;;  %v6313_v59 = vld [vmem:[#allocation11 + $0x1a0] ss:$16 sps:$4 sm:$0xff]   ;;  %v6330_v5 = vld [vmem:[#allocation11 + $0x1ec] ss:$16 sps:$4 sm:$0xff]  }
 0x1cb   :  { %1764 = vmatprep.subr.bf16.mxu1 %v6285_v7  ;;  %1805 = vmatprep.subr.bf16.mxu0 %v6288_v8  ;;  %v6325_v6 = vld [vmem:[#allocation11 + $0x1e0] ss:$16 sps:$4 sm:$0xff]   ;;  %v6328_v7 = vld [vmem:[#allocation11 + $0x1e8] ss:$16 sps:$4 sm:$0xff]   ;;  %v1549_v8 = vpack.c.bf16 %v7205_v60, %v7205_v60 }
 0x1cc   :  { %v6341_v60 = vld [vmem:[#allocation12 + $0x110] sm:$0xff]  }
 0x280   :  { %v1156_v14 = vpop.f32.mrb[8].mxu1  ;;  %v1197_v15 = vpop.f32.mrb[12].mxu0 }
 0x281   :  { %v1157_v16 = vadd.f32 %v1156_v14, %v1105_v10  ;;  %v1198_v17 = vadd.f32 %v1197_v15, %v1113_v11  ;;  %v1158_v18 = vpop.f32.mrb[9].mxu1  ;;  %v1199_v19 = vpop.f32.mrb[13].mxu0  ;;  %v6332_v10 = vld [vmem:[#allocation12 + $0x1c0] sm:$0xff]   ;;  %v6336_v14 = vld [vmem:[#allocation12 + $0x1c8] sm:$0xff]  }
 0x282   :  { %v1159_v20 = vadd.f32 %v1158_v18, %v1109_v12  ;;  %v1200_v21 = vadd.f32 %v1199_v19, %v1117_v13  ;;  %v1160_v22 = vpop.f32.mrb[10].mxu1  ;;  %v1201_v23 = vpop.f32.mrb[14].mxu0  ;;  %v6333_v11 = vld [vmem:[#allocation12 + $0x100] sm:$0xff]   ;;  %v6335_v13 = vld [vmem:[#allocation12 + $0x148] sm:$0xff]   ;;  %v6340_v18 = vld [vmem:[#allocation12 + $0x1d0] sm:$0xff]  }
 0x283   :  { %v1204_v25 = vmax.f32 %v1157_v16, 0.0  ;;  %v1206_v26 = vmax.f32 %v1198_v17, 0.0  ;;  %v1161_v27 = vpop.f32.mrb[11].mxu1  ;;  %v1202_v28 = vpop.f32.mrb[15].mxu0  ;;  %v6334_v12 = vld [vmem:[#allocation12 + $0x180] sm:$0xff]   ;;  %v6337_v15 = vld [vmem:[#allocation12 + $0x108] sm:$0xff]  }
 0x284   :  { %v1205_v30 = vmax.f32 %v1159_v20, 0.0  ;;  %v1207_v32 = vmax.f32 %v1200_v21, 0.0  ;;  %v6338_v16 = vld [vmem:[#allocation12 + $0x188] sm:$0xff]   ;;  %v6339_v17 = vld [vmem:[#allocation12 + $0x150] sm:$0xff]   ;;  %v6343_v20 = vld [vmem:[#allocation12 + $0x158] sm:$0xff]  }
 0x285   :  { %v1208_v39 = vpack.c.bf16 %v1204_v25, %v1204_v25  ;;  %v1210_v40 = vpack.c.bf16 %v1206_v26, %v1206_v26  ;;  %v6342_v19 = vld [vmem:[#allocation12 + $0x190] sm:$0xff]   ;;  %v6344_v21 = vld [vmem:[#allocation12 + $0x1d8] sm:$0xff]   ;;  %v6347_v25 = vld [vmem:[#allocation12 + $0x160] sm:$0xff]  }
 0x286   :  { %v1209_v34 = vpack.c.bf16 %v1205_v30, %v1205_v30  ;;  %v1211_v36 = vpack.c.bf16 %v1207_v32, %v1207_v32  ;;  %v6345_v22 = vld [vmem:[#allocation12 + $0x118] sm:$0xff]   ;;  %v6348_v26 = vld [vmem:[#allocation12 + $0x1e0] sm:$0xff]   ;;  %v6351_v30 = vld [vmem:[#allocation12 + $0x168] sm:$0xff]  }
 0x287   :  { %v6346_v23 = vld [vmem:[#allocation12 + $0x198] sm:$0xff]   ;;  %v6349_v27 = vld [vmem:[#allocation12 + $0x120] sm:$0xff]   ;;  %v6352_v32 = vld [vmem:[#allocation12 + $0x1e8] sm:$0xff]  }
 0x288   :  { %1501 = vmatprep.mubr.bf16.mxu1 %v1209_v34  ;;  %1541 = vmatprep.mubr.bf16.mxu0 %v1211_v36  ;;  %v6350_v28 = vld [vmem:[#allocation12 + $0x1a0] sm:$0xff]   ;;  %v6353_v34 = vld [vmem:[#allocation12 + $0x128] sm:$0xff]  }
 0x289   :  { %1502 = vmatmul.mubr.bf16.vlgmr.msra.gmra.mrb[12].mxu1 %v1208_v39  ;;  %1542 = vmatmul.mubr.bf16.vlgmr.msra.gmra.mrb[16].mxu0 %v1210_v40  ;;  %v6354_v36 = vld [vmem:[#allocation12 + $0x1a8] sm:$0xff]   ;;  %v6357_v39 = vld [vmem:[#allocation12 + $0x130] sm:$0xff]  }
 0x28a   :  { %1765 = vmatpush1.bf16.msra.mxu1 %v6283_v37  ;;  %1806 = vmatpush1.bf16.msra.mxu0 %v6286_v38  ;;  %v6355_v37 = vld [vmem:[#allocation12 + $0x170] sm:$0xff]  }
 0x28b   :  { %1766 = vmatprep.subr.bf16.mxu1 %v6291_v41  ;;  %1807 = vmatprep.subr.bf16.mxu0 %v6294_v42  ;;  %v6356_v38 = vld [vmem:[#allocation12 + $0x1f0] sm:$0xff]   ;;  %v6359_v41 = vld [vmem:[#allocation12 + $0x178] sm:$0xff]  }
 0x28c   :  { %1796 = vmatprep.mubr.bf16.mxu1 %v6973_v63  ;;  %1837 = vmatprep.mubr.bf16.mxu0 %v6973_v63  ;;  %v6358_v40 = vld [vmem:[#allocation12 + $0x1b0] sm:$0xff]   ;;  %v6360_v42 = vld [vmem:[#allocation12 + $0x1f8] sm:$0xff]  }
 0x28e   :  { %1767 = vmatpush1.bf16.msra.mxu1 %v6289_v43  ;;  %1808 = vmatpush1.bf16.msra.mxu0 %v6292_v44  ;;  %v6361_v43 = vld [vmem:[#allocation12 + $0x138] sm:$0xff]  }
 0x28f   :  { %1768 = vmatprep.subr.bf16.mxu1 %v6297_v45  ;;  %1809 = vmatprep.subr.bf16.mxu0 %v6300_v46  ;;  %v6362_v44 = vld [vmem:[#allocation12 + $0x1b8] sm:$0xff]   ;;  %v2257_v45 = vld [vmem:[#allocation14 + $0x200] sm:$0xff] }
 0x290   :  { %v2261_v46 = vld [vmem:[#allocation14 + $0x220] sm:$0xff] }
 0x292   :  { %1769 = vmatpush1.bf16.msra.mxu1 %v6295_v47  ;;  %1810 = vmatpush1.bf16.msra.mxu0 %v6298_v48  ;;  %v2258_v47 = vld [vmem:[#allocation14 + $0x208] sm:$0xff]  ;;  %v5497_v48 = vcombine.low %v2257_v45, %v2261_v46 }
 0x293   :  { %1770 = vmatprep.subr.bf16.mxu1 %v6303_v49  ;;  %1811 = vmatprep.subr.bf16.mxu0 %v6306_v50  ;;  %v5498_v49 = vcombine.high %v2257_v45, %v2261_v46  ;;  %v2262_v50 = vld [vmem:[#allocation14 + $0x228] sm:$0xff] }
 0x296   :  { %1771 = vmatpush1.bf16.msra.mxu1 %v6301_v51  ;;  %1812 = vmatpush1.bf16.msra.mxu0 %v6304_v52  ;;  %v5499_v51 = vcombine.low %v2258_v47, %v2262_v50  ;;  %v5500_v52 = vcombine.high %v2258_v47, %v2262_v50  ;;  %v2285_v50 = vld [vmem:[#allocation14 + $0x2e0] sm:$0xff] }
 0x297   :  { %1772 = vmatprep.subr.bf16.mxu1 %v6309_v53  ;;  %1813 = vmatprep.subr.bf16.mxu0 %v6312_v54 }
 0x29a   :  { %1773 = vmatpush1.bf16.msra.mxu1 %v6307_v55  ;;  %1814 = vmatpush1.bf16.msra.mxu0 %v6310_v56  ;;  %v1276_v55 = vld [vmem:[#allocation9 + $0x12] sm:$0x1] }
 0x29b   :  { %1774 = vmatprep.subr.bf16.mxu1 %v6315_v57  ;;  %1815 = vmatprep.subr.bf16.mxu0 %v6318_v58 }
 0x29e   :  { %1775 = vmatpush1.bf16.msra.mxu1 %v6313_v59  ;;  %1816 = vmatpush1.bf16.msra.mxu0 %v6316_v61 }
 0x29f   :  { %1776 = vmatprep.subr.bf16.mxu1 %v6321_v62  ;;  %1817 = vmatprep.subr.bf16.mxu0 %v6324_v0 }
 0x2a2   :  { %1777 = vmatpush1.bf16.msra.mxu1 %v6319_v1  ;;  %1818 = vmatpush1.bf16.msra.mxu0 %v6322_v3 }
 0x2a3   :  { %1778 = vmatprep.subr.bf16.mxu1 %v6327_v4  ;;  %1819 = vmatprep.subr.bf16.mxu0 %v6330_v5  ;;  %v1582_v5 = vld [vmem:[#allocation9 + $0xe] sm:$0xf] }
 0x2a6   :  { %1779 = vmatpush1.bf16.msra.mxu1 %v6325_v6  ;;  %1820 = vmatpush1.bf16.msra.mxu0 %v6328_v7  ;;  %v1747_v6 = vrot.slane %v1582_v5, %v7162_v33  ;;  %v1755_v7 = vrot.slane %v1582_v5, %v7165_v35 }
 0x2a7   :  { %6009 = vmatprep.subr.bf16.mxu1 %v6331_v9  ;;  %6031 = vmatprep.subr.bf16.mxu0 %v6332_v10  ;;  %v1759_v9 = vrot.slane %v1582_v5, %v7159_v31 }
 0x2a9   :  { %1797 = vmatmul.mubr.bf16.vlgmr.msra.gmra.mrb[16].mxu1 %v1549_v8  ;;  %1838 = vmatmul.mubr.bf16.vlgmr.msra.gmra.mrb[20].mxu0 %v1549_v8  ;;  %v1751_v8 = vrot.slane %v1582_v5, %v7156_v29  ;;  %v2301_v5 = vld [vmem:[#allocation14 + $0x360] sm:$0xff] }
 0x2aa   :  { %6010 = vmatpush3.bf16.msra.mxu1 %v6333_v11  ;;  %6032 = vmatpush3.bf16.msra.mxu0 %v6334_v12 }
 0x2ab   :  { %6011 = vmatprep.subr.bf16.mxu1 %v6335_v13  ;;  %6033 = vmatprep.subr.bf16.mxu0 %v6336_v14 }
 0x2ae   :  { %6012 = vmatpush3.bf16.msra.mxu1 %v6337_v15  ;;  %6034 = vmatpush3.bf16.msra.mxu0 %v6338_v16 }
 0x2af   :  { %6013 = vmatprep.subr.bf16.mxu1 %v6339_v17  ;;  %6035 = vmatprep.subr.bf16.mxu0 %v6340_v18 }
 0x2b2   :  { %6014 = vmatpush3.bf16.msra.mxu1 %v6341_v60  ;;  %6036 = vmatpush3.bf16.msra.mxu0 %v6342_v19 }
 0x2b3   :  { %6015 = vmatprep.subr.bf16.mxu1 %v6343_v20  ;;  %6037 = vmatprep.subr.bf16.mxu0 %v6344_v21 }
 0x2b6   :  { %6016 = vmatpush3.bf16.msra.mxu1 %v6345_v22  ;;  %6038 = vmatpush3.bf16.msra.mxu0 %v6346_v23  ;;  %v2265_v23 = vld [vmem:[#allocation14 + $0x240] sm:$0xff] }
 0x2b7   :  { %6017 = vmatprep.subr.bf16.mxu1 %v6347_v25  ;;  %6039 = vmatprep.subr.bf16.mxu0 %v6348_v26 }
 0x2ba   :  { %6018 = vmatpush3.bf16.msra.mxu1 %v6349_v27  ;;  %6040 = vmatpush3.bf16.msra.mxu0 %v6350_v28  ;;  %v2269_v27 = vld [vmem:[#allocation14 + $0x260] sm:$0xff]  ;;  %v2266_v28 = vld [vmem:[#allocation14 + $0x248] sm:$0xff] }
 0x2bb   :  { %6019 = vmatprep.subr.bf16.mxu1 %v6351_v30  ;;  %6041 = vmatprep.subr.bf16.mxu0 %v6352_v32  ;;  %v2270_v30 = vld [vmem:[#allocation14 + $0x268] sm:$0xff] }
 0x2bc   :  { %v5507_v45 = vcombine.low %v2266_v28, %v2270_v30 }
 0x2be   :  { %6020 = vmatpush3.bf16.msra.mxu1 %v6353_v34  ;;  %6042 = vmatpush3.bf16.msra.mxu0 %v6354_v36 }
 0x2bf   :  { %6021 = vmatprep.subr.bf16.mxu1 %v6355_v37  ;;  %6043 = vmatprep.subr.bf16.mxu0 %v6356_v38  ;;  %v5506_v38 = vcombine.high %v2265_v23, %v2269_v27 }
 0x2c2   :  { %6022 = vmatpush3.bf16.msra.mxu1 %v6357_v39  ;;  %6044 = vmatpush3.bf16.msra.mxu0 %v6358_v40  ;;  %v5508_v39 = vcombine.high %v2266_v28, %v2270_v30  ;;  %v2273_v40 = vld [vmem:[#allocation14 + $0x280] sm:$0xff] }
 0x2c3   :  { %6023 = vmatprep.subr.bf16.mxu1 %v6359_v41  ;;  %6045 = vmatprep.subr.bf16.mxu0 %v6360_v42  ;;  %v2277_v41 = vld [vmem:[#allocation14 + $0x2a0] sm:$0xff]  ;;  %v2274_v42 = vld [vmem:[#allocation14 + $0x288] sm:$0xff] }
 0x2c4   :  { %v5514_v46 = vcombine.high %v2273_v40, %v2277_v41 }
 0x2c6   :  { %6024 = vmatpush3.bf16.msra.mxu1 %v6361_v43  ;;  %6046 = vmatpush3.bf16.msra.mxu0 %v6362_v44  ;;  %v2278_v43 = vld [vmem:[#allocation14 + $0x2a8] sm:$0xff]  ;;  %v5505_v44 = vcombine.low %v2265_v23, %v2269_v27 }
 0x2c7   :  { %2641 = vmatprep.subr.bf16.mxu1 %v5498_v49  ;;  %2682 = vmatprep.subr.bf16.mxu0 %v5500_v52  ;;  %v5516_v47 = vcombine.high %v2274_v42, %v2278_v43  ;;  %v2281_v49 = vld [vmem:[#allocation14 + $0x2c0] sm:$0xff]  ;;  %v2282_v52 = vld [vmem:[#allocation14 + $0x2c8] sm:$0xff] }
 0x2c8   :  { %v2314_v23 = vld [vmem:[#allocation14 + $0x3c8] sm:$0xff] }
 0x35c   :  { %v5981_v53 = vpop.f32.mrb[12].mxu1  ;;  %v6003_v54 = vpop.f32.mrb[16].mxu0 }
 0x35d   :  { %v5982_v56 = vpop.f32.mrb[13].mxu1  ;;  %v6004_v57 = vpop.f32.mrb[17].mxu0 }
 0x35e   :  { %v5983_v58 = vadd.f32 %v5982_v56, %v5981_v53  ;;  %v6005_v59 = vadd.f32 %v6004_v57, %v6003_v54  ;;  %v5984_v61 = vpop.f32.mrb[14].mxu1  ;;  %v6006_v62 = vpop.f32.mrb[18].mxu0  ;;  %v2286_v53 = vld [vmem:[#allocation14 + $0x2e8] sm:$0xff]  ;;  %v5513_v54 = vcombine.low %v2273_v40, %v2277_v41  ;;  %v2289_v56 = vld [vmem:[#allocation14 + $0x300] sm:$0xff] }
 0x35f   :  { %v5985_v0 = vpop.f32.mrb[15].mxu1  ;;  %v6007_v1 = vpop.f32.mrb[19].mxu0  ;;  %v2293_v57 = vld [vmem:[#allocation14 + $0x320] sm:$0xff]  ;;  %v5521_v61 = vcombine.low %v2281_v49, %v2285_v50  ;;  %v5523_v62 = vcombine.low %v2282_v52, %v2286_v53 }
 0x360   :  { %v1504_v3 = vadd.f32 %v5983_v58, %v1276_v55  ;;  %v5515_v55 = vcombine.low %v2274_v42, %v2278_v43  ;;  %v2290_v58 = vld [vmem:[#allocation14 + $0x308] sm:$0xff]  ;;  %v5530_v0 = vcombine.high %v2289_v56, %v2293_v57 }
 0x362   :  { %v7215_v4 = vadd.f32 %v6005_v59, %v1504_v3  ;;  %v2294_v59 = vld [vmem:[#allocation14 + $0x328] sm:$0xff]  ;;  %v2297_v3 = vld [vmem:[#allocation14 + $0x340] sm:$0xff] }
 0x363   :  { %v5532_v1 = vcombine.high %v2290_v58, %v2294_v59 }
 0x37c   :  { %v1798_v10 = vpop.f32.mrb[16].mxu1  ;;  %v1839_v11 = vpop.f32.mrb[20].mxu0 }
 0x37d   :  { %v1799_v12 = vadd.f32 %v1798_v10, %v1747_v6  ;;  %v1840_v13 = vadd.f32 %v1839_v11, %v1755_v7  ;;  %v1800_v14 = vpop.f32.mrb[17].mxu1  ;;  %v1841_v15 = vpop.f32.mrb[21].mxu0  ;;  %v2298_v6 = vld [vmem:[#allocation14 + $0x348] sm:$0xff]  ;;  %v5538_v10 = vcombine.high %v2297_v3, %v2301_v5 }
 0x37e   :  { %v1801_v16 = vadd.f32 %v1800_v14, %v1751_v8  ;;  %v1842_v17 = vadd.f32 %v1841_v15, %v1759_v9  ;;  %v1802_v18 = vpop.f32.mrb[18].mxu1  ;;  %v1843_v60 = vpop.f32.mrb[22].mxu0  ;;  %v2302_v7 = vld [vmem:[#allocation14 + $0x368] sm:$0xff]  ;;  %v5529_v8 = vcombine.low %v2289_v56, %v2293_v57  ;;  %v5531_v9 = vcombine.low %v2290_v58, %v2294_v59  ;;  %v2305_v14 = vld [vmem:[#allocation14 + $0x380] sm:$0xff]  ;;  %v2268_v56 = vld [vmem:[#allocation14 + $0x258] sm:$0xff] }
 0x37f   :  { %v1846_v19 = vmax.f32 %v1799_v12, 0.0  ;;  %v1848_v20 = vmax.f32 %v1840_v13, 0.0  ;;  %v1803_v21 = vpop.f32.mrb[19].mxu1  ;;  %v1844_v22 = vpop.f32.mrb[23].mxu0  ;;  %v5540_v11 = vcombine.high %v2298_v6, %v2302_v7  ;;  %v5537_v12 = vcombine.low %v2297_v3, %v2301_v5  ;;  %v2309_v15 = vld [vmem:[#allocation14 + $0x3a0] sm:$0xff]  ;;  %v2310_v18 = vld [vmem:[#allocation14 + $0x3a8] sm:$0xff] }
 0x380   :  { %v1847_v25 = vmax.f32 %v1801_v16, 0.0  ;;  %v1849_v26 = vmax.f32 %v1842_v17, 0.0  ;;  %v5539_v13 = vcombine.low %v2298_v6, %v2302_v7  ;;  %v2306_v16 = vld [vmem:[#allocation14 + $0x388] sm:$0xff]  ;;  %v5546_v17 = vcombine.high %v2305_v14, %v2309_v15  ;;  %v2313_v21 = vld [vmem:[#allocation14 + $0x3c0] sm:$0xff]  ;;  %v2272_v57 = vld [vmem:[#allocation14 + $0x278] sm:$0xff] }
 0x381   :  { %v1850_v36 = vpack.c.bf16 %v1846_v19, %v1846_v19  ;;  %v1852_v37 = vpack.c.bf16 %v1848_v20, %v1848_v20  ;;  %v5545_v60 = vcombine.low %v2305_v14, %v2309_v15  ;;  %v5547_v19 = vcombine.low %v2306_v16, %v2310_v18  ;;  %v2317_v22 = vld [vmem:[#allocation14 + $0x3e0] sm:$0xff]  ;;  %v2276_v3 = vld [vmem:[#allocation14 + $0x298] sm:$0xff] }
 0x382   :  { %v1851_v32 = vpack.c.bf16 %v1847_v25, %v1847_v25  ;;  %v1853_v34 = vpack.c.bf16 %v1849_v26, %v1849_v26  ;;  %v5548_v20 = vcombine.high %v2306_v16, %v2310_v18  ;;  %v5554_v25 = vcombine.high %v2313_v21, %v2317_v22  ;;  %v2318_v26 = vld [vmem:[#allocation14 + $0x3e8] sm:$0xff]  ;;  %v2280_v5 = vld [vmem:[#allocation14 + $0x2b8] sm:$0xff]  ;;  %v2291_v18 = vld [vmem:[#allocation14 + $0x310] sm:$0xff] }
 0x383   :  { %v5553_v27 = vcombine.low %v2313_v21, %v2317_v22  ;;  %v5555_v28 = vcombine.low %v2314_v23, %v2318_v26  ;;  %v5556_v30 = vcombine.high %v2314_v23, %v2318_v26  ;;  %v5511_v7 = vcombine.low %v2268_v56, %v2272_v57  ;;  %v2299_v26 = vld [vmem:[#allocation14 + $0x350] sm:$0xff] }
 0x384   :  { %2143 = vmatprep.mubr.bf16.mxu1 %v1851_v32  ;;  %2183 = vmatprep.mubr.bf16.mxu0 %v1853_v34  ;;  %v2259_v32 = vld [vmem:[#allocation14 + $0x210] sm:$0xff]  ;;  %v5519_v15 = vcombine.low %v2276_v3, %v2280_v5 }
 0x385   :  { %2144 = vmatmul.mubr.bf16.vlgmr.msra.gmra.mrb[20].mxu1 %v1850_v36  ;;  %2184 = vmatmul.mubr.bf16.vlgmr.msra.gmra.mrb[24].mxu0 %v1852_v37  ;;  %v2263_v34 = vld [vmem:[#allocation14 + $0x230] sm:$0xff]  ;;  %v2260_v36 = vld [vmem:[#allocation14 + $0x218] sm:$0xff] }
 0x386   :  { %2642 = vmatpush1.bf16.msra.mxu1 %v5497_v48  ;;  %2683 = vmatpush1.bf16.msra.mxu0 %v5499_v51  ;;  %v5522_v48 = vcombine.high %v2281_v49, %v2285_v50  ;;  %v5524_v51 = vcombine.high %v2282_v52, %v2286_v53  ;;  %v5502_v37 = vcombine.high %v2259_v32, %v2263_v34 }
 0x387   :  { %2643 = vmatprep.subr.bf16.mxu1 %v5506_v38  ;;  %2684 = vmatprep.subr.bf16.mxu0 %v5508_v39  ;;  %v2264_v38 = vld [vmem:[#allocation14 + $0x238] sm:$0xff]  ;;  %v5501_v39 = vcombine.low %v2259_v32, %v2263_v34 }
 0x388   :  { %2673 = vmatprep.mubr.bf16.mxu1 %v6973_v63  ;;  %2714 = vmatprep.mubr.bf16.mxu0 %v6973_v63  ;;  %v5503_v40 = vcombine.low %v2260_v36, %v2264_v38  ;;  %v5504_v41 = vcombine.high %v2260_v36, %v2264_v38  ;;  %v2307_v38 = vld [vmem:[#allocation14 + $0x390] sm:$0xff] }
 0x38a   :  { %2644 = vmatpush1.bf16.msra.mxu1 %v5505_v44  ;;  %2685 = vmatpush1.bf16.msra.mxu0 %v5507_v45  ;;  %v1918_v44 = vld [vmem:[#allocation9 + $0x13] sm:$0x1] }
 0x38b   :  { %2645 = vmatprep.subr.bf16.mxu1 %v5514_v46  ;;  %2686 = vmatprep.subr.bf16.mxu0 %v5516_v47 }
 0x38e   :  { %2646 = vmatpush1.bf16.msra.mxu1 %v5513_v54  ;;  %2687 = vmatpush1.bf16.msra.mxu0 %v5515_v55 }
 0x38f   :  { %2647 = vmatprep.subr.bf16.mxu1 %v5522_v48  ;;  %2688 = vmatprep.subr.bf16.mxu0 %v5524_v51  ;;  %v2267_v48 = vld [vmem:[#allocation14 + $0x250] sm:$0xff] }
 0x390   :  { %v2271_v51 = vld [vmem:[#allocation14 + $0x270] sm:$0xff] }
 0x391   :  { %v5509_v6 = vcombine.low %v2267_v48, %v2271_v51 }
 0x392   :  { %2648 = vmatpush1.bf16.msra.mxu1 %v5521_v61  ;;  %2689 = vmatpush1.bf16.msra.mxu0 %v5523_v62  ;;  %v5510_v61 = vcombine.high %v2267_v48, %v2271_v51  ;;  %v5512_v62 = vcombine.high %v2268_v56, %v2272_v57  ;;  %v2192_v48 = vld [vmem:[#allocation14] sm:$0xff]  ;;  %v2193_v56 = vld [vmem:[#allocation14 + $0x8] sm:$0xff] }
 0x393   :  { %2649 = vmatprep.subr.bf16.mxu1 %v5530_v0  ;;  %2690 = vmatprep.subr.bf16.mxu0 %v5532_v1  ;;  %v2275_v0 = vld [vmem:[#allocation14 + $0x290] sm:$0xff]  ;;  %v2196_v51 = vld [vmem:[#allocation14 + $0x20] sm:$0xff]  ;;  %v2197_v57 = vld [vmem:[#allocation14 + $0x28] sm:$0xff] }
 0x394   :  { %v2279_v1 = vld [vmem:[#allocation14 + $0x2b0] sm:$0xff] }
 0x395   :  { %v5517_v14 = vcombine.low %v2275_v0, %v2279_v1 }
 0x396   :  { %2650 = vmatpush1.bf16.msra.mxu1 %v5529_v8  ;;  %2691 = vmatpush1.bf16.msra.mxu0 %v5531_v9  ;;  %v5518_v8 = vcombine.high %v2275_v0, %v2279_v1  ;;  %v5520_v9 = vcombine.high %v2276_v3, %v2280_v5  ;;  %v5564_v0 = vcombine.high %v2193_v56, %v2197_v57  ;;  %v2200_v1 = vld [vmem:[#allocation14 + $0x40] sm:$0xff]  ;;  %v2201_v5 = vld [vmem:[#allocation14 + $0x48] sm:$0xff] }
 0x397   :  { %2651 = vmatprep.subr.bf16.mxu1 %v5538_v10  ;;  %2692 = vmatprep.subr.bf16.mxu0 %v5540_v11  ;;  %v2283_v10 = vld [vmem:[#allocation14 + $0x2d0] sm:$0xff]  ;;  %v2204_v3 = vld [vmem:[#allocation14 + $0x60] sm:$0xff] }
 0x398   :  { %v2287_v11 = vld [vmem:[#allocation14 + $0x2f0] sm:$0xff] }
 0x399   :  { %v5526_v16 = vcombine.high %v2283_v10, %v2287_v11  ;;  %v5525_v21 = vcombine.low %v2283_v10, %v2287_v11  ;;  %v2208_v11 = vld [vmem:[#allocation14 + $0x80] sm:$0xff] }
 0x39a   :  { %2652 = vmatpush1.bf16.msra.mxu1 %v5537_v12  ;;  %2693 = vmatpush1.bf16.msra.mxu0 %v5539_v13  ;;  %v2284_v12 = vld [vmem:[#allocation14 + $0x2d8] sm:$0xff] }
 0x39b   :  { %2653 = vmatprep.subr.bf16.mxu1 %v5546_v17  ;;  %2694 = vmatprep.subr.bf16.mxu0 %v5548_v20  ;;  %v2288_v13 = vld [vmem:[#allocation14 + $0x2f8] sm:$0xff] }
 0x39c   :  { %v5528_v17 = vcombine.high %v2284_v12, %v2288_v13  ;;  %v2296_v20 = vld [vmem:[#allocation14 + $0x338] sm:$0xff]  ;;  %v5527_v22 = vcombine.low %v2284_v12, %v2288_v13  ;;  %v2212_v12 = vld [vmem:[#allocation14 + $0xa0] sm:$0xff]  ;;  %v2209_v13 = vld [vmem:[#allocation14 + $0x88] sm:$0xff] }
 0x39e   :  { %2654 = vmatpush1.bf16.msra.mxu1 %v5545_v60  ;;  %2695 = vmatpush1.bf16.msra.mxu0 %v5547_v19  ;;  %v2295_v60 = vld [vmem:[#allocation14 + $0x330] sm:$0xff]  ;;  %v2292_v19 = vld [vmem:[#allocation14 + $0x318] sm:$0xff] }
 0x39f   :  { %2655 = vmatprep.subr.bf16.mxu1 %v5554_v25  ;;  %2696 = vmatprep.subr.bf16.mxu0 %v5556_v30  ;;  %v5534_v23 = vcombine.high %v2291_v18, %v2295_v60  ;;  %v5536_v25 = vcombine.high %v2292_v19, %v2296_v20  ;;  %v2304_v30 = vld [vmem:[#allocation14 + $0x378] sm:$0xff]  ;;  %v5533_v32 = vcombine.low %v2291_v18, %v2295_v60  ;;  %v2216_v60 = vld [vmem:[#allocation14 + $0xc0] sm:$0xff] }
 0x3a0   :  { %v5535_v34 = vcombine.low %v2292_v19, %v2296_v20  ;;  %v2220_v19 = vld [vmem:[#allocation14 + $0xe0] sm:$0xff]  ;;  %v2217_v20 = vld [vmem:[#allocation14 + $0xc8] sm:$0xff] }
 0x3a2   :  { %2656 = vmatpush1.bf16.msra.mxu1 %v5553_v27  ;;  %2697 = vmatpush1.bf16.msra.mxu0 %v5555_v28  ;;  %v2303_v27 = vld [vmem:[#allocation14 + $0x370] sm:$0xff]  ;;  %v2300_v28 = vld [vmem:[#allocation14 + $0x358] sm:$0xff] }
 0x3a3   :  { %2723 = vmatprep.subr.bf16.mxu1 %v5502_v37  ;;  %2764 = vmatprep.subr.bf16.mxu0 %v5504_v41  ;;  %v5542_v36 = vcombine.high %v2299_v26, %v2303_v27  ;;  %v5544_v37 = vcombine.high %v2300_v28, %v2304_v30  ;;  %v2312_v41 = vld [vmem:[#allocation14 + $0x3b8] sm:$0xff] }
 0x458   :  { %v6025_v42 = vpop.f32.mrb[20].mxu1  ;;  %v6047_v43 = vpop.f32.mrb[24].mxu0 }
 0x459   :  { %v6026_v45 = vpop.f32.mrb[21].mxu1  ;;  %v6048_v46 = vpop.f32.mrb[25].mxu0 }
 0x45a   :  { %v6027_v47 = vadd.f32 %v6026_v45, %v6025_v42  ;;  %v6049_v49 = vadd.f32 %v6048_v46, %v6047_v43  ;;  %v6028_v50 = vpop.f32.mrb[22].mxu1  ;;  %v6050_v52 = vpop.f32.mrb[26].mxu0  ;;  %v5541_v42 = vcombine.low %v2299_v26, %v2303_v27  ;;  %v5543_v43 = vcombine.low %v2300_v28, %v2304_v30  ;;  %v2315_v46 = vld [vmem:[#allocation14 + $0x3d0] sm:$0xff]  ;;  %v2224_v26 = vld [vmem:[#allocation14 + $0x100] sm:$0xff]  ;;  %v2225_v28 = vld [vmem:[#allocation14 + $0x108] sm:$0xff] }
 0x45b   :  { %v6029_v53 = vpop.f32.mrb[23].mxu1  ;;  %v6051_v54 = vpop.f32.mrb[27].mxu0  ;;  %v2320_v50 = vld [vmem:[#allocation14 + $0x3f8] sm:$0xff]  ;;  %v2228_v27 = vld [vmem:[#allocation14 + $0x120] sm:$0xff]  ;;  %v2229_v30 = vld [vmem:[#allocation14 + $0x128] sm:$0xff] }
 0x45c   :  { %v2146_v55 = vadd.f32 %v6027_v47, %v1918_v44  ;;  %v2319_v47 = vld [vmem:[#allocation14 + $0x3f0] sm:$0xff] }
 0x45d   :  { %v5558_v54 = vcombine.high %v2315_v46, %v2319_v47 }
 0x45e   :  { %v2186_v58 = vadd.f32 %v6049_v49, %v2146_v55  ;;  %v2316_v49 = vld [vmem:[#allocation14 + $0x3d8] sm:$0xff] }
 0x45f   :  { %v5560_v55 = vcombine.high %v2316_v49, %v2320_v50 }
 0x460   :  { %v7223_v59 = vpack.c.bf16 %v2186_v58, %v2186_v58  ;;  %v5557_v58 = vcombine.low %v2315_v46, %v2319_v47  ;;  %v2240_v46 = vld [vmem:[#allocation14 + $0x180] sm:$0xff] }
 0x461   :  { %v2244_v47 = vld [vmem:[#allocation14 + $0x1a0] sm:$0xff] }
 0x462   :  { %2674 = vmatmul.mubr.bf16.vlgmr.msra.gmra.mrb[24].mxu1 %v7223_v59  ;;  %2715 = vmatmul.mubr.bf16.vlgmr.msra.gmra.mrb[28].mxu0 %v7223_v59 }
 0x463   :  { %2724 = vmatpush1.bf16.msra.mxu1 %v5501_v39  ;;  %2765 = vmatpush1.bf16.msra.mxu0 %v5503_v40  ;;  %v2311_v39 = vld [vmem:[#allocation14 + $0x3b0] sm:$0xff]  ;;  %v2308_v40 = vld [vmem:[#allocation14 + $0x398] sm:$0xff] }
 0x464   :  { %2725 = vmatprep.subr.bf16.mxu1 %v5510_v61  ;;  %2766 = vmatprep.subr.bf16.mxu0 %v5512_v62  ;;  %v5550_v44 = vcombine.high %v2307_v38, %v2311_v39  ;;  %v5552_v45 = vcombine.high %v2308_v40, %v2312_v41  ;;  %v5549_v52 = vcombine.low %v2307_v38, %v2311_v39  ;;  %v2232_v38 = vld [vmem:[#allocation14 + $0x140] sm:$0xff] }
 0x465   :  { %2755 = vmatprep.mubr.bf16.mxu1 %v6973_v63  ;;  %2796 = vmatprep.mubr.bf16.mxu0 %v6973_v63  ;;  %v5551_v53 = vcombine.low %v2308_v40, %v2312_v41  ;;  %v5559_v61 = vcombine.low %v2316_v49, %v2320_v50  ;;  %v5562_v62 = vcombine.high %v2192_v48, %v2196_v51  ;;  %v2236_v39 = vld [vmem:[#allocation14 + $0x160] sm:$0xff]  ;;  %v2233_v40 = vld [vmem:[#allocation14 + $0x148] sm:$0xff] }
 0x466   :  { %v2237_v41 = vld [vmem:[#allocation14 + $0x168] sm:$0xff] }
 0x467   :  { %2726 = vmatpush1.bf16.msra.mxu1 %v5509_v6  ;;  %2767 = vmatpush1.bf16.msra.mxu0 %v5511_v7  ;;  %v2205_v6 = vld [vmem:[#allocation14 + $0x68] sm:$0xff]  ;;  %v5561_v7 = vcombine.low %v2192_v48, %v2196_v51  ;;  %v2248_v48 = vld [vmem:[#allocation14 + $0x1c0] sm:$0xff] }
 0x468   :  { %2727 = vmatprep.subr.bf16.mxu1 %v5518_v8  ;;  %2768 = vmatprep.subr.bf16.mxu0 %v5520_v9  ;;  %v5563_v8 = vcombine.low %v2193_v56, %v2197_v57  ;;  %v5570_v9 = vcombine.high %v2200_v1, %v2204_v3  ;;  %v5572_v10 = vcombine.high %v2201_v5, %v2205_v6  ;;  %v2241_v49 = vld [vmem:[#allocation14 + $0x188] sm:$0xff]  ;;  %v2252_v51 = vld [vmem:[#allocation14 + $0x1e0] sm:$0xff] }
 0x469   :  { %v2245_v50 = vld [vmem:[#allocation14 + $0x1a8] sm:$0xff] }
 0x46a   :  { %v2249_v56 = vld [vmem:[#allocation14 + $0x1c8] sm:$0xff] }
 0x46b   :  { %2728 = vmatpush1.bf16.msra.mxu1 %v5517_v14  ;;  %2769 = vmatpush1.bf16.msra.mxu0 %v5519_v15  ;;  %v2213_v14 = vld [vmem:[#allocation14 + $0xa8] sm:$0xff]  ;;  %v5569_v15 = vcombine.low %v2200_v1, %v2204_v3  ;;  %v2194_v1 = vld [vmem:[#allocation14 + $0x10] sm:$0xff] }
 0x46c   :  { %2729 = vmatprep.subr.bf16.mxu1 %v5526_v16  ;;  %2770 = vmatprep.subr.bf16.mxu0 %v5528_v17  ;;  %v5571_v16 = vcombine.low %v2201_v5, %v2205_v6  ;;  %v5578_v17 = vcombine.high %v2208_v11, %v2212_v12  ;;  %v5580_v18 = vcombine.high %v2209_v13, %v2213_v14  ;;  %v2253_v57 = vld [vmem:[#allocation14 + $0x1e8] sm:$0xff]  ;;  %v2198_v3 = vld [vmem:[#allocation14 + $0x30] sm:$0xff]  ;;  %v2195_v5 = vld [vmem:[#allocation14 + $0x18] sm:$0xff] }
 0x46d   :  { %v2199_v6 = vld [vmem:[#allocation14 + $0x38] sm:$0xff] }
 0x46f   :  { %2730 = vmatpush1.bf16.msra.mxu1 %v5525_v21  ;;  %2771 = vmatpush1.bf16.msra.mxu0 %v5527_v22  ;;  %v2221_v21 = vld [vmem:[#allocation14 + $0xe8] sm:$0xff]  ;;  %v5577_v22 = vcombine.low %v2208_v11, %v2212_v12  ;;  %v2202_v11 = vld [vmem:[#allocation14 + $0x50] sm:$0xff] }
 0x470   :  { %2731 = vmatprep.subr.bf16.mxu1 %v5534_v23  ;;  %2772 = vmatprep.subr.bf16.mxu0 %v5536_v25  ;;  %v5586_v23 = vcombine.high %v2216_v60, %v2220_v19  ;;  %v5588_v25 = vcombine.high %v2217_v20, %v2221_v21  ;;  %v2206_v12 = vld [vmem:[#allocation14 + $0x70] sm:$0xff] }
 0x473   :  { %2732 = vmatpush1.bf16.msra.mxu1 %v5533_v32  ;;  %2773 = vmatpush1.bf16.msra.mxu0 %v5535_v34  ;;  %v5585_v32 = vcombine.low %v2216_v60, %v2220_v19  ;;  %v5587_v34 = vcombine.low %v2217_v20, %v2221_v21  ;;  %v2210_v19 = vld [vmem:[#allocation14 + $0x90] sm:$0xff]  ;;  %v2211_v21 = vld [vmem:[#allocation14 + $0x98] sm:$0xff] }
 0x474   :  { %2733 = vmatprep.subr.bf16.mxu1 %v5542_v36  ;;  %2774 = vmatprep.subr.bf16.mxu0 %v5544_v37  ;;  %v5594_v36 = vcombine.high %v2224_v26, %v2228_v27  ;;  %v5596_v37 = vcombine.high %v2225_v28, %v2229_v30  ;;  %v2214_v20 = vld [vmem:[#allocation14 + $0xb0] sm:$0xff] }
 0x477   :  { %2734 = vmatpush1.bf16.msra.mxu1 %v5541_v42  ;;  %2775 = vmatpush1.bf16.msra.mxu0 %v5543_v43  ;;  %v5593_v42 = vcombine.low %v2224_v26, %v2228_v27  ;;  %v5595_v43 = vcombine.low %v2225_v28, %v2229_v30  ;;  %v2218_v26 = vld [vmem:[#allocation14 + $0xd0] sm:$0xff]  ;;  %v2219_v28 = vld [vmem:[#allocation14 + $0xd8] sm:$0xff] }
 0x478   :  { %2735 = vmatprep.subr.bf16.mxu1 %v5550_v44  ;;  %2776 = vmatprep.subr.bf16.mxu0 %v5552_v45  ;;  %v5602_v44 = vcombine.high %v2232_v38, %v2236_v39  ;;  %v5604_v45 = vcombine.high %v2233_v40, %v2237_v41  ;;  %v2222_v27 = vld [vmem:[#allocation14 + $0xf0] sm:$0xff]  ;;  %v2223_v30 = vld [vmem:[#allocation14 + $0xf8] sm:$0xff] }
 0x47b   :  { %2736 = vmatpush1.bf16.msra.mxu1 %v5549_v52  ;;  %2777 = vmatpush1.bf16.msra.mxu0 %v5551_v53  ;;  %v5601_v52 = vcombine.low %v2232_v38, %v2236_v39  ;;  %v5603_v53 = vcombine.low %v2233_v40, %v2237_v41  ;;  %v2226_v38 = vld [vmem:[#allocation14 + $0x110] sm:$0xff]  ;;  %v2227_v40 = vld [vmem:[#allocation14 + $0x118] sm:$0xff] }
 0x47c   :  { %2737 = vmatprep.subr.bf16.mxu1 %v5558_v54  ;;  %2778 = vmatprep.subr.bf16.mxu0 %v5560_v55  ;;  %v5610_v54 = vcombine.high %v2240_v46, %v2244_v47  ;;  %v5612_v55 = vcombine.high %v2241_v49, %v2245_v50  ;;  %v2230_v39 = vld [vmem:[#allocation14 + $0x130] sm:$0xff]  ;;  %v2231_v41 = vld [vmem:[#allocation14 + $0x138] sm:$0xff] }
 0x47f   :  { %2738 = vmatpush1.bf16.msra.mxu1 %v5557_v58  ;;  %2779 = vmatpush1.bf16.msra.mxu0 %v5559_v61  ;;  %v5609_v58 = vcombine.low %v2240_v46, %v2244_v47  ;;  %v5611_v61 = vcombine.low %v2241_v49, %v2245_v50  ;;  %v2238_v46 = vld [vmem:[#allocation14 + $0x170] sm:$0xff]  ;;  %v2235_v47 = vld [vmem:[#allocation14 + $0x158] sm:$0xff]  ;;  %v5597_v50 = vcombine.low %v2226_v38, %v2230_v39 }
 0x480   :  { %3125 = vmatprep.subr.bf16.mxu1 %v5562_v62  ;;  %3166 = vmatprep.subr.bf16.mxu0 %v5564_v0  ;;  %v5618_v62 = vcombine.high %v2248_v48, %v2252_v51  ;;  %v5620_v0 = vcombine.high %v2249_v56, %v2253_v57  ;;  %v2239_v49 = vld [vmem:[#allocation14 + $0x178] sm:$0xff] }
 0x482   :  { %2756 = vmatmul.mubr.bf16.vlgmr.msra.gmra.mrb[28].mxu1 %v7223_v59  ;;  %2797 = vmatmul.mubr.bf16.vlgmr.msra.gmra.mrb[32].mxu0 %v7223_v59  ;;  %v5579_v59 = vcombine.low %v2209_v13, %v2213_v14  ;;  %v2203_v13 = vld [vmem:[#allocation14 + $0x58] sm:$0xff] }
 0x483   :  { %3126 = vmatpush1.bf16.msra.mxu1 %v5561_v7  ;;  %3167 = vmatpush1.bf16.msra.mxu0 %v5563_v8  ;;  %v5617_v7 = vcombine.low %v2248_v48, %v2252_v51  ;;  %v5619_v8 = vcombine.low %v2249_v56, %v2253_v57  ;;  %v2207_v14 = vld [vmem:[#allocation14 + $0x78] sm:$0xff]  ;;  %v2246_v48 = vld [vmem:[#allocation14 + $0x1b0] sm:$0xff] }
 0x484   :  { %3127 = vmatprep.subr.bf16.mxu1 %v5570_v9  ;;  %3168 = vmatprep.subr.bf16.mxu0 %v5572_v10  ;;  %v5566_v9 = vcombine.high %v2194_v1, %v2198_v3  ;;  %v5568_v10 = vcombine.high %v2195_v5, %v2199_v6  ;;  %v5576_v60 = vcombine.high %v2203_v13, %v2207_v14  ;;  %v2243_v51 = vld [vmem:[#allocation14 + $0x198] sm:$0xff] }
 0x485   :  { %3157 = vmatprep.mubr.bf16.mxu1 %v6973_v63  ;;  %3198 = vmatprep.mubr.bf16.mxu0 %v6973_v63  ;;  %v2247_v56 = vld [vmem:[#allocation14 + $0x1b8] sm:$0xff] }
 0x487   :  { %3128 = vmatpush1.bf16.msra.mxu1 %v5569_v15  ;;  %3169 = vmatpush1.bf16.msra.mxu0 %v5571_v16  ;;  %v5565_v15 = vcombine.low %v2194_v1, %v2198_v3  ;;  %v5567_v16 = vcombine.low %v2195_v5, %v2199_v6  ;;  %v2254_v1 = vld [vmem:[#allocation14 + $0x1f0] sm:$0xff]  ;;  %v2251_v3 = vld [vmem:[#allocation14 + $0x1d8] sm:$0xff] }
 0x488   :  { %3129 = vmatprep.subr.bf16.mxu1 %v5578_v17  ;;  %3170 = vmatprep.subr.bf16.mxu0 %v5580_v18  ;;  %v7235_v17 = vpack.c.bf16 %v7215_v4, %v7215_v4  ;;  %v5574_v18 = vcombine.high %v2202_v11, %v2206_v12  ;;  %v5582_v4 = vcombine.high %v2210_v19, %v2214_v20  ;;  %v2255_v5 = vld [vmem:[#allocation14 + $0x1f8] sm:$0xff] }
 0x48b   :  { %3130 = vmatpush1.bf16.msra.mxu1 %v5577_v22  ;;  %3171 = vmatpush1.bf16.msra.mxu0 %v5579_v59  ;;  %v2215_v22 = vld [vmem:[#allocation14 + $0xb8] sm:$0xff]  ;;  %v5573_v59 = vcombine.low %v2202_v11, %v2206_v12  ;;  %v5623_v11 = vcombine.low %v2251_v3, %v2255_v5  ;;  %v6365_v12 = vld [vmem:[#allocation15 + $0x4] ss:$16 sps:$4 sm:$0xff]  }
 0x48c   :  { %3131 = vmatprep.subr.bf16.mxu1 %v5586_v23  ;;  %3172 = vmatprep.subr.bf16.mxu0 %v5588_v25  ;;  %v5575_v23 = vcombine.low %v2203_v13, %v2207_v14  ;;  %v5584_v25 = vcombine.high %v2211_v21, %v2215_v22  ;;  %v6368_v13 = vld [vmem:[#allocation15 + $0xc] ss:$16 sps:$4 sm:$0xff]   ;;  %v6363_v14 = vld [vmem:[#allocation15] ss:$16 sps:$4 sm:$0xff]  }
 0x48f   :  { %3132 = vmatpush1.bf16.msra.mxu1 %v5585_v32  ;;  %3173 = vmatpush1.bf16.msra.mxu0 %v5587_v34  ;;  %v5581_v32 = vcombine.low %v2210_v19, %v2214_v20  ;;  %v5583_v34 = vcombine.low %v2211_v21, %v2215_v22  ;;  %v6372_v19 = vld [vmem:[#allocation15 + $0x28] ss:$16 sps:$4 sm:$0xff]   ;;  %v6377_v20 = vld [vmem:[#allocation15 + $0x44] ss:$16 sps:$4 sm:$0xff]   ;;  %v6380_v21 = vld [vmem:[#allocation15 + $0x4c] ss:$16 sps:$4 sm:$0xff]  }
 0x490   :  { %3133 = vmatprep.subr.bf16.mxu1 %v5594_v36  ;;  %3174 = vmatprep.subr.bf16.mxu0 %v5596_v37  ;;  %v5590_v36 = vcombine.high %v2218_v26, %v2222_v27  ;;  %v5592_v37 = vcombine.high %v2219_v28, %v2223_v30  ;;  %v6375_v22 = vld [vmem:[#allocation15 + $0x40] ss:$16 sps:$4 sm:$0xff]  }
 0x493   :  { %3134 = vmatpush1.bf16.msra.mxu1 %v5593_v42  ;;  %3175 = vmatpush1.bf16.msra.mxu0 %v5595_v43  ;;  %v5589_v42 = vcombine.low %v2218_v26, %v2222_v27  ;;  %v5591_v43 = vcombine.low %v2219_v28, %v2223_v30  ;;  %v6389_v26 = vld [vmem:[#allocation15 + $0x84] ss:$16 sps:$4 sm:$0xff]   ;;  %v6392_v27 = vld [vmem:[#allocation15 + $0x8c] ss:$16 sps:$4 sm:$0xff]   ;;  %v6387_v28 = vld [vmem:[#allocation15 + $0x80] ss:$16 sps:$4 sm:$0xff]  }
 0x494   :  { %3135 = vmatprep.subr.bf16.mxu1 %v5602_v44  ;;  %3176 = vmatprep.subr.bf16.mxu0 %v5604_v45  ;;  %v5598_v44 = vcombine.high %v2226_v38, %v2230_v39  ;;  %v2234_v45 = vld [vmem:[#allocation14 + $0x150] sm:$0xff]  ;;  %v6390_v30 = vld [vmem:[#allocation15 + $0x88] ss:$16 sps:$4 sm:$0xff]   ;;  %v6404_v39 = vld [vmem:[#allocation15 + $0xcc] ss:$16 sps:$4 sm:$0xff]  }
 0x495   :  { %v5605_v57 = vcombine.low %v2234_v45, %v2238_v46  ;;  %v6401_v38 = vld [vmem:[#allocation15 + $0xc4] ss:$16 sps:$4 sm:$0xff]  }
 0x497   :  { %3136 = vmatpush1.bf16.msra.mxu1 %v5601_v52  ;;  %3177 = vmatpush1.bf16.msra.mxu0 %v5603_v53  ;;  %v5599_v52 = vcombine.low %v2227_v40, %v2231_v41  ;;  %v5606_v53 = vcombine.high %v2234_v45, %v2238_v46  ;;  %v6413_v45 = vld [vmem:[#allocation15 + $0x104] ss:$16 sps:$4 sm:$0xff]   ;;  %v6416_v46 = vld [vmem:[#allocation15 + $0x10c] ss:$16 sps:$4 sm:$0xff]  }
 0x498   :  { %3137 = vmatprep.subr.bf16.mxu1 %v5610_v54  ;;  %3178 = vmatprep.subr.bf16.mxu0 %v5612_v55  ;;  %v5608_v54 = vcombine.high %v2235_v47, %v2239_v49  ;;  %v2242_v55 = vld [vmem:[#allocation14 + $0x190] sm:$0xff] }
 0x499   :  { %v5613_v6 = vcombine.low %v2242_v55, %v2246_v48 }
 0x49b   :  { %3138 = vmatpush1.bf16.msra.mxu1 %v5609_v58  ;;  %3179 = vmatpush1.bf16.msra.mxu0 %v5611_v61  ;;  %v5607_v58 = vcombine.low %v2235_v47, %v2239_v49  ;;  %v5614_v61 = vcombine.high %v2242_v55, %v2246_v48  ;;  %v6411_v47 = vld [vmem:[#allocation15 + $0x100] ss:$16 sps:$4 sm:$0xff]   ;;  %v6414_v49 = vld [vmem:[#allocation15 + $0x108] ss:$16 sps:$4 sm:$0xff]   ;;  %v6425_v55 = vld [vmem:[#allocation15 + $0x144] ss:$16 sps:$4 sm:$0xff]  }
 0x49c   :  { %3139 = vmatprep.subr.bf16.mxu1 %v5618_v62  ;;  %3180 = vmatprep.subr.bf16.mxu0 %v5620_v0  ;;  %v5616_v62 = vcombine.high %v2243_v51, %v2247_v56  ;;  %v2250_v0 = vld [vmem:[#allocation14 + $0x1d0] sm:$0xff]  ;;  %v6428_v48 = vld [vmem:[#allocation15 + $0x14c] ss:$16 sps:$4 sm:$0xff]  }
 0x49f   :  { %3140 = vmatpush1.bf16.msra.mxu1 %v5617_v7  ;;  %3181 = vmatpush1.bf16.msra.mxu0 %v5619_v8  ;;  %v5615_v7 = vcombine.low %v2243_v51, %v2247_v56  ;;  %v5622_v8 = vcombine.high %v2250_v0, %v2254_v1  ;;  %v6423_v51 = vld [vmem:[#allocation15 + $0x140] ss:$16 sps:$4 sm:$0xff]   ;;  %v6426_v56 = vld [vmem:[#allocation15 + $0x148] ss:$16 sps:$4 sm:$0xff]  }
 0x4a0   :  { %3207 = vmatprep.subr.bf16.mxu1 %v5566_v9  ;;  %3248 = vmatprep.subr.bf16.mxu0 %v5568_v10  ;;  %v5624_v9 = vcombine.high %v2251_v3, %v2255_v5  ;;  %v5621_v10 = vcombine.low %v2250_v0, %v2254_v1  ;;  %v6437_v0 = vld [vmem:[#allocation15 + $0x184] ss:$16 sps:$4 sm:$0xff]   ;;  %v6440_v1 = vld [vmem:[#allocation15 + $0x18c] ss:$16 sps:$4 sm:$0xff]   ;;  %v6435_v3 = vld [vmem:[#allocation15 + $0x180] ss:$16 sps:$4 sm:$0xff]  }
 0x4a1   :  { %v6438_v5 = vld [vmem:[#allocation15 + $0x188] ss:$16 sps:$4 sm:$0xff]  }
 0x4a2   :  { %3158 = vmatmul.mubr.bf16.vlgmr.msra.gmra.mrb[32].mxu1 %v7235_v17  ;;  %3199 = vmatmul.mubr.bf16.vlgmr.msra.gmra.mrb[36].mxu0 %v7235_v17 }
 0x4a3   :  { %3208 = vmatpush1.bf16.msra.mxu1 %v5565_v15  ;;  %3249 = vmatpush1.bf16.msra.mxu0 %v5567_v16  ;;  %v6366_v15 = vld [vmem:[#allocation15 + $0x8] ss:$16 sps:$4 sm:$0xff]   ;;  %v6371_v16 = vld [vmem:[#allocation15 + $0x24] ss:$16 sps:$4 sm:$0xff]  }
 0x4a4   :  { %3209 = vmatprep.subr.bf16.mxu1 %v5574_v18  ;;  %3250 = vmatprep.subr.bf16.mxu0 %v5576_v60  ;;  %v6374_v18 = vld [vmem:[#allocation15 + $0x2c] ss:$16 sps:$4 sm:$0xff]   ;;  %v6369_v60 = vld [vmem:[#allocation15 + $0x20] ss:$16 sps:$4 sm:$0xff]  }
 0x4a5   :  { %3239 = vmatprep.mubr.bf16.mxu1 %v6973_v63  ;;  %3280 = vmatprep.mubr.bf16.mxu0 %v6973_v63  ;;  %v5600_v63 = vcombine.high %v2227_v40, %v2231_v41  ;;  %v6399_v40 = vld [vmem:[#allocation15 + $0xc0] ss:$16 sps:$4 sm:$0xff]   ;;  %v6402_v41 = vld [vmem:[#allocation15 + $0xc8] ss:$16 sps:$4 sm:$0xff]  }
 0x4a7   :  { %3210 = vmatpush1.bf16.msra.mxu1 %v5573_v59  ;;  %3251 = vmatpush1.bf16.msra.mxu0 %v5575_v23  ;;  %v6378_v59 = vld [vmem:[#allocation15 + $0x48] ss:$16 sps:$4 sm:$0xff]   ;;  %v6383_v23 = vld [vmem:[#allocation15 + $0x64] ss:$16 sps:$4 sm:$0xff]  }
 0x4a8   :  { %3211 = vmatprep.subr.bf16.mxu1 %v5582_v4  ;;  %3252 = vmatprep.subr.bf16.mxu0 %v5584_v25  ;;  %v6386_v4 = vld [vmem:[#allocation15 + $0x6c] ss:$16 sps:$4 sm:$0xff]   ;;  %v6381_v25 = vld [vmem:[#allocation15 + $0x60] ss:$16 sps:$4 sm:$0xff]  }
 0x4ab   :  { %3212 = vmatpush1.bf16.msra.mxu1 %v5581_v32  ;;  %3253 = vmatpush1.bf16.msra.mxu0 %v5583_v34  ;;  %v6395_v32 = vld [vmem:[#allocation15 + $0xa4] ss:$16 sps:$4 sm:$0xff]   ;;  %v6398_v34 = vld [vmem:[#allocation15 + $0xac] ss:$16 sps:$4 sm:$0xff]  }
 0x4ac   :  { %3213 = vmatprep.subr.bf16.mxu1 %v5590_v36  ;;  %3254 = vmatprep.subr.bf16.mxu0 %v5592_v37  ;;  %v6393_v36 = vld [vmem:[#allocation15 + $0xa0] ss:$16 sps:$4 sm:$0xff]   ;;  %v6396_v37 = vld [vmem:[#allocation15 + $0xa8] ss:$16 sps:$4 sm:$0xff]  }
 0x4af   :  { %3214 = vmatpush1.bf16.msra.mxu1 %v5589_v42  ;;  %3255 = vmatpush1.bf16.msra.mxu0 %v5591_v43  ;;  %v6407_v42 = vld [vmem:[#allocation15 + $0xe4] ss:$16 sps:$4 sm:$0xff]   ;;  %v6410_v43 = vld [vmem:[#allocation15 + $0xec] ss:$16 sps:$4 sm:$0xff]  }
 0x4b0   :  { %3215 = vmatprep.subr.bf16.mxu1 %v5598_v44  ;;  %3256 = vmatprep.subr.bf16.mxu0 %v5600_v63  ;;  %v6405_v44 = vld [vmem:[#allocation15 + $0xe0] ss:$16 sps:$4 sm:$0xff]   ;;  %v6408_v63 = vld [vmem:[#allocation15 + $0xe8] ss:$16 sps:$4 sm:$0xff]  }
 0x4b3   :  { %3216 = vmatpush1.bf16.msra.mxu1 %v5597_v50  ;;  %3257 = vmatpush1.bf16.msra.mxu0 %v5599_v52  ;;  %v6419_v50 = vld [vmem:[#allocation15 + $0x124] ss:$16 sps:$4 sm:$0xff]   ;;  %v6422_v52 = vld [vmem:[#allocation15 + $0x12c] ss:$16 sps:$4 sm:$0xff]  }
 0x4b4   :  { %3217 = vmatprep.subr.bf16.mxu1 %v5606_v53  ;;  %3258 = vmatprep.subr.bf16.mxu0 %v5608_v54  ;;  %v6417_v53 = vld [vmem:[#allocation15 + $0x120] ss:$16 sps:$4 sm:$0xff]   ;;  %v6420_v54 = vld [vmem:[#allocation15 + $0x128] ss:$16 sps:$4 sm:$0xff]  }
 0x4b7   :  { %3218 = vmatpush1.bf16.msra.mxu1 %v5605_v57  ;;  %3259 = vmatpush1.bf16.msra.mxu0 %v5607_v58  ;;  %v6431_v57 = vld [vmem:[#allocation15 + $0x164] ss:$16 sps:$4 sm:$0xff]   ;;  %v6434_v58 = vld [vmem:[#allocation15 + $0x16c] ss:$16 sps:$4 sm:$0xff]  }
 0x4b8   :  { %3219 = vmatprep.subr.bf16.mxu1 %v5614_v61  ;;  %3260 = vmatprep.subr.bf16.mxu0 %v5616_v62  ;;  %v6429_v61 = vld [vmem:[#allocation15 + $0x160] ss:$16 sps:$4 sm:$0xff]   ;;  %v6432_v62 = vld [vmem:[#allocation15 + $0x168] ss:$16 sps:$4 sm:$0xff]  }
 0x4bb   :  { %3220 = vmatpush1.bf16.msra.mxu1 %v5613_v6  ;;  %3261 = vmatpush1.bf16.msra.mxu0 %v5615_v7  ;;  %v6443_v6 = vld [vmem:[#allocation15 + $0x1a4] ss:$16 sps:$4 sm:$0xff]   ;;  %v6446_v7 = vld [vmem:[#allocation15 + $0x1ac] ss:$16 sps:$4 sm:$0xff]  }
 0x4bc   :  { %3221 = vmatprep.subr.bf16.mxu1 %v5622_v8  ;;  %3262 = vmatprep.subr.bf16.mxu0 %v5624_v9  ;;  %v6441_v8 = vld [vmem:[#allocation15 + $0x1a0] ss:$16 sps:$4 sm:$0xff]   ;;  %v6444_v9 = vld [vmem:[#allocation15 + $0x1a8] ss:$16 sps:$4 sm:$0xff]  }
 0x4bf   :  { %3222 = vmatpush1.bf16.msra.mxu1 %v5621_v10  ;;  %3263 = vmatpush1.bf16.msra.mxu0 %v5623_v11  ;;  %v6449_v10 = vld [vmem:[#allocation15 + $0x1c4] ss:$16 sps:$4 sm:$0xff]   ;;  %v6452_v11 = vld [vmem:[#allocation15 + $0x1cc] ss:$16 sps:$4 sm:$0xff]  }
 0x4c0   :  { %4913 = vmatprep.subr.bf16.mxu1 %v6365_v12  ;;  %5077 = vmatprep.subr.bf16.mxu0 %v6368_v13  ;;  %v6447_v12 = vld [vmem:[#allocation15 + $0x1c0] ss:$16 sps:$4 sm:$0xff]   ;;  %v6450_v13 = vld [vmem:[#allocation15 + $0x1c8] ss:$16 sps:$4 sm:$0xff]  }
 0x4c2   :  { %3240 = vmatmul.mubr.bf16.vlgmr.msra.gmra.mrb[36].mxu1 %v7235_v17  ;;  %3281 = vmatmul.mubr.bf16.vlgmr.msra.gmra.mrb[40].mxu0 %v7235_v17  ;;  %v6384_v17 = vld [vmem:[#allocation15 + $0x68] ss:$16 sps:$4 sm:$0xff]  }
 0x4c3   :  { %4914 = vmatpush1.bf16.msra.mxu1 %v6363_v14  ;;  %5078 = vmatpush1.bf16.msra.mxu0 %v6366_v15  ;;  %v6455_v14 = vld [vmem:[#allocation15 + $0x1e4] ss:$16 sps:$4 sm:$0xff]   ;;  %v6458_v15 = vld [vmem:[#allocation15 + $0x1ec] ss:$16 sps:$4 sm:$0xff]  }
 0x4c4   :  { %4915 = vmatprep.subr.bf16.mxu1 %v6371_v16  ;;  %5079 = vmatprep.subr.bf16.mxu0 %v6374_v18  ;;  %v6453_v16 = vld [vmem:[#allocation15 + $0x1e0] ss:$16 sps:$4 sm:$0xff]   ;;  %v6456_v18 = vld [vmem:[#allocation15 + $0x1e8] ss:$16 sps:$4 sm:$0xff]  }
 0x4c7   :  { %4916 = vmatpush1.bf16.msra.mxu1 %v6369_v60  ;;  %5080 = vmatpush1.bf16.msra.mxu0 %v6372_v19  ;;  %v6461_v60 = vld [vmem:[#allocation15 + $0x204] ss:$16 sps:$4 sm:$0xff]   ;;  %v6464_v19 = vld [vmem:[#allocation15 + $0x20c] ss:$16 sps:$4 sm:$0xff]  }
 0x4c8   :  { %4917 = vmatprep.subr.bf16.mxu1 %v6377_v20  ;;  %5081 = vmatprep.subr.bf16.mxu0 %v6380_v21 }
 0x4cb   :  { %4918 = vmatpush1.bf16.msra.mxu1 %v6375_v22  ;;  %5082 = vmatpush1.bf16.msra.mxu0 %v6378_v59 }
 0x4cc   :  { %4919 = vmatprep.subr.bf16.mxu1 %v6383_v23  ;;  %5083 = vmatprep.subr.bf16.mxu0 %v6386_v4 }
 0x4cf   :  { %4920 = vmatpush1.bf16.msra.mxu1 %v6381_v25  ;;  %5084 = vmatpush1.bf16.msra.mxu0 %v6384_v17 }
 0x4d0   :  { %4921 = vmatprep.subr.bf16.mxu1 %v6389_v26  ;;  %5085 = vmatprep.subr.bf16.mxu0 %v6392_v27 }
 0x4d3   :  { %4922 = vmatpush1.bf16.msra.mxu1 %v6387_v28  ;;  %5086 = vmatpush1.bf16.msra.mxu0 %v6390_v30 }
 0x4d4   :  { %4923 = vmatprep.subr.bf16.mxu1 %v6395_v32  ;;  %5087 = vmatprep.subr.bf16.mxu0 %v6398_v34 }
 0x4d7   :  { %4924 = vmatpush1.bf16.msra.mxu1 %v6393_v36  ;;  %5088 = vmatpush1.bf16.msra.mxu0 %v6396_v37 }
 0x4d8   :  { %4925 = vmatprep.subr.bf16.mxu1 %v6401_v38  ;;  %5089 = vmatprep.subr.bf16.mxu0 %v6404_v39  ;;  %v7251_v38 = vld [vmem:[#allocation9 + $0x14] sm:$0xff] }
 0x4d9   :  { %v3294_v39 = vrot.slane %v7251_v38, %v7162_v33 }
 0x4db   :  { %4926 = vmatpush1.bf16.msra.mxu1 %v6399_v40  ;;  %5090 = vmatpush1.bf16.msra.mxu0 %v6402_v41  ;;  %v3302_v40 = vrot.slane %v7251_v38, %v7165_v35 }
 0x4dc   :  { %4927 = vmatprep.subr.bf16.mxu1 %v6407_v42  ;;  %5091 = vmatprep.subr.bf16.mxu0 %v6410_v43  ;;  %v3298_v43 = vrot.slane %v7251_v38, %v7156_v29 }
 0x4df   :  { %4928 = vmatpush1.bf16.msra.mxu1 %v6405_v44  ;;  %5092 = vmatpush1.bf16.msra.mxu0 %v6408_v63  ;;  %v3306_v44 = vrot.slane %v7251_v38, %v7159_v31 }
 0x4e0   :  { %4929 = vmatprep.subr.bf16.mxu1 %v6413_v45  ;;  %5093 = vmatprep.subr.bf16.mxu0 %v6416_v46 }
 0x4e3   :  { %4930 = vmatpush1.bf16.msra.mxu1 %v6411_v47  ;;  %5094 = vmatpush1.bf16.msra.mxu0 %v6414_v49 }
 0x4e4   :  { %4931 = vmatprep.subr.bf16.mxu1 %v6419_v50  ;;  %5095 = vmatprep.subr.bf16.mxu0 %v6422_v52 }
 0x4e7   :  { %4932 = vmatpush1.bf16.msra.mxu1 %v6417_v53  ;;  %5096 = vmatpush1.bf16.msra.mxu0 %v6420_v54 }
 0x4e8   :  { %4933 = vmatprep.subr.bf16.mxu1 %v6425_v55  ;;  %5097 = vmatprep.subr.bf16.mxu0 %v6428_v48 }
 0x4eb   :  { %4934 = vmatpush1.bf16.msra.mxu1 %v6423_v51  ;;  %5098 = vmatpush1.bf16.msra.mxu0 %v6426_v56 }
 0x4ec   :  { %4935 = vmatprep.subr.bf16.mxu1 %v6431_v57  ;;  %5099 = vmatprep.subr.bf16.mxu0 %v6434_v58 }
 0x4ef   :  { %4936 = vmatpush1.bf16.msra.mxu1 %v6429_v61  ;;  %5100 = vmatpush1.bf16.msra.mxu0 %v6432_v62 }
 0x4f0   :  { %4937 = vmatprep.subr.bf16.mxu1 %v6437_v0  ;;  %5101 = vmatprep.subr.bf16.mxu0 %v6440_v1  ;;  %v6459_v1 = vld [vmem:[#allocation15 + $0x200] ss:$16 sps:$4 sm:$0xff]  }
 0x4f3   :  { %4938 = vmatpush1.bf16.msra.mxu1 %v6435_v3  ;;  %5102 = vmatpush1.bf16.msra.mxu0 %v6438_v5  ;;  %v6462_v3 = vld [vmem:[#allocation15 + $0x208] ss:$16 sps:$4 sm:$0xff]  }
 0x4f4   :  { %4939 = vmatprep.subr.bf16.mxu1 %v6443_v6  ;;  %5103 = vmatprep.subr.bf16.mxu0 %v6446_v7  ;;  %v6467_v6 = vld [vmem:[#allocation15 + $0x224] ss:$16 sps:$4 sm:$0xff]   ;;  %v6470_v7 = vld [vmem:[#allocation15 + $0x22c] ss:$16 sps:$4 sm:$0xff]  }
 0x4f7   :  { %4940 = vmatpush1.bf16.msra.mxu1 %v6441_v8  ;;  %5104 = vmatpush1.bf16.msra.mxu0 %v6444_v9  ;;  %v6465_v9 = vld [vmem:[#allocation15 + $0x220] ss:$16 sps:$4 sm:$0xff]  }
 0x4f8   :  { %4941 = vmatprep.subr.bf16.mxu1 %v6449_v10  ;;  %5105 = vmatprep.subr.bf16.mxu0 %v6452_v11  ;;  %v6468_v10 = vld [vmem:[#allocation15 + $0x228] ss:$16 sps:$4 sm:$0xff]   ;;  %v6473_v11 = vld [vmem:[#allocation15 + $0x244] ss:$16 sps:$4 sm:$0xff]  }
 0x4fb   :  { %4942 = vmatpush1.bf16.msra.mxu1 %v6447_v12  ;;  %5106 = vmatpush1.bf16.msra.mxu0 %v6450_v13  ;;  %v6476_v12 = vld [vmem:[#allocation15 + $0x24c] ss:$16 sps:$4 sm:$0xff]   ;;  %v6471_v13 = vld [vmem:[#allocation15 + $0x240] ss:$16 sps:$4 sm:$0xff]  }
 0x4fc   :  { %4943 = vmatprep.subr.bf16.mxu1 %v6455_v14  ;;  %5107 = vmatprep.subr.bf16.mxu0 %v6458_v15  ;;  %v6474_v14 = vld [vmem:[#allocation15 + $0x248] ss:$16 sps:$4 sm:$0xff]   ;;  %v6479_v15 = vld [vmem:[#allocation15 + $0x264] ss:$16 sps:$4 sm:$0xff]  }
 0x4ff   :  { %4944 = vmatpush1.bf16.msra.mxu1 %v6453_v16  ;;  %5108 = vmatpush1.bf16.msra.mxu0 %v6456_v18  ;;  %v6482_v16 = vld [vmem:[#allocation15 + $0x26c] ss:$16 sps:$4 sm:$0xff]   ;;  %v6477_v18 = vld [vmem:[#allocation15 + $0x260] ss:$16 sps:$4 sm:$0xff]  }
 0x500   :  { %4954 = vmatprep.subr.bf16.mxu1 %v6461_v60  ;;  %5118 = vmatprep.subr.bf16.mxu0 %v6464_v19  ;;  %v6480_v60 = vld [vmem:[#allocation15 + $0x268] ss:$16 sps:$4 sm:$0xff]   ;;  %v6485_v19 = vld [vmem:[#allocation15 + $0x284] ss:$16 sps:$4 sm:$0xff]  }
 0x535   :  { %v2675_v20 = vpop.f32.mrb[24].mxu1  ;;  %v2716_v21 = vpop.f32.mrb[28].mxu0 }
 0x536   :  { %v2677_v22 = vpop.f32.mrb[25].mxu1  ;;  %v2718_v59 = vpop.f32.mrb[29].mxu0 }
 0x537   :  { %v2679_v23 = vpop.f32.mrb[26].mxu1  ;;  %v2720_v4 = vpop.f32.mrb[30].mxu0 }
 0x538   :  { %v2680_v25 = vpop.f32.mrb[27].mxu1  ;;  %v2721_v17 = vpop.f32.mrb[31].mxu0  ;;  %v6494_v23 = vld [vmem:[#allocation15 + $0x2ac] ss:$16 sps:$4 sm:$0xff]   ;;  %v3317_v4 = vsub.s32 6, %v7153_v24 }
 0x539   :  { %v6489_v25 = vld [vmem:[#allocation15 + $0x2a0] ss:$16 sps:$4 sm:$0xff]   ;;  %v6492_v17 = vld [vmem:[#allocation15 + $0x2a8] ss:$16 sps:$4 sm:$0xff]  }
 0x555   :  { %v7243_v26 = vpop.f32.mrb[28].mxu1  ;;  %v7245_v27 = vpop.f32.mrb[32].mxu0 }
 0x556   :  { %v7247_v28 = vpop.f32.mrb[29].mxu1  ;;  %v7249_v30 = vpop.f32.mrb[33].mxu0 }
 0x557   :  { %v2761_v32 = vpop.f32.mrb[30].mxu1  ;;  %v2802_v34 = vpop.f32.mrb[34].mxu0 }
 0x558   :  { %v2762_v36 = vpop.f32.mrb[31].mxu1  ;;  %v2803_v37 = vpop.f32.mrb[35].mxu0  ;;  %v3313_v32 = vsub.s32 5, %v7153_v24  ;;  %v3321_v34 = vsub.s32 7, %v7153_v24 }
 0x559   :  { %v6497_v36 = vld [vmem:[#allocation15 + $0x2c4] ss:$16 sps:$4 sm:$0xff]   ;;  %v6500_v37 = vld [vmem:[#allocation15 + $0x2cc] ss:$16 sps:$4 sm:$0xff]  }
 0x575   :  { %v3159_v41 = vpop.f32.mrb[32].mxu1  ;;  %v3200_v42 = vpop.f32.mrb[36].mxu0 }
 0x576   :  { %v3160_v63 = vadd.f32 %v3159_v41, %v2675_v20  ;;  %v3201_v45 = vadd.f32 %v3200_v42, %v2716_v21  ;;  %v3161_v46 = vpop.f32.mrb[33].mxu1  ;;  %v3202_v47 = vpop.f32.mrb[37].mxu0  ;;  %v6488_v20 = vld [vmem:[#allocation15 + $0x28c] ss:$16 sps:$4 sm:$0xff]   ;;  %v6483_v21 = vld [vmem:[#allocation15 + $0x280] ss:$16 sps:$4 sm:$0xff]  }
 0x577   :  { %v3162_v49 = vadd.f32 %v3161_v46, %v2677_v22  ;;  %v3203_v50 = vadd.f32 %v3202_v47, %v2718_v59  ;;  %v3163_v52 = vpop.f32.mrb[34].mxu1  ;;  %v3204_v53 = vpop.f32.mrb[38].mxu0  ;;  %v6486_v22 = vld [vmem:[#allocation15 + $0x288] ss:$16 sps:$4 sm:$0xff]   ;;  %v6491_v59 = vld [vmem:[#allocation15 + $0x2a4] ss:$16 sps:$4 sm:$0xff]  }
 0x578   :  { %v3331_v54 = vadd.f32 %v3294_v39, %v3160_v63  ;;  %v7261_v55 = vadd.f32 %v3302_v40, %v3201_v45  ;;  %v3164_v48 = vpop.f32.mrb[35].mxu1  ;;  %v3205_v51 = vpop.f32.mrb[39].mxu0  ;;  %v3310_v39 = vrot.slane %v7251_v38, %v163_v2  ;;  %v3318_v40 = vrot.slane %v7251_v38, %v3317_v4  ;;  %v6495_v63 = vld [vmem:[#allocation15 + $0x2c0] ss:$16 sps:$4 sm:$0xff]   ;;  %v6498_v45 = vld [vmem:[#allocation15 + $0x2c8] ss:$16 sps:$4 sm:$0xff]  }
 0x579   :  { %v3332_v56 = vadd.f32 %v3298_v43, %v3162_v49  ;;  %v3334_v57 = vadd.f32 %v3306_v44, %v3203_v50  ;;  %v3314_v43 = vrot.slane %v7251_v38, %v3313_v32  ;;  %v3322_v44 = vrot.slane %v7251_v38, %v3321_v34  ;;  %v6503_v2 = vld [vmem:[#allocation15 + $0x2e4] ss:$16 sps:$4 sm:$0xff]   ;;  %v6506_v50 = vld [vmem:[#allocation15 + $0x2ec] ss:$16 sps:$4 sm:$0xff]   ;;  %v6543_v4 = vld [vmem:[#allocation15 + $0x3c0] ss:$16 sps:$4 sm:$0xff]  }
 0x57a   :  { %v3339_v58 = vmax.f32 %v3331_v54, 0.0  ;;  %v6554_v32 = vld [vmem:[#allocation15 + $0x3ec] ss:$16 sps:$4 sm:$0xff]   ;;  %v6549_v34 = vld [vmem:[#allocation15 + $0x3e0] ss:$16 sps:$4 sm:$0xff]  }
 0x57b   :  { %v3340_v61 = vmax.f32 %v3332_v56, 0.0  ;;  %v3342_v62 = vmax.f32 %v3334_v57, 0.0 }
 0x57c   :  { %v3347_v5 = vpack.c.bf16 %v3339_v58, %v3339_v58  ;;  %v6501_v58 = vld [vmem:[#allocation15 + $0x2e0] ss:$16 sps:$4 sm:$0xff]  }
 0x57d   :  { %v3348_v0 = vpack.c.bf16 %v3340_v61, %v3340_v61  ;;  %v3350_v8 = vpack.c.bf16 %v3342_v62, %v3342_v62  ;;  %v6504_v61 = vld [vmem:[#allocation15 + $0x2e8] ss:$16 sps:$4 sm:$0xff]   ;;  %v6507_v62 = vld [vmem:[#allocation15 + $0x300] ss:$16 sps:$4 sm:$0xff]  }
 0x57f   :  { %4945 = vmatprep.mubr.bf16.mxu1 %v3348_v0  ;;  %5109 = vmatprep.mubr.bf16.mxu0 %v3348_v0  ;;  %v6510_v0 = vld [vmem:[#allocation15 + $0x308] ss:$16 sps:$4 sm:$0xff]  }
 0x580   :  { %4946 = vmatmul.mubr.bf16.vlgmr.msra.gmra.mrb[40].mxu1 %v3347_v5  ;;  %5110 = vmatmul.mubr.bf16.vlgmr.msra.gmra.mrb[44].mxu0 %v3347_v5  ;;  %v6513_v5 = vld [vmem:[#allocation15 + $0x320] ss:$16 sps:$4 sm:$0xff]  }
 0x581   :  { %4955 = vmatpush1.bf16.msra.mxu1 %v6459_v1  ;;  %5119 = vmatpush1.bf16.msra.mxu0 %v6462_v3  ;;  %v6515_v1 = vld [vmem:[#allocation15 + $0x324] ss:$16 sps:$4 sm:$0xff]   ;;  %v6518_v3 = vld [vmem:[#allocation15 + $0x32c] ss:$16 sps:$4 sm:$0xff]  }
 0x582   :  { %4986 = vmatprep.mubr.bf16.mxu1 %v3350_v8  ;;  %5150 = vmatprep.mubr.bf16.mxu0 %v3350_v8  ;;  %v6524_v8 = vld [vmem:[#allocation15 + $0x34c] ss:$16 sps:$4 sm:$0xff]  }
 0x583   :  { %4956 = vmatprep.subr.bf16.mxu1 %v6467_v6  ;;  %5120 = vmatprep.subr.bf16.mxu0 %v6470_v7  ;;  %v6516_v6 = vld [vmem:[#allocation15 + $0x328] ss:$16 sps:$4 sm:$0xff]   ;;  %v6521_v7 = vld [vmem:[#allocation15 + $0x344] ss:$16 sps:$4 sm:$0xff]  }
 0x585   :  { %4957 = vmatpush1.bf16.msra.mxu1 %v6465_v9  ;;  %5121 = vmatpush1.bf16.msra.mxu0 %v6468_v10  ;;  %v6519_v9 = vld [vmem:[#allocation15 + $0x340] ss:$16 sps:$4 sm:$0xff]   ;;  %v6522_v10 = vld [vmem:[#allocation15 + $0x348] ss:$16 sps:$4 sm:$0xff]  }
 0x586   :  { %4958 = vmatprep.subr.bf16.mxu1 %v6473_v11  ;;  %5122 = vmatprep.subr.bf16.mxu0 %v6476_v12  ;;  %v6527_v11 = vld [vmem:[#allocation15 + $0x364] ss:$16 sps:$4 sm:$0xff]   ;;  %v6530_v12 = vld [vmem:[#allocation15 + $0x36c] ss:$16 sps:$4 sm:$0xff]  }
 0x589   :  { %4959 = vmatpush1.bf16.msra.mxu1 %v6471_v13  ;;  %5123 = vmatpush1.bf16.msra.mxu0 %v6474_v14  ;;  %v6525_v13 = vld [vmem:[#allocation15 + $0x360] ss:$16 sps:$4 sm:$0xff]   ;;  %v6528_v14 = vld [vmem:[#allocation15 + $0x368] ss:$16 sps:$4 sm:$0xff]  }
 0x58a   :  { %4960 = vmatprep.subr.bf16.mxu1 %v6479_v15  ;;  %5124 = vmatprep.subr.bf16.mxu0 %v6482_v16  ;;  %v6533_v15 = vld [vmem:[#allocation15 + $0x384] ss:$16 sps:$4 sm:$0xff]   ;;  %v6536_v16 = vld [vmem:[#allocation15 + $0x38c] ss:$16 sps:$4 sm:$0xff]  }
 0x58d   :  { %4961 = vmatpush1.bf16.msra.mxu1 %v6477_v18  ;;  %5125 = vmatpush1.bf16.msra.mxu0 %v6480_v60  ;;  %v6531_v18 = vld [vmem:[#allocation15 + $0x380] ss:$16 sps:$4 sm:$0xff]   ;;  %v6534_v60 = vld [vmem:[#allocation15 + $0x388] ss:$16 sps:$4 sm:$0xff]  }
 0x58e   :  { %4962 = vmatprep.subr.bf16.mxu1 %v6485_v19  ;;  %5126 = vmatprep.subr.bf16.mxu0 %v6488_v20  ;;  %v6539_v19 = vld [vmem:[#allocation15 + $0x3a4] ss:$16 sps:$4 sm:$0xff]   ;;  %v6542_v20 = vld [vmem:[#allocation15 + $0x3ac] ss:$16 sps:$4 sm:$0xff]  }
 0x591   :  { %4963 = vmatpush1.bf16.msra.mxu1 %v6483_v21  ;;  %5127 = vmatpush1.bf16.msra.mxu0 %v6486_v22  ;;  %v6537_v21 = vld [vmem:[#allocation15 + $0x3a0] ss:$16 sps:$4 sm:$0xff]   ;;  %v6540_v22 = vld [vmem:[#allocation15 + $0x3a8] ss:$16 sps:$4 sm:$0xff]  }
 0x592   :  { %4964 = vmatprep.subr.bf16.mxu1 %v6491_v59  ;;  %5128 = vmatprep.subr.bf16.mxu0 %v6494_v23  ;;  %v6545_v59 = vld [vmem:[#allocation15 + $0x3c4] ss:$16 sps:$4 sm:$0xff]   ;;  %v6548_v23 = vld [vmem:[#allocation15 + $0x3cc] ss:$16 sps:$4 sm:$0xff]  }
 0x595   :  { %4965 = vmatpush1.bf16.msra.mxu1 %v6489_v25  ;;  %5129 = vmatpush1.bf16.msra.mxu0 %v6492_v17  ;;  %v3241_v41 = vpop.f32.mrb[36].mxu1  ;;  %v3282_v42 = vpop.f32.mrb[40].mxu0  ;;  %v6546_v25 = vld [vmem:[#allocation15 + $0x3c8] ss:$16 sps:$4 sm:$0xff]   ;;  %v6551_v17 = vld [vmem:[#allocation15 + $0x3e4] ss:$16 sps:$4 sm:$0xff]  }
 0x596   :  { %v3242_v46 = vadd.f32 %v3241_v41, %v7243_v26  ;;  %v3283_v47 = vadd.f32 %v3282_v42, %v7245_v27  ;;  %v3243_v49 = vpop.f32.mrb[37].mxu1  ;;  %v3284_v24 = vpop.f32.mrb[41].mxu0  ;;  %4966 = vmatprep.subr.bf16.mxu1 %v6497_v36  ;;  %5130 = vmatprep.subr.bf16.mxu0 %v6500_v37  ;;  %v6552_v36 = vld [vmem:[#allocation15 + $0x3e8] ss:$16 sps:$4 sm:$0xff]   ;;  %v3341_v37 = vmax.f32 %v7261_v55, 0.0 }
 0x597   :  { %v3244_v52 = vadd.f32 %v3243_v49, %v7247_v28  ;;  %v3285_v53 = vadd.f32 %v3284_v24, %v7249_v30  ;;  %v3245_v54 = vpop.f32.mrb[38].mxu1  ;;  %v3286_v48 = vpop.f32.mrb[42].mxu0  ;;  %v6509_v28 = vld [vmem:[#allocation15 + $0x304] ss:$16 sps:$4 sm:$0xff]   ;;  %v6512_v30 = vld [vmem:[#allocation15 + $0x30c] ss:$16 sps:$4 sm:$0xff]  }
 0x598   :  { %v7276_v51 = vadd.f32 %v3310_v39, %v3242_v46  ;;  %v7278_v38 = vadd.f32 %v3318_v40, %v3283_v47  ;;  %v3246_v56 = vpop.f32.mrb[39].mxu1  ;;  %v3287_v26 = vpop.f32.mrb[43].mxu0  ;;  %v6557_v39 = vld [vmem:[#allocation15 + $0x404] ss:$16 sps:$4 sm:$0xff]   ;;  %v6560_v40 = vld [vmem:[#allocation15 + $0x40c] ss:$16 sps:$4 sm:$0xff]  }
 0x599   :  { %v7280_v57 = vadd.f32 %v3314_v43, %v3244_v52  ;;  %v7282_v27 = vadd.f32 %v3322_v44, %v3285_v53  ;;  %4967 = vmatpush1.bf16.msra.mxu1 %v6495_v63  ;;  %5131 = vmatpush1.bf16.msra.mxu0 %v6498_v45  ;;  %v6555_v42 = vld [vmem:[#allocation15 + $0x400] ss:$16 sps:$4 sm:$0xff]   ;;  %v3349_v43 = vpack.c.bf16 %v3341_v37, %v3341_v37  ;;  %v6558_v44 = vld [vmem:[#allocation15 + $0x408] ss:$16 sps:$4 sm:$0xff]   ;;  %v6563_v45 = vld [vmem:[#allocation15 + $0x424] ss:$16 sps:$4 sm:$0xff]  }
 0x59a   :  { %4968 = vmatprep.subr.bf16.mxu1 %v6503_v2  ;;  %5132 = vmatprep.subr.bf16.mxu0 %v6506_v50  ;;  %v6566_v46 = vld [vmem:[#allocation15 + $0x42c] ss:$16 sps:$4 sm:$0xff]   ;;  %v6561_v55 = vld [vmem:[#allocation15 + $0x420] ss:$16 sps:$4 sm:$0xff]   ;;  %v6564_v47 = vld [vmem:[#allocation15 + $0x428] ss:$16 sps:$4 sm:$0xff]  }
 0x59b   :  { %v3344_v41 = vmax.f32 %v7280_v57, 0.0  ;;  %v6569_v49 = vld [vmem:[#allocation15 + $0x444] ss:$16 sps:$4 sm:$0xff]   ;;  %v6572_v24 = vld [vmem:[#allocation15 + $0x44c] ss:$16 sps:$4 sm:$0xff]  }
 0x59c   :  { %v6567_v2 = vld [vmem:[#allocation15 + $0x440] ss:$16 sps:$4 sm:$0xff]   ;;  %v6570_v50 = vld [vmem:[#allocation15 + $0x448] ss:$16 sps:$4 sm:$0xff]   ;;  %v6575_v52 = vld [vmem:[#allocation15 + $0x464] ss:$16 sps:$4 sm:$0xff]  }
 0x59d   :  { %4969 = vmatpush1.bf16.msra.mxu1 %v6501_v58  ;;  %5133 = vmatpush1.bf16.msra.mxu0 %v6504_v61  ;;  %v3352_v63 = vpack.c.bf16 %v3344_v41, %v3344_v41  ;;  %v6578_v53 = vld [vmem:[#allocation15 + $0x46c] ss:$16 sps:$4 sm:$0xff]   ;;  %v6573_v54 = vld [vmem:[#allocation15 + $0x460] ss:$16 sps:$4 sm:$0xff]   ;;  %v6576_v48 = vld [vmem:[#allocation15 + $0x468] ss:$16 sps:$4 sm:$0xff]  }
 0x59e   :  { %4970 = vmatprep.subr.bf16.mxu1 %v6509_v28  ;;  %5134 = vmatprep.subr.bf16.mxu0 %v6512_v30  ;;  %v6581_v56 = vld [vmem:[#allocation15 + $0x484] ss:$16 sps:$4 sm:$0xff]   ;;  %v6584_v26 = vld [vmem:[#allocation15 + $0x48c] ss:$16 sps:$4 sm:$0xff]   ;;  %v6579_v57 = vld [vmem:[#allocation15 + $0x480] ss:$16 sps:$4 sm:$0xff]  }
 0x59f   :  { %v6582_v58 = vld [vmem:[#allocation15 + $0x488] ss:$16 sps:$4 sm:$0xff]   ;;  %v6587_v61 = vld [vmem:[#allocation15 + $0x4a4] ss:$16 sps:$4 sm:$0xff]   ;;  %v6590_v28 = vld [vmem:[#allocation15 + $0x4ac] ss:$16 sps:$4 sm:$0xff]  }
 0x5a0   :  { %v6585_v30 = vld [vmem:[#allocation15 + $0x4a0] ss:$16 sps:$4 sm:$0xff]   ;;  %v6638_v37 = vld [vmem:[#allocation15 + $0x5ac] ss:$16 sps:$4 sm:$0xff]   ;;  %v6641_v41 = vld [vmem:[#allocation15 + $0x5c4] ss:$16 sps:$4 sm:$0xff]  }
 0x5a1   :  { %4971 = vmatpush1.bf16.msra.mxu1 %v6507_v62  ;;  %5135 = vmatpush1.bf16.msra.mxu0 %v6510_v0  ;;  %v6588_v62 = vld [vmem:[#allocation15 + $0x4a8] ss:$16 sps:$4 sm:$0xff]   ;;  %v6593_v0 = vld [vmem:[#allocation15 + $0x4c4] ss:$16 sps:$4 sm:$0xff]  }
 0x5a2   :  { %4972 = vmatprep.subr.bf16.mxu1 %v6515_v1  ;;  %5136 = vmatprep.subr.bf16.mxu0 %v6518_v3  ;;  %v6596_v1 = vld [vmem:[#allocation15 + $0x4cc] ss:$16 sps:$4 sm:$0xff]   ;;  %v6591_v3 = vld [vmem:[#allocation15 + $0x4c0] ss:$16 sps:$4 sm:$0xff]  }
 0x5a5   :  { %4973 = vmatpush1.bf16.msra.mxu1 %v6513_v5  ;;  %5137 = vmatpush1.bf16.msra.mxu0 %v6516_v6  ;;  %v6594_v5 = vld [vmem:[#allocation15 + $0x4c8] ss:$16 sps:$4 sm:$0xff]   ;;  %v6599_v6 = vld [vmem:[#allocation15 + $0x4e4] ss:$16 sps:$4 sm:$0xff]  }
 0x5a6   :  { %4974 = vmatprep.subr.bf16.mxu1 %v6521_v7  ;;  %5138 = vmatprep.subr.bf16.mxu0 %v6524_v8  ;;  %v6602_v7 = vld [vmem:[#allocation15 + $0x4ec] ss:$16 sps:$4 sm:$0xff]   ;;  %v6597_v8 = vld [vmem:[#allocation15 + $0x4e0] ss:$16 sps:$4 sm:$0xff]  }
 0x5a9   :  { %4975 = vmatpush1.bf16.msra.mxu1 %v6519_v9  ;;  %5139 = vmatpush1.bf16.msra.mxu0 %v6522_v10  ;;  %v6600_v9 = vld [vmem:[#allocation15 + $0x4e8] ss:$16 sps:$4 sm:$0xff]   ;;  %v6605_v10 = vld [vmem:[#allocation15 + $0x504] ss:$16 sps:$4 sm:$0xff]  }
 0x5aa   :  { %4976 = vmatprep.subr.bf16.mxu1 %v6527_v11  ;;  %5140 = vmatprep.subr.bf16.mxu0 %v6530_v12  ;;  %v6608_v11 = vld [vmem:[#allocation15 + $0x50c] ss:$16 sps:$4 sm:$0xff]   ;;  %v6603_v12 = vld [vmem:[#allocation15 + $0x500] ss:$16 sps:$4 sm:$0xff]  }
 0x5ad   :  { %4977 = vmatpush1.bf16.msra.mxu1 %v6525_v13  ;;  %5141 = vmatpush1.bf16.msra.mxu0 %v6528_v14  ;;  %v6606_v13 = vld [vmem:[#allocation15 + $0x508] ss:$16 sps:$4 sm:$0xff]   ;;  %v6611_v14 = vld [vmem:[#allocation15 + $0x524] ss:$16 sps:$4 sm:$0xff]  }
 0x5ae   :  { %4978 = vmatprep.subr.bf16.mxu1 %v6533_v15  ;;  %5142 = vmatprep.subr.bf16.mxu0 %v6536_v16  ;;  %v6614_v15 = vld [vmem:[#allocation15 + $0x52c] ss:$16 sps:$4 sm:$0xff]   ;;  %v6609_v16 = vld [vmem:[#allocation15 + $0x520] ss:$16 sps:$4 sm:$0xff]  }
 0x5b1   :  { %4979 = vmatpush1.bf16.msra.mxu1 %v6531_v18  ;;  %5143 = vmatpush1.bf16.msra.mxu0 %v6534_v60  ;;  %v6612_v18 = vld [vmem:[#allocation15 + $0x528] ss:$16 sps:$4 sm:$0xff]   ;;  %v6617_v60 = vld [vmem:[#allocation15 + $0x544] ss:$16 sps:$4 sm:$0xff]  }
 0x5b2   :  { %4980 = vmatprep.subr.bf16.mxu1 %v6539_v19  ;;  %5144 = vmatprep.subr.bf16.mxu0 %v6542_v20  ;;  %v6620_v19 = vld [vmem:[#allocation15 + $0x54c] ss:$16 sps:$4 sm:$0xff]   ;;  %v6615_v20 = vld [vmem:[#allocation15 + $0x540] ss:$16 sps:$4 sm:$0xff]  }
 0x5b5   :  { %4981 = vmatpush1.bf16.msra.mxu1 %v6537_v21  ;;  %5145 = vmatpush1.bf16.msra.mxu0 %v6540_v22  ;;  %v6618_v21 = vld [vmem:[#allocation15 + $0x548] ss:$16 sps:$4 sm:$0xff]   ;;  %v6623_v22 = vld [vmem:[#allocation15 + $0x564] ss:$16 sps:$4 sm:$0xff]  }
 0x5b6   :  { %4982 = vmatprep.subr.bf16.mxu1 %v6545_v59  ;;  %5146 = vmatprep.subr.bf16.mxu0 %v6548_v23  ;;  %v6626_v59 = vld [vmem:[#allocation15 + $0x56c] ss:$16 sps:$4 sm:$0xff]   ;;  %v6621_v23 = vld [vmem:[#allocation15 + $0x560] ss:$16 sps:$4 sm:$0xff]  }
 0x5b9   :  { %4983 = vmatpush1.bf16.msra.mxu1 %v6543_v4  ;;  %5147 = vmatpush1.bf16.msra.mxu0 %v6546_v25  ;;  %v6624_v4 = vld [vmem:[#allocation15 + $0x568] ss:$16 sps:$4 sm:$0xff]   ;;  %v6629_v25 = vld [vmem:[#allocation15 + $0x584] ss:$16 sps:$4 sm:$0xff]  }
 0x5ba   :  { %4984 = vmatprep.subr.bf16.mxu1 %v6551_v17  ;;  %5148 = vmatprep.subr.bf16.mxu0 %v6554_v32  ;;  %v6632_v17 = vld [vmem:[#allocation15 + $0x58c] ss:$16 sps:$4 sm:$0xff]   ;;  %v6627_v32 = vld [vmem:[#allocation15 + $0x580] ss:$16 sps:$4 sm:$0xff]  }
 0x5bd   :  { %4985 = vmatpush1.bf16.msra.mxu1 %v6549_v34  ;;  %5149 = vmatpush1.bf16.msra.mxu0 %v6552_v36  ;;  %v6630_v34 = vld [vmem:[#allocation15 + $0x588] ss:$16 sps:$4 sm:$0xff]   ;;  %v6635_v36 = vld [vmem:[#allocation15 + $0x5a4] ss:$16 sps:$4 sm:$0xff]  }
 0x5be   :  { %4995 = vmatprep.subr.bf16.mxu1 %v6557_v39  ;;  %5159 = vmatprep.subr.bf16.mxu0 %v6560_v40  ;;  %v6633_v39 = vld [vmem:[#allocation15 + $0x5a0] ss:$16 sps:$4 sm:$0xff]   ;;  %v6636_v40 = vld [vmem:[#allocation15 + $0x5a8] ss:$16 sps:$4 sm:$0xff]  }
 0x5c0   :  { %4987 = vmatmul.mubr.bf16.vlgmr.msra.gmra.mrb[40].mxu1 %v3349_v43  ;;  %5151 = vmatmul.mubr.bf16.vlgmr.msra.gmra.mrb[44].mxu0 %v3349_v43  ;;  %v6639_v43 = vld [vmem:[#allocation15 + $0x5c0] ss:$16 sps:$4 sm:$0xff]  }
 0x5c1   :  { %4996 = vmatpush1.bf16.msra.mxu1 %v6555_v42  ;;  %5027 = vmatprep.mubr.bf16.mxu1 %v3352_v63  ;;  %v6644_v42 = vld [vmem:[#allocation15 + $0x5cc] ss:$16 sps:$4 sm:$0xff]  }
 0x5c2   :  { %5160 = vmatpush1.bf16.msra.mxu0 %v6558_v44  ;;  %5191 = vmatprep.mubr.bf16.mxu0 %v3352_v63  ;;  %v6642_v44 = vld [vmem:[#allocation15 + $0x5c8] ss:$16 sps:$4 sm:$0xff]   ;;  %v6647_v63 = vld [vmem:[#allocation15 + $0x5e4] ss:$16 sps:$4 sm:$0xff]  }
 0x5c3   :  { %4997 = vmatprep.subr.bf16.mxu1 %v6563_v45  ;;  %5161 = vmatprep.subr.bf16.mxu0 %v6566_v46  ;;  %v6650_v45 = vld [vmem:[#allocation15 + $0x5ec] ss:$16 sps:$4 sm:$0xff]   ;;  %v6645_v46 = vld [vmem:[#allocation15 + $0x5e0] ss:$16 sps:$4 sm:$0xff]  }
 0x5c5   :  { %4998 = vmatpush1.bf16.msra.mxu1 %v6561_v55  ;;  %v3343_v55 = vmax.f32 %v7276_v51, 0.0  ;;  %v6657_v51 = vld [vmem:[#allocation15 + $0x620] ss:$16 sps:$4 sm:$0xff]  }
 0x5c6   :  { %5162 = vmatpush1.bf16.msra.mxu0 %v6564_v47  ;;  %4999 = vmatprep.subr.bf16.mxu1 %v6569_v49  ;;  %v6648_v47 = vld [vmem:[#allocation15 + $0x5e8] ss:$16 sps:$4 sm:$0xff]   ;;  %v6653_v49 = vld [vmem:[#allocation15 + $0x604] ss:$16 sps:$4 sm:$0xff]  }
 0x5c7   :  { %5163 = vmatprep.subr.bf16.mxu0 %v6572_v24  ;;  %v6656_v24 = vld [vmem:[#allocation15 + $0x60c] ss:$16 sps:$4 sm:$0xff]  }
 0x5c9   :  { %5000 = vmatpush1.bf16.msra.mxu1 %v6567_v2  ;;  %v3346_v2 = vmax.f32 %v7282_v27, 0.0  ;;  %v6668_v27 = vld [vmem:[#allocation15 + $0x64c] ss:$16 sps:$4 sm:$0xff]  }
 0x5ca   :  { %5164 = vmatpush1.bf16.msra.mxu0 %v6570_v50  ;;  %5001 = vmatprep.subr.bf16.mxu1 %v6575_v52  ;;  %v6651_v50 = vld [vmem:[#allocation15 + $0x600] ss:$16 sps:$4 sm:$0xff]   ;;  %v3351_v52 = vpack.c.bf16 %v3343_v55, %v3343_v55 }
 0x5cb   :  { %5165 = vmatprep.subr.bf16.mxu0 %v6578_v53  ;;  %v6654_v53 = vld [vmem:[#allocation15 + $0x608] ss:$16 sps:$4 sm:$0xff]   ;;  %v6729_v55 = vld [vmem:[#allocation15 + $0x7a0] ss:$16 sps:$4 sm:$0xff]  }
 0x5cd   :  { %5002 = vmatpush1.bf16.msra.mxu1 %v6573_v54  ;;  %v6659_v54 = vld [vmem:[#allocation15 + $0x624] ss:$16 sps:$4 sm:$0xff]  }
 0x5ce   :  { %5166 = vmatpush1.bf16.msra.mxu0 %v6576_v48  ;;  %5003 = vmatprep.subr.bf16.mxu1 %v6581_v56  ;;  %v3354_v48 = vpack.c.bf16 %v3346_v2, %v3346_v2  ;;  %v6662_v56 = vld [vmem:[#allocation15 + $0x62c] ss:$16 sps:$4 sm:$0xff]   ;;  %v6735_v2 = vld [vmem:[#allocation15 + $0x7c0] ss:$16 sps:$4 sm:$0xff]  }
 0x5cf   :  { %5167 = vmatprep.subr.bf16.mxu0 %v6584_v26  ;;  %v6660_v26 = vld [vmem:[#allocation15 + $0x628] ss:$16 sps:$4 sm:$0xff]  }
 0x5d1   :  { %5004 = vmatpush1.bf16.msra.mxu1 %v6579_v57  ;;  %v6665_v57 = vld [vmem:[#allocation15 + $0x644] ss:$16 sps:$4 sm:$0xff]  }
 0x5d2   :  { %5168 = vmatpush1.bf16.msra.mxu0 %v6582_v58  ;;  %5005 = vmatprep.subr.bf16.mxu1 %v6587_v61  ;;  %v6663_v58 = vld [vmem:[#allocation15 + $0x640] ss:$16 sps:$4 sm:$0xff]   ;;  %v6666_v61 = vld [vmem:[#allocation15 + $0x648] ss:$16 sps:$4 sm:$0xff]  }
 0x5d3   :  { %5169 = vmatprep.subr.bf16.mxu0 %v6590_v28  ;;  %v6671_v28 = vld [vmem:[#allocation15 + $0x664] ss:$16 sps:$4 sm:$0xff]  }
 0x5d5   :  { %5006 = vmatpush1.bf16.msra.mxu1 %v6585_v30  ;;  %v6674_v30 = vld [vmem:[#allocation15 + $0x66c] ss:$16 sps:$4 sm:$0xff]  }
 0x5d6   :  { %5170 = vmatpush1.bf16.msra.mxu0 %v6588_v62  ;;  %5007 = vmatprep.subr.bf16.mxu1 %v6593_v0  ;;  %v6669_v62 = vld [vmem:[#allocation15 + $0x660] ss:$16 sps:$4 sm:$0xff]   ;;  %v6672_v0 = vld [vmem:[#allocation15 + $0x668] ss:$16 sps:$4 sm:$0xff]  }
 0x5d7   :  { %5171 = vmatprep.subr.bf16.mxu0 %v6596_v1  ;;  %v6677_v1 = vld [vmem:[#allocation15 + $0x684] ss:$16 sps:$4 sm:$0xff]  }
 0x5d9   :  { %5008 = vmatpush1.bf16.msra.mxu1 %v6591_v3  ;;  %v6680_v3 = vld [vmem:[#allocation15 + $0x68c] ss:$16 sps:$4 sm:$0xff]  }
 0x5da   :  { %5172 = vmatpush1.bf16.msra.mxu0 %v6594_v5  ;;  %5009 = vmatprep.subr.bf16.mxu1 %v6599_v6  ;;  %v6675_v5 = vld [vmem:[#allocation15 + $0x680] ss:$16 sps:$4 sm:$0xff]   ;;  %v6678_v6 = vld [vmem:[#allocation15 + $0x688] ss:$16 sps:$4 sm:$0xff]  }
 0x5db   :  { %5173 = vmatprep.subr.bf16.mxu0 %v6602_v7  ;;  %v6683_v7 = vld [vmem:[#allocation15 + $0x6a4] ss:$16 sps:$4 sm:$0xff]  }
 0x5dd   :  { %5010 = vmatpush1.bf16.msra.mxu1 %v6597_v8  ;;  %v6686_v8 = vld [vmem:[#allocation15 + $0x6ac] ss:$16 sps:$4 sm:$0xff]  }
 0x5de   :  { %5174 = vmatpush1.bf16.msra.mxu0 %v6600_v9  ;;  %5011 = vmatprep.subr.bf16.mxu1 %v6605_v10  ;;  %v6681_v9 = vld [vmem:[#allocation15 + $0x6a0] ss:$16 sps:$4 sm:$0xff]   ;;  %v6684_v10 = vld [vmem:[#allocation15 + $0x6a8] ss:$16 sps:$4 sm:$0xff]  }
 0x5df   :  { %5175 = vmatprep.subr.bf16.mxu0 %v6608_v11  ;;  %v6689_v11 = vld [vmem:[#allocation15 + $0x6c4] ss:$16 sps:$4 sm:$0xff]  }
 0x5e1   :  { %5012 = vmatpush1.bf16.msra.mxu1 %v6603_v12  ;;  %v6692_v12 = vld [vmem:[#allocation15 + $0x6cc] ss:$16 sps:$4 sm:$0xff]  }
 0x5e2   :  { %5176 = vmatpush1.bf16.msra.mxu0 %v6606_v13  ;;  %5013 = vmatprep.subr.bf16.mxu1 %v6611_v14  ;;  %v6687_v13 = vld [vmem:[#allocation15 + $0x6c0] ss:$16 sps:$4 sm:$0xff]   ;;  %v6690_v14 = vld [vmem:[#allocation15 + $0x6c8] ss:$16 sps:$4 sm:$0xff]  }
 0x5e3   :  { %5177 = vmatprep.subr.bf16.mxu0 %v6614_v15  ;;  %v6695_v15 = vld [vmem:[#allocation15 + $0x6e4] ss:$16 sps:$4 sm:$0xff]  }
 0x5e5   :  { %5014 = vmatpush1.bf16.msra.mxu1 %v6609_v16  ;;  %v6698_v16 = vld [vmem:[#allocation15 + $0x6ec] ss:$16 sps:$4 sm:$0xff]  }
 0x5e6   :  { %5178 = vmatpush1.bf16.msra.mxu0 %v6612_v18  ;;  %5015 = vmatprep.subr.bf16.mxu1 %v6617_v60  ;;  %v6693_v18 = vld [vmem:[#allocation15 + $0x6e0] ss:$16 sps:$4 sm:$0xff]   ;;  %v6696_v60 = vld [vmem:[#allocation15 + $0x6e8] ss:$16 sps:$4 sm:$0xff]  }
 0x5e7   :  { %5179 = vmatprep.subr.bf16.mxu0 %v6620_v19  ;;  %v6701_v19 = vld [vmem:[#allocation15 + $0x704] ss:$16 sps:$4 sm:$0xff]  }
 0x5e9   :  { %5016 = vmatpush1.bf16.msra.mxu1 %v6615_v20  ;;  %v6704_v20 = vld [vmem:[#allocation15 + $0x70c] ss:$16 sps:$4 sm:$0xff]  }
 0x5ea   :  { %5180 = vmatpush1.bf16.msra.mxu0 %v6618_v21  ;;  %5017 = vmatprep.subr.bf16.mxu1 %v6623_v22  ;;  %v6699_v21 = vld [vmem:[#allocation15 + $0x700] ss:$16 sps:$4 sm:$0xff]   ;;  %v6702_v22 = vld [vmem:[#allocation15 + $0x708] ss:$16 sps:$4 sm:$0xff]  }
 0x5eb   :  { %5181 = vmatprep.subr.bf16.mxu0 %v6626_v59  ;;  %v6707_v59 = vld [vmem:[#allocation15 + $0x724] ss:$16 sps:$4 sm:$0xff]  }
 0x5ed   :  { %5018 = vmatpush1.bf16.msra.mxu1 %v6621_v23  ;;  %v6710_v23 = vld [vmem:[#allocation15 + $0x72c] ss:$16 sps:$4 sm:$0xff]  }
 0x5ee   :  { %5182 = vmatpush1.bf16.msra.mxu0 %v6624_v4  ;;  %5019 = vmatprep.subr.bf16.mxu1 %v6629_v25  ;;  %v6705_v4 = vld [vmem:[#allocation15 + $0x720] ss:$16 sps:$4 sm:$0xff]   ;;  %v6708_v25 = vld [vmem:[#allocation15 + $0x728] ss:$16 sps:$4 sm:$0xff]  }
 0x5ef   :  { %5183 = vmatprep.subr.bf16.mxu0 %v6632_v17  ;;  %v6713_v17 = vld [vmem:[#allocation15 + $0x744] ss:$16 sps:$4 sm:$0xff]  }
 0x5f1   :  { %5020 = vmatpush1.bf16.msra.mxu1 %v6627_v32  ;;  %v6716_v32 = vld [vmem:[#allocation15 + $0x74c] ss:$16 sps:$4 sm:$0xff]  }
 0x5f2   :  { %5184 = vmatpush1.bf16.msra.mxu0 %v6630_v34  ;;  %5021 = vmatprep.subr.bf16.mxu1 %v6635_v36  ;;  %v6711_v34 = vld [vmem:[#allocation15 + $0x740] ss:$16 sps:$4 sm:$0xff]   ;;  %v6714_v36 = vld [vmem:[#allocation15 + $0x748] ss:$16 sps:$4 sm:$0xff]  }
 0x5f3   :  { %5185 = vmatprep.subr.bf16.mxu0 %v6638_v37  ;;  %v6719_v37 = vld [vmem:[#allocation15 + $0x764] ss:$16 sps:$4 sm:$0xff]  }
 0x5f5   :  { %5022 = vmatpush1.bf16.msra.mxu1 %v6633_v39  ;;  %v6722_v39 = vld [vmem:[#allocation15 + $0x76c] ss:$16 sps:$4 sm:$0xff]  }
 0x5f6   :  { %5186 = vmatpush1.bf16.msra.mxu0 %v6636_v40  ;;  %5023 = vmatprep.subr.bf16.mxu1 %v6641_v41  ;;  %v6717_v40 = vld [vmem:[#allocation15 + $0x760] ss:$16 sps:$4 sm:$0xff]   ;;  %v6720_v41 = vld [vmem:[#allocation15 + $0x768] ss:$16 sps:$4 sm:$0xff]  }
 0x5f7   :  { %5187 = vmatprep.subr.bf16.mxu0 %v6644_v42  ;;  %v6725_v42 = vld [vmem:[#allocation15 + $0x784] ss:$16 sps:$4 sm:$0xff]  }
 0x5f9   :  { %5024 = vmatpush1.bf16.msra.mxu1 %v6639_v43  ;;  %v6728_v43 = vld [vmem:[#allocation15 + $0x78c] ss:$16 sps:$4 sm:$0xff]  }
 0x5fa   :  { %5188 = vmatpush1.bf16.msra.mxu0 %v6642_v44  ;;  %5025 = vmatprep.subr.bf16.mxu1 %v6647_v63  ;;  %v6723_v44 = vld [vmem:[#allocation15 + $0x780] ss:$16 sps:$4 sm:$0xff]   ;;  %v6726_v63 = vld [vmem:[#allocation15 + $0x788] ss:$16 sps:$4 sm:$0xff]  }
 0x5fb   :  { %5189 = vmatprep.subr.bf16.mxu0 %v6650_v45  ;;  %v6731_v45 = vld [vmem:[#allocation15 + $0x7a4] ss:$16 sps:$4 sm:$0xff]  }
 0x5fd   :  { %5026 = vmatpush1.bf16.msra.mxu1 %v6645_v46  ;;  %v6734_v46 = vld [vmem:[#allocation15 + $0x7ac] ss:$16 sps:$4 sm:$0xff]  }
 0x5fe   :  { %5190 = vmatpush1.bf16.msra.mxu0 %v6648_v47  ;;  %5036 = vmatprep.subr.bf16.mxu1 %v6653_v49  ;;  %v6732_v47 = vld [vmem:[#allocation15 + $0x7a8] ss:$16 sps:$4 sm:$0xff]   ;;  %v6737_v49 = vld [vmem:[#allocation15 + $0x7c4] ss:$16 sps:$4 sm:$0xff]  }
 0x5ff   :  { %5200 = vmatprep.subr.bf16.mxu0 %v6656_v24  ;;  %v6740_v24 = vld [vmem:[#allocation15 + $0x7cc] ss:$16 sps:$4 sm:$0xff]  }
 0x600   :  { %5028 = vmatmul.mubr.bf16.vlgmr.msra.gmra.mrb[40].mxu1 %v3351_v52 }
 0x601   :  { %5192 = vmatmul.mubr.bf16.vlgmr.msra.gmra.mrb[44].mxu0 %v3351_v52  ;;  %5037 = vmatpush1.bf16.msra.mxu1 %v6651_v50  ;;  %v6738_v50 = vld [vmem:[#allocation15 + $0x7c8] ss:$16 sps:$4 sm:$0xff]   ;;  %v6743_v52 = vld [vmem:[#allocation15 + $0x7e4] ss:$16 sps:$4 sm:$0xff]  }
 0x602   :  { %5068 = vmatprep.mubr.bf16.mxu1 %v3354_v48  ;;  %5201 = vmatpush1.bf16.msra.mxu0 %v6654_v53  ;;  %v6746_v53 = vld [vmem:[#allocation15 + $0x7ec] ss:$16 sps:$4 sm:$0xff]  }
 0x603   :  { %5232 = vmatprep.mubr.bf16.mxu0 %v3354_v48  ;;  %5038 = vmatprep.subr.bf16.mxu1 %v6659_v54  ;;  %v6741_v54 = vld [vmem:[#allocation15 + $0x7e0] ss:$16 sps:$4 sm:$0xff]   ;;  %v3345_v48 = vmax.f32 %v7278_v38, 0.0 }
 0x604   :  { %5202 = vmatprep.subr.bf16.mxu0 %v6662_v56  ;;  %v6744_v56 = vld [vmem:[#allocation15 + $0x7e8] ss:$16 sps:$4 sm:$0xff]  }
 0x605   :  { %5039 = vmatpush1.bf16.msra.mxu1 %v6657_v51  ;;  %v3353_v51 = vpack.c.bf16 %v3345_v48, %v3345_v48 }
 0x606   :  { %5203 = vmatpush1.bf16.msra.mxu0 %v6660_v26  ;;  %5040 = vmatprep.subr.bf16.mxu1 %v6665_v57  ;;  %v3611_v26 = vld [vmem:[#allocation9 + $0x1c] sm:$0xf] }
 0x607   :  { %5204 = vmatprep.subr.bf16.mxu0 %v6668_v27  ;;  %v4896_v57 = vrot.slane %v3611_v26, %v7162_v33  ;;  %v5245_v27 = vld [vmem:[#allocation9 + $0x20] sm:$0xf] }
 0x609   :  { %5041 = vmatpush1.bf16.msra.mxu1 %v6663_v58  ;;  %v4904_v58 = vrot.slane %v3611_v26, %v7165_v35 }
 0x60a   :  { %5205 = vmatpush1.bf16.msra.mxu0 %v6666_v61  ;;  %5042 = vmatprep.subr.bf16.mxu1 %v6671_v28  ;;  %v4900_v61 = vrot.slane %v3611_v26, %v7156_v29  ;;  %v4908_v28 = vrot.slane %v3611_v26, %v7159_v31 }
 0x60b   :  { %5206 = vmatprep.subr.bf16.mxu0 %v6674_v30 }
 0x60d   :  { %5043 = vmatpush1.bf16.msra.mxu1 %v6669_v62  ;;  %v5250_v62 = vrot.slane %v5245_v27, %v7162_v33 }
 0x60e   :  { %5207 = vmatpush1.bf16.msra.mxu0 %v6672_v0  ;;  %5044 = vmatprep.subr.bf16.mxu1 %v6677_v1 }
 0x60f   :  { %5208 = vmatprep.subr.bf16.mxu0 %v6680_v3 }
 0x611   :  { %5045 = vmatpush1.bf16.msra.mxu1 %v6675_v5  ;;  %v5258_v5 = vrot.slane %v5245_v27, %v7165_v35 }
 0x612   :  { %5209 = vmatpush1.bf16.msra.mxu0 %v6678_v6  ;;  %5046 = vmatprep.subr.bf16.mxu1 %v6683_v7  ;;  %v5254_v7 = vrot.slane %v5245_v27, %v7156_v29 }
 0x613   :  { %5210 = vmatprep.subr.bf16.mxu0 %v6686_v8 }
 0x615   :  { %5047 = vmatpush1.bf16.msra.mxu1 %v6681_v9 }
 0x616   :  { %5211 = vmatpush1.bf16.msra.mxu0 %v6684_v10  ;;  %5048 = vmatprep.subr.bf16.mxu1 %v6689_v11 }
 0x617   :  { %5212 = vmatprep.subr.bf16.mxu0 %v6692_v12 }
 0x619   :  { %5049 = vmatpush1.bf16.msra.mxu1 %v6687_v13 }
 0x61a   :  { %5213 = vmatpush1.bf16.msra.mxu0 %v6690_v14  ;;  %5050 = vmatprep.subr.bf16.mxu1 %v6695_v15 }
 0x61b   :  { %5214 = vmatprep.subr.bf16.mxu0 %v6698_v16 }
 0x61d   :  { %5051 = vmatpush1.bf16.msra.mxu1 %v6693_v18  ;;  %v5262_v18 = vrot.slane %v5245_v27, %v7159_v31 }
 0x61e   :  { %5215 = vmatpush1.bf16.msra.mxu0 %v6696_v60  ;;  %5052 = vmatprep.subr.bf16.mxu1 %v6701_v19 }
 0x61f   :  { %5216 = vmatprep.subr.bf16.mxu0 %v6704_v20 }
 0x621   :  { %5053 = vmatpush1.bf16.msra.mxu1 %v6699_v21 }
 0x622   :  { %5217 = vmatpush1.bf16.msra.mxu0 %v6702_v22  ;;  %5054 = vmatprep.subr.bf16.mxu1 %v6707_v59 }
 0x623   :  { %5218 = vmatprep.subr.bf16.mxu0 %v6710_v23 }
 0x625   :  { %5055 = vmatpush1.bf16.msra.mxu1 %v6705_v4 }
 0x626   :  { %5219 = vmatpush1.bf16.msra.mxu0 %v6708_v25  ;;  %5056 = vmatprep.subr.bf16.mxu1 %v6713_v17  ;;  %v5282_v17 = vstv %s7320_s8 }
 0x627   :  { %5220 = vmatprep.subr.bf16.mxu0 %v6716_v32 }
 0x629   :  { %5057 = vmatpush1.bf16.msra.mxu1 %v6711_v34 }
 0x62a   :  { %5221 = vmatpush1.bf16.msra.mxu0 %v6714_v36  ;;  %5058 = vmatprep.subr.bf16.mxu1 %v6719_v37 }
 0x62b   :  { %5222 = vmatprep.subr.bf16.mxu0 %v6722_v39 }
 0x62d   :  { %5059 = vmatpush1.bf16.msra.mxu1 %v6717_v40 }
 0x62e   :  { %5223 = vmatpush1.bf16.msra.mxu0 %v6720_v41  ;;  %5060 = vmatprep.subr.bf16.mxu1 %v6725_v42 }
 0x62f   :  { %5224 = vmatprep.subr.bf16.mxu0 %v6728_v43 }
 0x631   :  { %5061 = vmatpush1.bf16.msra.mxu1 %v6723_v44 }
 0x632   :  { %5225 = vmatpush1.bf16.msra.mxu0 %v6726_v63  ;;  %5062 = vmatprep.subr.bf16.mxu1 %v6731_v45 }
 0x633   :  { %5226 = vmatprep.subr.bf16.mxu0 %v6734_v46 }
 0x635   :  { %5063 = vmatpush1.bf16.msra.mxu1 %v6729_v55 }
 0x636   :  { %5227 = vmatpush1.bf16.msra.mxu0 %v6732_v47  ;;  %5064 = vmatprep.subr.bf16.mxu1 %v6737_v49 }
 0x637   :  { %5228 = vmatprep.subr.bf16.mxu0 %v6740_v24 }
 0x639   :  { %5065 = vmatpush1.bf16.msra.mxu1 %v6735_v2 }
 0x63a   :  { %5229 = vmatpush1.bf16.msra.mxu0 %v6738_v50  ;;  %5066 = vmatprep.subr.bf16.mxu1 %v6743_v52 }
 0x63b   :  { %5230 = vmatprep.subr.bf16.mxu0 %v6746_v53 }
 0x63d   :  { %5067 = vmatpush1.bf16.msra.mxu1 %v6741_v54 }
 0x63e   :  { %5231 = vmatpush1.bf16.msra.mxu0 %v6744_v56 }
 0x640   :  { %5069 = vmatmul.mubr.bf16.vlgmr.msra.gmra.mrb[40].mxu1 %v3353_v51 }
 0x641   :  { %5233 = vmatmul.mubr.bf16.vlgmr.msra.gmra.mrb[44].mxu0 %v3353_v51 }
 0x713   :  { %v5070_v38 = vpop.f32.mrb[40].mxu1 }
 0x714   :  { %v6093_v30 = vadd.f32 %v5070_v38, %v4896_v57  ;;  %v5234_v0 = vpop.f32.mrb[44].mxu0  ;;  %v5072_v1 = vpop.f32.mrb[41].mxu1 }
 0x715   :  { %v6095_v3 = vadd.f32 %v5234_v0, %v4904_v58  ;;  %v6094_v6 = vadd.f32 %v5072_v1, %v4900_v61  ;;  %v5236_v8 = vpop.f32.mrb[45].mxu0  ;;  %v5074_v9 = vpop.f32.mrb[42].mxu1 }
 0x716   :  { %v5241_v10 = vmax.f32 %v6093_v30, 0.0  ;;  %v6096_v11 = vadd.f32 %v5236_v8, %v4908_v28  ;;  %v5238_v12 = vpop.f32.mrb[46].mxu0  ;;  %v5075_v13 = vpop.f32.mrb[43].mxu1 }
 0x717   :  { %v5243_v14 = vmax.f32 %v6095_v3, 0.0  ;;  %v5242_v15 = vmax.f32 %v6094_v6, 0.0  ;;  %v5239_v16 = vpop.f32.mrb[47].mxu0 }
 0x718   :  { %v5267_v33 = vmul.f32 %v5250_v62, %v5241_v10  ;;  %v5244_v60 = vmax.f32 %v6096_v11, 0.0 }
 0x719   :  { %v5269_v19 = vmul.f32 %v5258_v5, %v5243_v14  ;;  %v5268_v20 = vmul.f32 %v5254_v7, %v5242_v15 }
 0x71a   :  { %v5272_v35 = vsel %vm5271_vm1, %v5267_v33, 0.0  ;;  %v5270_v21 = vmul.f32 %v5262_v18, %v5244_v60 }
 0x71b   :  { %v5273_v22 = vsel %vm5271_vm1, %v5268_v20, 0.0  ;;  %v5275_v59 = vsel %vm5271_vm1, %v5269_v19, 0.0 }
 0x71c   :  { %v5274_v29 = vadd.f32 %v5273_v22, %v5272_v35  ;;  %v5277_v4 = vsel %vm5271_vm1, %v5270_v21, 0.0 }
 0x71e   :  { %v5276_v23 = vadd.f32 %v5275_v59, %v5274_v29 }
 0x720   :  { %v5278_v25 = vadd.f32 %v5277_v4, %v5276_v23 }
 0x722   :  { %5279 = vadd.xlane.f32.xlu0 %v5278_v25 }
 0x7af   :  { %v5280_v31 = vpop.xlane.xlu0 %5279 }
 0x7b0   :  { %v5283_v32 = vadd.f32 %v5282_v17, %v5280_v31 }
 0x7b2   :  { %5285 = vst.msk [vmem:[#allocation17] sm:$0x1] %vm5284_vm2, %v5283_v32 }
 0x7b3   :  { %6934 = shalt.err (!%p6931_p12)
}
 0x7b4   :  { %s6935_s25 = scalar_lea.hbm %s7321_s9, 16 }
 0x7b5   :  { %p6936_p13 = scmp.ne.s32.totalorder %s7321_s9, %s6935_s25  ;;  %p6939_p0 = scmp.lt.u32.totalorder %s6935_s25, %s7321_s9 }
 0x7b7   :  { %p6941_p1 = pnand %p6939_p0, %p6936_p13 }
 0x7b9   :  { %6944 = shalt.err (!%p6941_p1)
}
 0x7ba   :  { %5295 = dma.vmem_to_hbm [thread:$0]  %s5293_s16, 16, %s7321_s9, [#allocation5]  }
 0x7bb   :  { %6955 = dma.done.wait [#allocation5], 16  }
 0x7bc   :  { %6956 = vsyncadd [#allocation5], 4294967280 }
 0x7bd   :  { %5299 = vsyncpa [#allocation4], 1 }
 0x7be   :  { %5300 = vsyncpa [#allocation7], 1 }
 0x7bf   :  { %5301 = vsyncpa [#allocation10], 1 }
 0x7c0   :  { %5302 = vsyncpa [#allocation13], 1 }
 0x7c1   :  { %5303 = vsyncpa [#allocation16], 1 }
 0x7c2   :  { %5304 = vsyncpa [#allocation5], 1 }

</bundles_post_ra>
